<compile_context>
chip_gen: v7x
topology: tpu7x:2x2x1
jax: 0.10.0
libtpu: 0.0.40
codegen_flags: <defaults>
</compile_context>

<pallas_src>
import functools
import numpy as np
import jax
import jax.numpy as jnp
from jax.experimental import pallas as pl
from jax.experimental.pallas import tpu as pltpu

EPS = 1e-5
MXU_DTYPE = jnp.bfloat16            # MXU matmul input dtype (accumulation is f32)
VMEM_LIMIT_BYTES = 48 * 1024 * 1024  # safe on all generations; tune per chip
                                     # (~100 MiB on v5e/v6e, ~48 MiB on v7x)


# ----------------------------------------------------------------------------
# in-kernel helpers
# ----------------------------------------------------------------------------
def _fill_pad_rows(pad_ref, src_ref, ch0, row0, r, nR, TH,
                   scale=None, shift=None):
    """Fill pad_ref[:, :, ch0:ch0+Cs] with image rows [row0-1, row0+TH] of
    src_ref (zeros outside the image = conv padding), optionally applying a
    folded BatchNorm affine + ReLU to the data rows first (halo stays zero)."""
    _, W, Cs = src_ref.shape
    dt = pad_ref.dtype
    ch1 = ch0 + Cs

    def xform(v):
        if scale is None:
            return v.astype(dt)
        return jnp.maximum(v.astype(jnp.float32) * scale + shift, 0.0).astype(dt)

    # Left / right conv-halo columns (zeros), full tile height incl. corners.
    zcol = jnp.zeros((TH + 2, 1, Cs), dt)
    pad_ref[:, 0:1, ch0:ch1] = zcol
    pad_ref[:, W + 1:W + 2, ch0:ch1] = zcol

    # Interior rows of this tile.
    pad_ref[1:TH + 1, 1:W + 1, ch0:ch1] = xform(src_ref[pl.ds(row0, TH), :, :])

    zrow = jnp.zeros((1, W, Cs), dt)

    # Top halo row: image row row0-1, or conv zero-padding at the image top.
    @pl.when(r == 0)
    def _():
        pad_ref[0:1, 1:W + 1, ch0:ch1] = zrow

    @pl.when(r > 0)
    def _():
        pad_ref[0:1, 1:W + 1, ch0:ch1] = xform(src_ref[pl.ds(row0 - 1, 1), :, :])

    # Bottom halo row: image row row0+TH, or conv zero-padding at the bottom.
    @pl.when(r == nR - 1)
    def _():
        pad_ref[TH + 1:TH + 2, 1:W + 1, ch0:ch1] = zrow

    @pl.when(r < nR - 1)
    def _():
        pad_ref[TH + 1:TH + 2, 1:W + 1, ch0:ch1] = xform(
            src_ref[pl.ds(row0 + TH, 1), :, :])


def _conv3x3_dots(pad_ref, w_ref, TH, W, C):
    """3x3/pad-1 conv on the (TH+2, W+2, C) padded tile as 9 accumulating MXU
    dots on shifted windows (no im2col buffer is ever materialized)."""
    acc = None
    for k in range(9):
        ky, kx = divmod(k, 3)
        lhs = pad_ref[ky:ky + TH, kx:kx + W, :].reshape(TH * W, C)
        part = jnp.dot(lhs, w_ref[k * C:(k + 1) * C, :],
                       preferred_element_type=jnp.float32)
        acc = part if acc is None else acc + part
    return acc                                  # (TH*W, Cout) f32


# ----------------------------------------------------------------------------
# pass 1: concat fused into pad fill, conv1 (9 shifted dots), BN1 partial stats
# ----------------------------------------------------------------------------
def _conv1_stats_kernel(x2_ref, x1u_ref, w_ref, y_ref, st_ref, pad_ref):
    # x2_ref : (H, W, C2) bf16 skip connection (full image, resident over rows)
    # x1u_ref: (H, W, C1) bf16 upsampled+padded x1 (full image)
    # w_ref  : (9*(C2+C1), Cmid) bf16     y_ref: (TH, W, Cmid) bf16 pre-BN out
    # st_ref : (2, Cmid) f32 per-tile [sum; sum-of-squares]
    TH, W, Cmid = y_ref.shape
    C2 = x2_ref.shape[-1]
    C1 = x1u_ref.shape[-1]
    C = C2 + C1
    r = pl.program_id(1)
    nR = pl.num_programs(1)
    row0 = pl.multiple_of(r * TH, TH)

    # torch.cat([x2, x1_up], dim=1) fused into the pad fill (never hits HBM).
    _fill_pad_rows(pad_ref, x2_ref, 0, row0, r, nR, TH)
    _fill_pad_rows(pad_ref, x1u_ref, C2, row0, r, nR, TH)

    y = _conv3x3_dots(pad_ref, w_ref, TH, W, C)          # (TH*W, Cmid) f32
    yq = y.astype(y_ref.dtype)                           # bf16 for next pass
    y_ref[...] = yq.reshape(TH, W, Cmid)
    # BN1 partial stats, computed on the values pass 2 will actually normalize.
    yf = yq.astype(jnp.float32)
    st_ref[0:1, :] = jnp.sum(yf, axis=0, keepdims=True)
    st_ref[1:2, :] = jnp.sum(yf * yf, axis=0, keepdims=True)


# ----------------------------------------------------------------------------
# pass 2: BN1 affine + ReLU fused into pad fill, conv2, BN2 partial stats
# ----------------------------------------------------------------------------
def _conv2_stats_kernel(y1_ref, a_ref, c_ref, w_ref, y_ref, st_ref, pad_ref):
    TH, W, Cout = y_ref.shape
    Cm = y1_ref.shape[-1]
    r = pl.program_id(1)
    nR = pl.num_programs(1)
    row0 = pl.multiple_of(r * TH, TH)

    a = a_ref[...].reshape(1, 1, Cm)
    c = c_ref[...].reshape(1, 1, Cm)
    # BN1 affine + ReLU applied while filling the pad tile (halo stays zero).
    _fill_pad_rows(pad_ref, y1_ref, 0, row0, r, nR, TH, scale=a, shift=c)

    y = _conv3x3_dots(pad_ref, w_ref, TH, W, Cm)
    yq = y.astype(y_ref.dtype)
    y_ref[...] = yq.reshape(TH, W, Cout)
    yf = yq.astype(jnp.float32)
    st_ref[0:1, :] = jnp.sum(yf, axis=0, keepdims=True)
    st_ref[1:2, :] = jnp.sum(yf * yf, axis=0, keepdims=True)


# ----------------------------------------------------------------------------
# pass 3: BN2 affine + ReLU (memory-bound; reads bf16, writes f32)
# ----------------------------------------------------------------------------
def _bn_relu_kernel(y_ref, a_ref, c_ref, o_ref):
    C = o_ref.shape[-1]
    a = a_ref[...].reshape(1, 1, C)
    c = c_ref[...].reshape(1, 1, C)
    o_ref[...] = jnp.maximum(y_ref[...].astype(jnp.float32) * a + c, 0.0)


# ----------------------------------------------------------------------------
# host-side glue
# ----------------------------------------------------------------------------
def _bn_affine(partial_stats, count, gamma, beta):
    """Fold training-mode BatchNorm into a per-channel affine (scale, shift)."""
    s = jnp.sum(partial_stats, axis=(0, 1))          # (2, C) over all tiles
    mean = s[0] / count
    var = s[1] / count - mean * mean                 # biased variance
    scale = gamma * jax.lax.rsqrt(var + EPS)         # (1, C)
    shift = beta - mean * scale                      # (1, C)
    return scale.astype(jnp.float32), shift.astype(jnp.float32)


def _interp_matrix(n_in, n_out):
    """1-D bilinear interpolation matrix, align_corners=True (torch semantics)."""
    m = np.zeros((n_out, n_in), np.float32)
    if n_in == 1 or n_out == 1:
        m[:, 0] = 1.0
        return jnp.asarray(m)
    scale = (n_in - 1) / (n_out - 1)
    for q in range(n_out):
        src = q * scale
        i0 = min(int(np.floor(src)), n_in - 2)
        f = src - i0
        m[q, i0] += 1.0 - f
        m[q, i0 + 1] += f
    return jnp.asarray(m)


def _pick_row_tile(H, target=16):
    """Largest multiple-of-8 divisor of H up to `target`; whole image if none.
    Sweep `target` per generation (larger on v5e/v6e, smaller on v7x)."""
    cand = [t for t in range(8, min(H, target) + 1, 8) if H % t == 0]
    return max(cand) if cand else H


def up_forward(x1_nchw, x2_nchw, params, row_tile=None):
    """Pallas `Up` forward. Accepts/returns PyTorch-style NCHW float32."""
    w1, g1, b1, w2, g2, b2 = params
    N, C1, H1, W1 = x1_nchw.shape
    _, C2, H2, W2 = x2_nchw.shape
    Cin = C1 + C2
    Cmid = w1.shape[-1]
    Cout = w2.shape[-1]

    # ---- layout: NCHW -> NHWC (channels on the lane dim) ----
    x1 = jnp.transpose(x1_nchw, (0, 2, 3, 1)).astype(jnp.float32)
    x2 = jnp.transpose(x2_nchw, (0, 2, 3, 1))

    # ---- bilinear 2x upsample, align_corners=True, then F.pad to x2's size --
    # TODO(synk): fuse these two small interpolation matmuls into pass 1 so the
    # upsampled map never round-trips HBM; it is stored bf16 here (it only
    # feeds a bf16 MXU matmul) which already halves its traffic.
    Hu, Wu = 2 * H1, 2 * W1
    Ah = _interp_matrix(H1, Hu)
    Aw = _interp_matrix(W1, Wu)
    x1u = jnp.einsum('ph,nhwc->npwc', Ah, x1)
    x1u = jnp.einsum('qw,npwc->npqc', Aw, x1u)
    dY, dX = H2 - Hu, W2 - Wu
    x1u = jnp.pad(x1u, ((0, 0), (dY // 2, dY - dY // 2),
                        (dX // 2, dX - dX // 2), (0, 0)))

    # Kernel activations in bf16: the convs consume bf16 on the MXU anyway
    # (f32 accumulation), so this halves HBM/VMEM traffic at no precision cost.
    x1u = x1u.astype(MXU_DTYPE)
    x2 = x2.astype(MXU_DTYPE)

    # Conv weights as (9*Cin, Cout) tap-major slabs in bf16 (matches the
    # shifted-window dot ordering in _conv3x3_dots).
    w1f = w1.reshape(9 * Cin, Cmid).astype(MXU_DTYPE)
    w2f = w2.reshape(9 * Cmid, Cout).astype(MXU_DTYPE)

    # ---- row tiling ----
    TH = row_tile if row_tile is not None else _pick_row_tile(H2)
    if TH > H2 or H2 % TH != 0:
        TH = H2
    nR = H2 // TH
    M = N * H2 * W2

    # Both grid axes are independent per step: batch for megacore sharding,
    # rows for pipeline depth / bounded per-step VMEM.
    cparams = pltpu.CompilerParams(
        dimension_semantics=("parallel", "parallel"),
        vmem_limit_bytes=VMEM_LIMIT_BYTES)

    # ---- pass 1: conv1 (9 shifted-window MXU dots) + BN1 partial stats ----
    y1, st1 = pl.pallas_call(
        _conv1_stats_kernel,
        grid=(N, nR),
        in_specs=[
            pl.BlockSpec((None, H2, W2, C2), lambda n, r: (n, 0, 0, 0)),
            pl.BlockSpec((None, H2, W2, C1), lambda n, r: (n, 0, 0, 0)),
            # TODO(synk): pipeline_mode=pl.Buffered(1) on this constant weight
            # slab (fetched once) to avoid double-buffering it on v7x.
            pl.BlockSpec((9 * Cin, Cmid), lambda n, r: (0, 0)),
        ],
        out_specs=[
            pl.BlockSpec((None, TH, W2, Cmid), lambda n, r: (n, r, 0, 0)),
            pl.BlockSpec((None, None, 2, Cmid), lambda n, r: (n, r, 0, 0)),
        ],
        out_shape=[
            jax.ShapeDtypeStruct((N, H2, W2, Cmid), MXU_DTYPE),
            jax.ShapeDtypeStruct((N, nR, 2, Cmid), jnp.float32),
        ],
        scratch_shapes=[pltpu.VMEM((TH + 2, W2 + 2, Cin), MXU_DTYPE)],
        compiler_params=cparams,
    )(x2, x1u, w1f)
    a1, c1 = _bn_affine(st1, M, g1, b1)

    # ---- pass 2: BN1 affine+ReLU fused into pad fill, conv2, BN2 stats ----
    y2, st2 = pl.pallas_call(
        _conv2_stats_kernel,
        grid=(N, nR),
        in_specs=[
            pl.BlockSpec((None, H2, W2, Cmid), lambda n, r: (n, 0, 0, 0)),
            pl.BlockSpec((1, Cmid), lambda n, r: (0, 0)),
            pl.BlockSpec((1, Cmid), lambda n, r: (0, 0)),
            pl.BlockSpec((9 * Cmid, Cout), lambda n, r: (0, 0)),
        ],
        out_specs=[
            pl.BlockSpec((None, TH, W2, Cout), lambda n, r: (n, r, 0, 0)),
            pl.BlockSpec((None, None, 2, Cout), lambda n, r: (n, r, 0, 0)),
        ],
        out_shape=[
            jax.ShapeDtypeStruct((N, H2, W2, Cout), MXU_DTYPE),
            jax.ShapeDtypeStruct((N, nR, 2, Cout), jnp.float32),
        ],
        scratch_shapes=[pltpu.VMEM((TH + 2, W2 + 2, Cmid), MXU_DTYPE)],
        compiler_params=cparams,
    )(y1, a1, c1, w2f)
    a2, c2 = _bn_affine(st2, M, g2, b2)

    # ---- pass 3: BN2 affine + ReLU ----
    # TODO(synk): in a full UNet, fold this affine into the next layer's pad
    # fill (as done for BN1 in pass 2) and hand the consumer NHWC directly to
    # drop this pass and the transpose round trip below.
    out_nhwc = pl.pallas_call(
        _bn_relu_kernel,
        grid=(N, nR),
        in_specs=[
            pl.BlockSpec((None, TH, W2, Cout), lambda n, r: (n, r, 0, 0)),
            pl.BlockSpec((1, Cout), lambda n, r: (0, 0)),
            pl.BlockSpec((1, Cout), lambda n, r: (0, 0)),
        ],
        out_specs=pl.BlockSpec((None, TH, W2, Cout), lambda n, r: (n, r, 0, 0)),
        out_shape=jax.ShapeDtypeStruct((N, H2, W2, Cout), jnp.float32),
        compiler_params=cparams,
    )(y2, a2, c2)

    # Back to PyTorch NCHW to match the module interface.
    return jnp.transpose(out_nhwc, (0, 3, 1, 2))


# ----------------------------------------------------------------------------
# pure-JAX/XLA reference (identical semantics, independent code path)
# ----------------------------------------------------------------------------
def _bilinear_up_ref(x_nchw, Ho, Wo):
    """align_corners=True bilinear resize (matches nn.Upsample semantics)."""
    N, C, H, W = x_nchw.shape
    ys = jnp.arange(Ho, dtype=jnp.float32) * ((H - 1) / max(Ho - 1, 1))
    xs = jnp.arange(Wo, dtype=jnp.float32) * ((W - 1) / max(Wo - 1, 1))
    y0 = jnp.clip(jnp.floor(ys), 0, max(H - 2, 0)).astype(jnp.int32)
    x0 = jnp.clip(jnp.floor(xs), 0, max(W - 2, 0)).astype(jnp.int32)
    y1i = jnp.minimum(y0 + 1, H - 1)
    x1i = jnp.minimum(x0 + 1, W - 1)
    fy = (ys - y0.astype(jnp.float32))[None, None, :, None]
    fx = (xs - x0.astype(jnp.float32))[None, None, None, :]
    top = x_nchw[:, :, y0, :] * (1.0 - fy) + x_nchw[:, :, y1i, :] * fy
    return top[:, :, :, x0] * (1.0 - fx) + top[:, :, :, x1i] * fx


def up_reference(x1_nchw, x2_nchw, params):
    w1, g1, b1, w2, g2, b2 = params
    _, _, H1, W1 = x1_nchw.shape
    H2, W2 = x2_nchw.shape[2], x2_nchw.shape[3]

    x1u = _bilinear_up_ref(x1_nchw, 2 * H1, 2 * W1)
    dY, dX = H2 - 2 * H1, W2 - 2 * W1
    x1u = jnp.pad(x1u, ((0, 0), (0, 0),
                        (dY // 2, dY - dY // 2), (dX // 2, dX - dX // 2)))
    x = jnp.concatenate([x2_nchw, x1u], axis=1)

    def conv_bn_relu(h, w, g, b):
        y = jax.lax.conv_general_dilated(
            h, w, window_strides=(1, 1), padding=((1, 1), (1, 1)),
            dimension_numbers=("NCHW", "HWIO", "NCHW"))
        mean = jnp.mean(y, axis=(0, 2, 3), keepdims=True)
        var = jnp.mean((y - mean) ** 2, axis=(0, 2, 3), keepdims=True)
        y = (y - mean) / jnp.sqrt(var + EPS) * g.reshape(1, -1, 1, 1) \
            + b.reshape(1, -1, 1, 1)
        return jnp.maximum(y, 0.0)

    h = conv_bn_relu(x, w1, g1, b1)
    return conv_bn_relu(h, w2, g2, b2)


def init_params(key, in_channels, out_channels):
    """Deterministic synthetic parameters (shapes as in Up.__init__)."""
    mid_channels = in_channels // 2   # DoubleConv(in, out, in // 2)
    k1, k2, k3, k4, k5, k6 = jax.random.split(key, 6)
    w1 = 0.1 * jax.random.normal(k1, (3, 3, in_channels, mid_channels), jnp.float32)
    g1 = 1.0 + 0.1 * jax.random.normal(k2, (1, mid_channels), jnp.float32)
    b1 = 0.1 * jax.random.normal(k3, (1, mid_channels), jnp.float32)
    w2 = 0.1 * jax.random.normal(k4, (3, 3, mid_channels, out_channels), jnp.float32)
    g2 = 1.0 + 0.1 * jax.random.normal(k5, (1, out_channels), jnp.float32)
    b2 = 0.1 * jax.random.normal(k6, (1, out_channels), jnp.float32)
    return (w1, g1, b1, w2, g2, b2)


if __name__ == "__main__":
    key = jax.random.PRNGKey(0)
    kp, ka, kb = jax.random.split(key, 3)

    # x1: low-res decoder feature map; x2: skip connection at 2x spatial size.
    N, C1, C2 = 2, 4, 4
    H1 = W1 = 8
    H2 = W2 = 16
    in_channels = C1 + C2           # channels after the concat
    out_channels = 8

    params = init_params(kp, in_channels, out_channels)
    x1 = jax.random.normal(ka, (N, C1, H1, W1), jnp.float32)   # NCHW
    x2 = jax.random.normal(kb, (N, C2, H2, W2), jnp.float32)   # NCHW

    # row_tile=8 -> 2 row tiles per image: exercises the halo handling.
    fwd = jax.jit(functools.partial(up_forward, row_tile=8))
    out = jax.block_until_ready(fwd(x1, x2, params))
    assert out.shape == (N, out_channels, H2, W2), out.shape

    ref = jax.block_until_ready(up_reference(x1, x2, params))
    # bf16 MXU inputs + bf16 inter-pass tensors (f32 accumulation / BN math)
    # vs. the pure-f32 XLA reference: BatchNorm renormalizes, so the error
    # stays small; tolerance retained from the previous version.
    if not jnp.allclose(out, ref, atol=5e-2, rtol=5e-2):
        max_err = float(jnp.max(jnp.abs(out - ref)))
        raise AssertionError(f"Pallas kernel mismatch vs reference, max |err|={max_err}")

    print("KERNEL_OK")
</pallas_src>

<mosaic_0001>
module attributes {stable_mosaic.version = 11 : i64} {
  func.func @_conv2_stats_kernel(%arg0: i32, %arg1: i32, %arg2: memref<1x16x16x4xbf16, #tpu.memory_space<vmem>>, %arg3: memref<1x4xf32, #tpu.memory_space<vmem>>, %arg4: memref<1x4xf32, #tpu.memory_space<vmem>>, %arg5: memref<36x8xbf16, #tpu.memory_space<vmem>>, %arg6: memref<1x8x16x8xbf16, #tpu.memory_space<vmem>>, %arg7: memref<1x1x2x8xf32, #tpu.memory_space<vmem>>, %arg8: memref<10x18x4xbf16, #tpu.memory_space<vmem>>) attributes {dimension_semantics = [#tpu.dimension_semantics<parallel>, #tpu.dimension_semantics<parallel>], iteration_bounds = array<i64: 2, 2>, scalar_prefetch = 0 : i64, scratch_operands = 1 : i64, tpu.core_type = #tpu.core_type<tc>, window_params = [{transform_indices = @transform_0, window_bounds = array<i64: 1, 16, 16, 4>}, {pipeline_mode = #tpu.pipeline_mode<synchronous>, transform_indices = @transform_1, window_bounds = array<i64: 1, 4>}, {pipeline_mode = #tpu.pipeline_mode<synchronous>, transform_indices = @transform_2, window_bounds = array<i64: 1, 4>}, {pipeline_mode = #tpu.pipeline_mode<synchronous>, transform_indices = @transform_3, window_bounds = array<i64: 36, 8>}, {transform_indices = @transform_4, window_bounds = array<i64: 1, 8, 16, 8>}, {transform_indices = @transform_5, window_bounds = array<i64: 1, 1, 2, 8>}]} {
    %c8_i32 = arith.constant 8 : i32
    %0 = arith.muli %arg1, %c8_i32 : i32
    %1 = tpu.assume_multiple %0, 8 : i32
    %c0 = arith.constant 0 : index
    %c0_0 = arith.constant 0 : index
    %2 = vector.load %arg3[%c0, %c0_0] : memref<1x4xf32, #tpu.memory_space<vmem>>, vector<1x4xf32>
    %3 = vector.shape_cast %2 : vector<1x4xf32> to vector<1x1x4xf32>
    %c0_1 = arith.constant 0 : index
    %c0_2 = arith.constant 0 : index
    %4 = vector.load %arg4[%c0_1, %c0_2] : memref<1x4xf32, #tpu.memory_space<vmem>>, vector<1x4xf32>
    %5 = vector.shape_cast %4 : vector<1x4xf32> to vector<1x1x4xf32>
    %cst = arith.constant 0.000000e+00 : bf16
    %6 = vector.broadcast %cst : bf16 to vector<10x1x4xbf16>
    %c0_3 = arith.constant 0 : index
    %c0_4 = arith.constant 0 : index
    %c0_5 = arith.constant 0 : index
    %7 = vector.load %arg8[%c0_3, %c0_4, %c0_5] : memref<10x18x4xbf16, #tpu.memory_space<vmem>>, vector<10x1x4xbf16>
    tpu.vector_store %arg8[%c0_3, %c0_4, %c0_5], %6 {strides = array<i32>} : memref<10x18x4xbf16, #tpu.memory_space<vmem>>, vector<10x1x4xbf16>,
    %c0_6 = arith.constant 0 : index
    %c17 = arith.constant 17 : index
    %c0_7 = arith.constant 0 : index
    %8 = vector.load %arg8[%c0_6, %c17, %c0_7] : memref<10x18x4xbf16, #tpu.memory_space<vmem>>, vector<10x1x4xbf16>
    tpu.vector_store %arg8[%c0_6, %c17, %c0_7], %6 {strides = array<i32>} : memref<10x18x4xbf16, #tpu.memory_space<vmem>>, vector<10x1x4xbf16>,
    %c0_8 = arith.constant 0 : index
    %9 = arith.index_cast %1 : i32 to index
    %c0_9 = arith.constant 0 : index
    %c0_10 = arith.constant 0 : index
    %10 = vector.load %arg2[%c0_8, %9, %c0_9, %c0_10] : memref<1x16x16x4xbf16, #tpu.memory_space<vmem>>, vector<1x8x16x4xbf16>
    %11 = vector.shape_cast %10 : vector<1x8x16x4xbf16> to vector<8x16x4xbf16>
    %12 = arith.extf %11 : vector<8x16x4xbf16> to vector<8x16x4xf32>
    %13 = vector.broadcast %3 : vector<1x1x4xf32> to vector<8x16x4xf32>
    %14 = arith.mulf %12, %13 : vector<8x16x4xf32>
    %15 = vector.broadcast %5 : vector<1x1x4xf32> to vector<8x16x4xf32>
    %16 = arith.addf %14, %15 : vector<8x16x4xf32>
    %cst_11 = arith.constant 0.000000e+00 : f32
    %17 = vector.broadcast %cst_11 : f32 to vector<8x16x4xf32>
    %18 = arith.maximumf %16, %17 : vector<8x16x4xf32>
    %19 = arith.truncf %18 : vector<8x16x4xf32> to vector<8x16x4xbf16>
    %c1 = arith.constant 1 : index
    %c1_12 = arith.constant 1 : index
    %c0_13 = arith.constant 0 : index
    %20 = vector.load %arg8[%c1, %c1_12, %c0_13] : memref<10x18x4xbf16, #tpu.memory_space<vmem>>, vector<8x16x4xbf16>
    tpu.vector_store %arg8[%c1, %c1_12, %c0_13], %19 {strides = array<i32>} : memref<10x18x4xbf16, #tpu.memory_space<vmem>>, vector<8x16x4xbf16>,
    %cst_14 = arith.constant 0.000000e+00 : bf16
    %21 = vector.broadcast %cst_14 : bf16 to vector<1x16x4xbf16>
    %c0_i32 = arith.constant 0 : i32
    %22 = arith.cmpi eq, %arg1, %c0_i32 : i32
    %23 = arith.extui %22 : i1 to i32
    %c0_i32_15 = arith.constant 0 : i32
    %24 = arith.cmpi ne, %23, %c0_i32_15 : i32
    scf.if %24 {
      %c0_80 = arith.constant 0 : index
      %c1_81 = arith.constant 1 : index
      %c0_82 = arith.constant 0 : index
      %95 = vector.load %arg8[%c0_80, %c1_81, %c0_82] : memref<10x18x4xbf16, #tpu.memory_space<vmem>>, vector<1x16x4xbf16>
      tpu.vector_store %arg8[%c0_80, %c1_81, %c0_82], %21 {strides = array<i32>} : memref<10x18x4xbf16, #tpu.memory_space<vmem>>, vector<1x16x4xbf16>,
    } else {
    }
    %c0_i32_16 = arith.constant 0 : i32
    %25 = arith.cmpi sgt, %arg1, %c0_i32_16 : i32
    %26 = arith.extui %25 : i1 to i32
    %c0_i32_17 = arith.constant 0 : i32
    %27 = arith.cmpi ne, %26, %c0_i32_17 : i32
    scf.if %27 {
      %c1_i32_80 = arith.constant 1 : i32
      %95 = arith.subi %1, %c1_i32_80 : i32
      %c0_81 = arith.constant 0 : index
      %96 = arith.index_cast %95 : i32 to index
      %c0_82 = arith.constant 0 : index
      %c0_83 = arith.constant 0 : index
      %97 = vector.load %arg2[%c0_81, %96, %c0_82, %c0_83] : memref<1x16x16x4xbf16, #tpu.memory_space<vmem>>, vector<1x1x16x4xbf16>
      %98 = vector.shape_cast %97 : vector<1x1x16x4xbf16> to vector<1x16x4xbf16>
      %99 = arith.extf %98 : vector<1x16x4xbf16> to vector<1x16x4xf32>
      %100 = vector.broadcast %3 : vector<1x1x4xf32> to vector<1x16x4xf32>
      %101 = arith.mulf %99, %100 : vector<1x16x4xf32>
      %102 = vector.broadcast %5 : vector<1x1x4xf32> to vector<1x16x4xf32>
      %103 = arith.addf %101, %102 : vector<1x16x4xf32>
      %cst_84 = arith.constant 0.000000e+00 : f32
      %104 = vector.broadcast %cst_84 : f32 to vector<1x16x4xf32>
      %105 = arith.maximumf %103, %104 : vector<1x16x4xf32>
      %106 = arith.truncf %105 : vector<1x16x4xf32> to vector<1x16x4xbf16>
      %c0_85 = arith.constant 0 : index
      %c1_86 = arith.constant 1 : index
      %c0_87 = arith.constant 0 : index
      %107 = vector.load %arg8[%c0_85, %c1_86, %c0_87] : memref<10x18x4xbf16, #tpu.memory_space<vmem>>, vector<1x16x4xbf16>
      tpu.vector_store %arg8[%c0_85, %c1_86, %c0_87], %106 {strides = array<i32>} : memref<10x18x4xbf16, #tpu.memory_space<vmem>>, vector<1x16x4xbf16>,
    } else {
    }
    %c1_i32 = arith.constant 1 : i32
    %28 = arith.cmpi eq, %arg1, %c1_i32 : i32
    %29 = arith.extui %28 : i1 to i32
    %c0_i32_18 = arith.constant 0 : i32
    %30 = arith.cmpi ne, %29, %c0_i32_18 : i32
    scf.if %30 {
      %c9 = arith.constant 9 : index
      %c1_80 = arith.constant 1 : index
      %c0_81 = arith.constant 0 : index
      %95 = vector.load %arg8[%c9, %c1_80, %c0_81] : memref<10x18x4xbf16, #tpu.memory_space<vmem>>, vector<1x16x4xbf16>
      tpu.vector_store %arg8[%c9, %c1_80, %c0_81], %21 {strides = array<i32>} : memref<10x18x4xbf16, #tpu.memory_space<vmem>>, vector<1x16x4xbf16>,
    } else {
    }
    %c1_i32_19 = arith.constant 1 : i32
    %31 = arith.cmpi slt, %arg1, %c1_i32_19 : i32
    %32 = arith.extui %31 : i1 to i32
    %c0_i32_20 = arith.constant 0 : i32
    %33 = arith.cmpi ne, %32, %c0_i32_20 : i32
    scf.if %33 {
      %c8_i32_80 = arith.constant 8 : i32
      %95 = arith.addi %1, %c8_i32_80 : i32
      %c0_81 = arith.constant 0 : index
      %96 = arith.index_cast %95 : i32 to index
      %c0_82 = arith.constant 0 : index
      %c0_83 = arith.constant 0 : index
      %97 = vector.load %arg2[%c0_81, %96, %c0_82, %c0_83] : memref<1x16x16x4xbf16, #tpu.memory_space<vmem>>, vector<1x1x16x4xbf16>
      %98 = vector.shape_cast %97 : vector<1x1x16x4xbf16> to vector<1x16x4xbf16>
      %99 = arith.extf %98 : vector<1x16x4xbf16> to vector<1x16x4xf32>
      %100 = vector.broadcast %3 : vector<1x1x4xf32> to vector<1x16x4xf32>
      %101 = arith.mulf %99, %100 : vector<1x16x4xf32>
      %102 = vector.broadcast %5 : vector<1x1x4xf32> to vector<1x16x4xf32>
      %103 = arith.addf %101, %102 : vector<1x16x4xf32>
      %cst_84 = arith.constant 0.000000e+00 : f32
      %104 = vector.broadcast %cst_84 : f32 to vector<1x16x4xf32>
      %105 = arith.maximumf %103, %104 : vector<1x16x4xf32>
      %106 = arith.truncf %105 : vector<1x16x4xf32> to vector<1x16x4xbf16>
      %c9 = arith.constant 9 : index
      %c1_85 = arith.constant 1 : index
      %c0_86 = arith.constant 0 : index
      %107 = vector.load %arg8[%c9, %c1_85, %c0_86] : memref<10x18x4xbf16, #tpu.memory_space<vmem>>, vector<1x16x4xbf16>
      tpu.vector_store %arg8[%c9, %c1_85, %c0_86], %106 {strides = array<i32>} : memref<10x18x4xbf16, #tpu.memory_space<vmem>>, vector<1x16x4xbf16>,
    } else {
    }
    %c0_21 = arith.constant 0 : index
    %c0_22 = arith.constant 0 : index
    %c0_23 = arith.constant 0 : index
    %34 = vector.load %arg8[%c0_21, %c0_22, %c0_23] : memref<10x18x4xbf16, #tpu.memory_space<vmem>>, vector<8x16x4xbf16>
    %35 = vector.shape_cast %34 : vector<8x16x4xbf16> to vector<128x4xbf16>
    %c0_24 = arith.constant 0 : index
    %c0_25 = arith.constant 0 : index
    %36 = vector.load %arg5[%c0_24, %c0_25] : memref<36x8xbf16, #tpu.memory_space<vmem>>, vector<4x8xbf16>
    %cst_26 = arith.constant dense<0.000000e+00> : vector<128x8xf32>
    %37 = tpu.matmul %35, %36, %cst_26 {dimension_numbers = #tpu.dot_dimension_numbers<[1], [0], [0], [1], [0, 0, 1, 1], [], []>} : vector<128x4xbf16>, vector<4x8xbf16>, vector<128x8xf32> -> vector<128x8xf32>
    %c0_27 = arith.constant 0 : index
    %c1_28 = arith.constant 1 : index
    %c0_29 = arith.constant 0 : index
    %38 = vector.load %arg8[%c0_27, %c1_28, %c0_29] : memref<10x18x4xbf16, #tpu.memory_space<vmem>>, vector<8x16x4xbf16>
    %39 = vector.shape_cast %38 : vector<8x16x4xbf16> to vector<128x4xbf16>
    %c4 = arith.constant 4 : index
    %c0_30 = arith.constant 0 : index
    %40 = vector.load %arg5[%c4, %c0_30] : memref<36x8xbf16, #tpu.memory_space<vmem>>, vector<4x8xbf16>
    %cst_31 = arith.constant dense<0.000000e+00> : vector<128x8xf32>
    %41 = tpu.matmul %39, %40, %cst_31 {dimension_numbers = #tpu.dot_dimension_numbers<[1], [0], [0], [1], [0, 0, 1, 1], [], []>} : vector<128x4xbf16>, vector<4x8xbf16>, vector<128x8xf32> -> vector<128x8xf32>
    %42 = arith.addf %37, %41 : vector<128x8xf32>
    %c0_32 = arith.constant 0 : index
    %c2 = arith.constant 2 : index
    %c0_33 = arith.constant 0 : index
    %43 = vector.load %arg8[%c0_32, %c2, %c0_33] : memref<10x18x4xbf16, #tpu.memory_space<vmem>>, vector<8x16x4xbf16>
    %44 = vector.shape_cast %43 : vector<8x16x4xbf16> to vector<128x4xbf16>
    %c8 = arith.constant 8 : index
    %c0_34 = arith.constant 0 : index
    %45 = vector.load %arg5[%c8, %c0_34] : memref<36x8xbf16, #tpu.memory_space<vmem>>, vector<4x8xbf16>
    %cst_35 = arith.constant dense<0.000000e+00> : vector<128x8xf32>
    %46 = tpu.matmul %44, %45, %cst_35 {dimension_numbers = #tpu.dot_dimension_numbers<[1], [0], [0], [1], [0, 0, 1, 1], [], []>} : vector<128x4xbf16>, vector<4x8xbf16>, vector<128x8xf32> -> vector<128x8xf32>
    %47 = arith.addf %42, %46 : vector<128x8xf32>
    %c1_36 = arith.constant 1 : index
    %c0_37 = arith.constant 0 : index
    %c0_38 = arith.constant 0 : index
    %48 = vector.load %arg8[%c1_36, %c0_37, %c0_38] : memref<10x18x4xbf16, #tpu.memory_space<vmem>>, vector<8x16x4xbf16>
    %49 = vector.shape_cast %48 : vector<8x16x4xbf16> to vector<128x4xbf16>
    %c12 = arith.constant 12 : index
    %c0_39 = arith.constant 0 : index
    %50 = vector.load %arg5[%c12, %c0_39] : memref<36x8xbf16, #tpu.memory_space<vmem>>, vector<4x8xbf16>
    %cst_40 = arith.constant dense<0.000000e+00> : vector<128x8xf32>
    %51 = tpu.matmul %49, %50, %cst_40 {dimension_numbers = #tpu.dot_dimension_numbers<[1], [0], [0], [1], [0, 0, 1, 1], [], []>} : vector<128x4xbf16>, vector<4x8xbf16>, vector<128x8xf32> -> vector<128x8xf32>
    %52 = arith.addf %47, %51 : vector<128x8xf32>
    %c1_41 = arith.constant 1 : index
    %c1_42 = arith.constant 1 : index
    %c0_43 = arith.constant 0 : index
    %53 = vector.load %arg8[%c1_41, %c1_42, %c0_43] : memref<10x18x4xbf16, #tpu.memory_space<vmem>>, vector<8x16x4xbf16>
    %54 = vector.shape_cast %53 : vector<8x16x4xbf16> to vector<128x4xbf16>
    %c16 = arith.constant 16 : index
    %c0_44 = arith.constant 0 : index
    %55 = vector.load %arg5[%c16, %c0_44] : memref<36x8xbf16, #tpu.memory_space<vmem>>, vector<4x8xbf16>
    %cst_45 = arith.constant dense<0.000000e+00> : vector<128x8xf32>
    %56 = tpu.matmul %54, %55, %cst_45 {dimension_numbers = #tpu.dot_dimension_numbers<[1], [0], [0], [1], [0, 0, 1, 1], [], []>} : vector<128x4xbf16>, vector<4x8xbf16>, vector<128x8xf32> -> vector<128x8xf32>
    %57 = arith.addf %52, %56 : vector<128x8xf32>
    %c1_46 = arith.constant 1 : index
    %c2_47 = arith.constant 2 : index
    %c0_48 = arith.constant 0 : index
    %58 = vector.load %arg8[%c1_46, %c2_47, %c0_48] : memref<10x18x4xbf16, #tpu.memory_space<vmem>>, vector<8x16x4xbf16>
    %59 = vector.shape_cast %58 : vector<8x16x4xbf16> to vector<128x4xbf16>
    %c20 = arith.constant 20 : index
    %c0_49 = arith.constant 0 : index
    %60 = vector.load %arg5[%c20, %c0_49] : memref<36x8xbf16, #tpu.memory_space<vmem>>, vector<4x8xbf16>
    %cst_50 = arith.constant dense<0.000000e+00> : vector<128x8xf32>
    %61 = tpu.matmul %59, %60, %cst_50 {dimension_numbers = #tpu.dot_dimension_numbers<[1], [0], [0], [1], [0, 0, 1, 1], [], []>} : vector<128x4xbf16>, vector<4x8xbf16>, vector<128x8xf32> -> vector<128x8xf32>
    %62 = arith.addf %57, %61 : vector<128x8xf32>
    %c2_51 = arith.constant 2 : index
    %c0_52 = arith.constant 0 : index
    %c0_53 = arith.constant 0 : index
    %63 = vector.load %arg8[%c2_51, %c0_52, %c0_53] : memref<10x18x4xbf16, #tpu.memory_space<vmem>>, vector<8x16x4xbf16>
    %64 = vector.shape_cast %63 : vector<8x16x4xbf16> to vector<128x4xbf16>
    %c24 = arith.constant 24 : index
    %c0_54 = arith.constant 0 : index
    %65 = vector.load %arg5[%c24, %c0_54] : memref<36x8xbf16, #tpu.memory_space<vmem>>, vector<4x8xbf16>
    %cst_55 = arith.constant dense<0.000000e+00> : vector<128x8xf32>
    %66 = tpu.matmul %64, %65, %cst_55 {dimension_numbers = #tpu.dot_dimension_numbers<[1], [0], [0], [1], [0, 0, 1, 1], [], []>} : vector<128x4xbf16>, vector<4x8xbf16>, vector<128x8xf32> -> vector<128x8xf32>
    %67 = arith.addf %62, %66 : vector<128x8xf32>
    %c2_56 = arith.constant 2 : index
    %c1_57 = arith.constant 1 : index
    %c0_58 = arith.constant 0 : index
    %68 = vector.load %arg8[%c2_56, %c1_57, %c0_58] : memref<10x18x4xbf16, #tpu.memory_space<vmem>>, vector<8x16x4xbf16>
    %69 = vector.shape_cast %68 : vector<8x16x4xbf16> to vector<128x4xbf16>
    %c28 = arith.constant 28 : index
    %c0_59 = arith.constant 0 : index
    %70 = vector.load %arg5[%c28, %c0_59] : memref<36x8xbf16, #tpu.memory_space<vmem>>, vector<4x8xbf16>
    %cst_60 = arith.constant dense<0.000000e+00> : vector<128x8xf32>
    %71 = tpu.matmul %69, %70, %cst_60 {dimension_numbers = #tpu.dot_dimension_numbers<[1], [0], [0], [1], [0, 0, 1, 1], [], []>} : vector<128x4xbf16>, vector<4x8xbf16>, vector<128x8xf32> -> vector<128x8xf32>
    %72 = arith.addf %67, %71 : vector<128x8xf32>
    %c2_61 = arith.constant 2 : index
    %c2_62 = arith.constant 2 : index
    %c0_63 = arith.constant 0 : index
    %73 = vector.load %arg8[%c2_61, %c2_62, %c0_63] : memref<10x18x4xbf16, #tpu.memory_space<vmem>>, vector<8x16x4xbf16>
    %74 = vector.shape_cast %73 : vector<8x16x4xbf16> to vector<128x4xbf16>
    %c32 = arith.constant 32 : index
    %c0_64 = arith.constant 0 : index
    %75 = vector.load %arg5[%c32, %c0_64] : memref<36x8xbf16, #tpu.memory_space<vmem>>, vector<4x8xbf16>
    %cst_65 = arith.constant dense<0.000000e+00> : vector<128x8xf32>
    %76 = tpu.matmul %74, %75, %cst_65 {dimension_numbers = #tpu.dot_dimension_numbers<[1], [0], [0], [1], [0, 0, 1, 1], [], []>} : vector<128x4xbf16>, vector<4x8xbf16>, vector<128x8xf32> -> vector<128x8xf32>
    %77 = arith.addf %72, %76 : vector<128x8xf32>
    %78 = arith.truncf %77 : vector<128x8xf32> to vector<128x8xbf16>
    %79 = vector.shape_cast %78 : vector<128x8xbf16> to vector<8x16x8xbf16>
    %c0_66 = arith.constant 0 : index
    %c0_67 = arith.constant 0 : index
    %c0_68 = arith.constant 0 : index
    %c0_69 = arith.constant 0 : index
    %80 = vector.load %arg6[%c0_66, %c0_67, %c0_68, %c0_69] : memref<1x8x16x8xbf16, #tpu.memory_space<vmem>>, vector<1x8x16x8xbf16>
    %81 = vector.shape_cast %80 : vector<1x8x16x8xbf16> to vector<8x16x8xbf16>
    %82 = vector.shape_cast %79 : vector<8x16x8xbf16> to vector<1x8x16x8xbf16>
    tpu.vector_store %arg6[%c0_66, %c0_67, %c0_68, %c0_69], %82 {strides = array<i32>} : memref<1x8x16x8xbf16, #tpu.memory_space<vmem>>, vector<1x8x16x8xbf16>,
    %83 = arith.extf %78 : vector<128x8xbf16> to vector<128x8xf32>
    %cst_70 = arith.constant dense<0.000000e+00> : vector<8xf32>
    %84 = vector.multi_reduction <add>, %83, %cst_70 [0] : vector<128x8xf32> to vector<8xf32>
    %85 = vector.shape_cast %84 : vector<8xf32> to vector<1x8xf32>
    %c0_71 = arith.constant 0 : index
    %c0_72 = arith.constant 0 : index
    %c0_73 = arith.constant 0 : index
    %c0_74 = arith.constant 0 : index
    %86 = vector.load %arg7[%c0_71, %c0_72, %c0_73, %c0_74] : memref<1x1x2x8xf32, #tpu.memory_space<vmem>>, vector<1x1x1x8xf32>
    %87 = vector.shape_cast %86 : vector<1x1x1x8xf32> to vector<1x8xf32>
    %88 = vector.shape_cast %85 : vector<1x8xf32> to vector<1x1x1x8xf32>
    tpu.vector_store %arg7[%c0_71, %c0_72, %c0_73, %c0_74], %88 {strides = array<i32>} : memref<1x1x2x8xf32, #tpu.memory_space<vmem>>, vector<1x1x1x8xf32>,
    %89 = arith.mulf %83, %83 : vector<128x8xf32>
    %cst_75 = arith.constant dense<0.000000e+00> : vector<8xf32>
    %90 = vector.multi_reduction <add>, %89, %cst_75 [0] : vector<128x8xf32> to vector<8xf32>
    %91 = vector.shape_cast %90 : vector<8xf32> to vector<1x8xf32>
    %c0_76 = arith.constant 0 : index
    %c0_77 = arith.constant 0 : index
    %c1_78 = arith.constant 1 : index
    %c0_79 = arith.constant 0 : index
    %92 = vector.load %arg7[%c0_76, %c0_77, %c1_78, %c0_79] : memref<1x1x2x8xf32, #tpu.memory_space<vmem>>, vector<1x1x1x8xf32>
    %93 = vector.shape_cast %92 : vector<1x1x1x8xf32> to vector<1x8xf32>
    %94 = vector.shape_cast %91 : vector<1x8xf32> to vector<1x1x1x8xf32>
    tpu.vector_store %arg7[%c0_76, %c0_77, %c1_78, %c0_79], %94 {strides = array<i32>} : memref<1x1x2x8xf32, #tpu.memory_space<vmem>>, vector<1x1x1x8xf32>,
    return
  }
  func.func @transform_0(%arg0: i32, %arg1: i32) -> (i32, i32, i32, i32) {
    %c0_i32 = arith.constant 0 : i32
    %c0_i32_0 = arith.constant 0 : i32
    %c0_i32_1 = arith.constant 0 : i32
    %c0_i32_2 = arith.constant 0 : i32
    return %arg0, %c0_i32, %c0_i32_0, %c0_i32_1 : i32, i32, i32, i32
  }
  func.func @transform_1(%arg0: i32, %arg1: i32) -> (i32, i32) {
    %c0_i32 = arith.constant 0 : i32
    %c0_i32_0 = arith.constant 0 : i32
    %c0_i32_1 = arith.constant 0 : i32
    return %c0_i32, %c0_i32_0 : i32, i32
  }
  func.func @transform_2(%arg0: i32, %arg1: i32) -> (i32, i32) {
    %c0_i32 = arith.constant 0 : i32
    %c0_i32_0 = arith.constant 0 : i32
    %c0_i32_1 = arith.constant 0 : i32
    return %c0_i32, %c0_i32_0 : i32, i32
  }
  func.func @transform_3(%arg0: i32, %arg1: i32) -> (i32, i32) {
    %c0_i32 = arith.constant 0 : i32
    %c0_i32_0 = arith.constant 0 : i32
    %c0_i32_1 = arith.constant 0 : i32
    return %c0_i32, %c0_i32_0 : i32, i32
  }
  func.func @transform_4(%arg0: i32, %arg1: i32) -> (i32, i32, i32, i32) {
    %c0_i32 = arith.constant 0 : i32
    %c0_i32_0 = arith.constant 0 : i32
    %c0_i32_1 = arith.constant 0 : i32
    return %arg0, %arg1, %c0_i32, %c0_i32_0 : i32, i32, i32, i32
  }
  func.func @transform_5(%arg0: i32, %arg1: i32) -> (i32, i32, i32, i32) {
    %c0_i32 = arith.constant 0 : i32
    %c0_i32_0 = arith.constant 0 : i32
    %c0_i32_1 = arith.constant 0 : i32
    return %arg0, %arg1, %c0_i32, %c0_i32_0 : i32, i32, i32, i32
  }
}

module attributes {stable_mosaic.version = 11 : i64} {
  func.func @_conv1_stats_kernel(%arg0: i32, %arg1: i32, %arg2: memref<1x16x16x4xbf16, #tpu.memory_space<vmem>>, %arg3: memref<1x16x16x4xbf16, #tpu.memory_space<vmem>>, %arg4: memref<72x4xbf16, #tpu.memory_space<vmem>>, %arg5: memref<1x8x16x4xbf16, #tpu.memory_space<vmem>>, %arg6: memref<1x1x2x4xf32, #tpu.memory_space<vmem>>, %arg7: memref<10x18x8xbf16, #tpu.memory_space<vmem>>) attributes {dimension_semantics = [#tpu.dimension_semantics<parallel>, #tpu.dimension_semantics<parallel>], iteration_bounds = array<i64: 2, 2>, scalar_prefetch = 0 : i64, scratch_operands = 1 : i64, tpu.core_type = #tpu.core_type<tc>, window_params = [{transform_indices = @transform_0, window_bounds = array<i64: 1, 16, 16, 4>}, {transform_indices = @transform_1, window_bounds = array<i64: 1, 16, 16, 4>}, {pipeline_mode = #tpu.pipeline_mode<synchronous>, transform_indices = @transform_2, window_bounds = array<i64: 72, 4>}, {transform_indices = @transform_3, window_bounds = array<i64: 1, 8, 16, 4>}, {transform_indices = @transform_4, window_bounds = array<i64: 1, 1, 2, 4>}]} {
    %c8_i32 = arith.constant 8 : i32
    %0 = arith.muli %arg1, %c8_i32 : i32
    %1 = tpu.assume_multiple %0, 8 : i32
    %cst = arith.constant 0.000000e+00 : bf16
    %2 = vector.broadcast %cst : bf16 to vector<10x1x4xbf16>
    %c0 = arith.constant 0 : index
    %c0_0 = arith.constant 0 : index
    %c0_1 = arith.constant 0 : index
    %3 = vector.load %arg7[%c0, %c0_0, %c0_1] : memref<10x18x8xbf16, #tpu.memory_space<vmem>>, vector<10x1x4xbf16>
    tpu.vector_store %arg7[%c0, %c0_0, %c0_1], %2 {strides = array<i32>} : memref<10x18x8xbf16, #tpu.memory_space<vmem>>, vector<10x1x4xbf16>,
    %c0_2 = arith.constant 0 : index
    %c17 = arith.constant 17 : index
    %c0_3 = arith.constant 0 : index
    %4 = vector.load %arg7[%c0_2, %c17, %c0_3] : memref<10x18x8xbf16, #tpu.memory_space<vmem>>, vector<10x1x4xbf16>
    tpu.vector_store %arg7[%c0_2, %c17, %c0_3], %2 {strides = array<i32>} : memref<10x18x8xbf16, #tpu.memory_space<vmem>>, vector<10x1x4xbf16>,
    %c0_4 = arith.constant 0 : index
    %5 = arith.index_cast %1 : i32 to index
    %c0_5 = arith.constant 0 : index
    %c0_6 = arith.constant 0 : index
    %6 = vector.load %arg2[%c0_4, %5, %c0_5, %c0_6] : memref<1x16x16x4xbf16, #tpu.memory_space<vmem>>, vector<1x8x16x4xbf16>
    %7 = vector.shape_cast %6 : vector<1x8x16x4xbf16> to vector<8x16x4xbf16>
    %c1 = arith.constant 1 : index
    %c1_7 = arith.constant 1 : index
    %c0_8 = arith.constant 0 : index
    %8 = vector.load %arg7[%c1, %c1_7, %c0_8] : memref<10x18x8xbf16, #tpu.memory_space<vmem>>, vector<8x16x4xbf16>
    tpu.vector_store %arg7[%c1, %c1_7, %c0_8], %7 {strides = array<i32>} : memref<10x18x8xbf16, #tpu.memory_space<vmem>>, vector<8x16x4xbf16>,
    %cst_9 = arith.constant 0.000000e+00 : bf16
    %9 = vector.broadcast %cst_9 : bf16 to vector<1x16x4xbf16>
    %c0_i32 = arith.constant 0 : i32
    %10 = arith.cmpi eq, %arg1, %c0_i32 : i32
    %11 = arith.extui %10 : i1 to i32
    %c0_i32_10 = arith.constant 0 : i32
    %12 = arith.cmpi ne, %11, %c0_i32_10 : i32
    scf.if %12 {
      %c0_96 = arith.constant 0 : index
      %c1_97 = arith.constant 1 : index
      %c0_98 = arith.constant 0 : index
      %103 = vector.load %arg7[%c0_96, %c1_97, %c0_98] : memref<10x18x8xbf16, #tpu.memory_space<vmem>>, vector<1x16x4xbf16>
      tpu.vector_store %arg7[%c0_96, %c1_97, %c0_98], %9 {strides = array<i32>} : memref<10x18x8xbf16, #tpu.memory_space<vmem>>, vector<1x16x4xbf16>,
    } else {
    }
    %c0_i32_11 = arith.constant 0 : i32
    %13 = arith.cmpi sgt, %arg1, %c0_i32_11 : i32
    %14 = arith.extui %13 : i1 to i32
    %c0_i32_12 = arith.constant 0 : i32
    %15 = arith.cmpi ne, %14, %c0_i32_12 : i32
    scf.if %15 {
      %c1_i32_96 = arith.constant 1 : i32
      %103 = arith.subi %1, %c1_i32_96 : i32
      %c0_97 = arith.constant 0 : index
      %104 = arith.index_cast %103 : i32 to index
      %c0_98 = arith.constant 0 : index
      %c0_99 = arith.constant 0 : index
      %105 = vector.load %arg2[%c0_97, %104, %c0_98, %c0_99] : memref<1x16x16x4xbf16, #tpu.memory_space<vmem>>, vector<1x1x16x4xbf16>
      %106 = vector.shape_cast %105 : vector<1x1x16x4xbf16> to vector<1x16x4xbf16>
      %c0_100 = arith.constant 0 : index
      %c1_101 = arith.constant 1 : index
      %c0_102 = arith.constant 0 : index
      %107 = vector.load %arg7[%c0_100, %c1_101, %c0_102] : memref<10x18x8xbf16, #tpu.memory_space<vmem>>, vector<1x16x4xbf16>
      tpu.vector_store %arg7[%c0_100, %c1_101, %c0_102], %106 {strides = array<i32>} : memref<10x18x8xbf16, #tpu.memory_space<vmem>>, vector<1x16x4xbf16>,
    } else {
    }
    %c1_i32 = arith.constant 1 : i32
    %16 = arith.cmpi eq, %arg1, %c1_i32 : i32
    %17 = arith.extui %16 : i1 to i32
    %c0_i32_13 = arith.constant 0 : i32
    %18 = arith.cmpi ne, %17, %c0_i32_13 : i32
    scf.if %18 {
      %c9 = arith.constant 9 : index
      %c1_96 = arith.constant 1 : index
      %c0_97 = arith.constant 0 : index
      %103 = vector.load %arg7[%c9, %c1_96, %c0_97] : memref<10x18x8xbf16, #tpu.memory_space<vmem>>, vector<1x16x4xbf16>
      tpu.vector_store %arg7[%c9, %c1_96, %c0_97], %9 {strides = array<i32>} : memref<10x18x8xbf16, #tpu.memory_space<vmem>>, vector<1x16x4xbf16>,
    } else {
    }
    %c1_i32_14 = arith.constant 1 : i32
    %19 = arith.cmpi slt, %arg1, %c1_i32_14 : i32
    %20 = arith.extui %19 : i1 to i32
    %c0_i32_15 = arith.constant 0 : i32
    %21 = arith.cmpi ne, %20, %c0_i32_15 : i32
    scf.if %21 {
      %c8_i32_96 = arith.constant 8 : i32
      %103 = arith.addi %1, %c8_i32_96 : i32
      %c0_97 = arith.constant 0 : index
      %104 = arith.index_cast %103 : i32 to index
      %c0_98 = arith.constant 0 : index
      %c0_99 = arith.constant 0 : index
      %105 = vector.load %arg2[%c0_97, %104, %c0_98, %c0_99] : memref<1x16x16x4xbf16, #tpu.memory_space<vmem>>, vector<1x1x16x4xbf16>
      %106 = vector.shape_cast %105 : vector<1x1x16x4xbf16> to vector<1x16x4xbf16>
      %c9 = arith.constant 9 : index
      %c1_100 = arith.constant 1 : index
      %c0_101 = arith.constant 0 : index
      %107 = vector.load %arg7[%c9, %c1_100, %c0_101] : memref<10x18x8xbf16, #tpu.memory_space<vmem>>, vector<1x16x4xbf16>
      tpu.vector_store %arg7[%c9, %c1_100, %c0_101], %106 {strides = array<i32>} : memref<10x18x8xbf16, #tpu.memory_space<vmem>>, vector<1x16x4xbf16>,
    } else {
    }
    %cst_16 = arith.constant 0.000000e+00 : bf16
    %22 = vector.broadcast %cst_16 : bf16 to vector<10x1x4xbf16>
    %c0_17 = arith.constant 0 : index
    %c0_18 = arith.constant 0 : index
    %c4 = arith.constant 4 : index
    %23 = vector.load %arg7[%c0_17, %c0_18, %c4] : memref<10x18x8xbf16, #tpu.memory_space<vmem>>, vector<10x1x4xbf16>
    tpu.vector_store %arg7[%c0_17, %c0_18, %c4], %22 {strides = array<i32>} : memref<10x18x8xbf16, #tpu.memory_space<vmem>>, vector<10x1x4xbf16>,
    %c0_19 = arith.constant 0 : index
    %c17_20 = arith.constant 17 : index
    %c4_21 = arith.constant 4 : index
    %24 = vector.load %arg7[%c0_19, %c17_20, %c4_21] : memref<10x18x8xbf16, #tpu.memory_space<vmem>>, vector<10x1x4xbf16>
    tpu.vector_store %arg7[%c0_19, %c17_20, %c4_21], %22 {strides = array<i32>} : memref<10x18x8xbf16, #tpu.memory_space<vmem>>, vector<10x1x4xbf16>,
    %c0_22 = arith.constant 0 : index
    %25 = arith.index_cast %1 : i32 to index
    %c0_23 = arith.constant 0 : index
    %c0_24 = arith.constant 0 : index
    %26 = vector.load %arg3[%c0_22, %25, %c0_23, %c0_24] : memref<1x16x16x4xbf16, #tpu.memory_space<vmem>>, vector<1x8x16x4xbf16>
    %27 = vector.shape_cast %26 : vector<1x8x16x4xbf16> to vector<8x16x4xbf16>
    %c1_25 = arith.constant 1 : index
    %c1_26 = arith.constant 1 : index
    %c4_27 = arith.constant 4 : index
    %28 = vector.load %arg7[%c1_25, %c1_26, %c4_27] : memref<10x18x8xbf16, #tpu.memory_space<vmem>>, vector<8x16x4xbf16>
    tpu.vector_store %arg7[%c1_25, %c1_26, %c4_27], %27 {strides = array<i32>} : memref<10x18x8xbf16, #tpu.memory_space<vmem>>, vector<8x16x4xbf16>,
    %cst_28 = arith.constant 0.000000e+00 : bf16
    %29 = vector.broadcast %cst_28 : bf16 to vector<1x16x4xbf16>
    %c0_i32_29 = arith.constant 0 : i32
    %30 = arith.cmpi eq, %arg1, %c0_i32_29 : i32
    %31 = arith.extui %30 : i1 to i32
    %c0_i32_30 = arith.constant 0 : i32
    %32 = arith.cmpi ne, %31, %c0_i32_30 : i32
    scf.if %32 {
      %c0_96 = arith.constant 0 : index
      %c1_97 = arith.constant 1 : index
      %c4_98 = arith.constant 4 : index
      %103 = vector.load %arg7[%c0_96, %c1_97, %c4_98] : memref<10x18x8xbf16, #tpu.memory_space<vmem>>, vector<1x16x4xbf16>
      tpu.vector_store %arg7[%c0_96, %c1_97, %c4_98], %29 {strides = array<i32>} : memref<10x18x8xbf16, #tpu.memory_space<vmem>>, vector<1x16x4xbf16>,
    } else {
    }
    %c0_i32_31 = arith.constant 0 : i32
    %33 = arith.cmpi sgt, %arg1, %c0_i32_31 : i32
    %34 = arith.extui %33 : i1 to i32
    %c0_i32_32 = arith.constant 0 : i32
    %35 = arith.cmpi ne, %34, %c0_i32_32 : i32
    scf.if %35 {
      %c1_i32_96 = arith.constant 1 : i32
      %103 = arith.subi %1, %c1_i32_96 : i32
      %c0_97 = arith.constant 0 : index
      %104 = arith.index_cast %103 : i32 to index
      %c0_98 = arith.constant 0 : index
      %c0_99 = arith.constant 0 : index
      %105 = vector.load %arg3[%c0_97, %104, %c0_98, %c0_99] : memref<1x16x16x4xbf16, #tpu.memory_space<vmem>>, vector<1x1x16x4xbf16>
      %106 = vector.shape_cast %105 : vector<1x1x16x4xbf16> to vector<1x16x4xbf16>
      %c0_100 = arith.constant 0 : index
      %c1_101 = arith.constant 1 : index
      %c4_102 = arith.constant 4 : index
      %107 = vector.load %arg7[%c0_100, %c1_101, %c4_102] : memref<10x18x8xbf16, #tpu.memory_space<vmem>>, vector<1x16x4xbf16>
      tpu.vector_store %arg7[%c0_100, %c1_101, %c4_102], %106 {strides = array<i32>} : memref<10x18x8xbf16, #tpu.memory_space<vmem>>, vector<1x16x4xbf16>,
    } else {
    }
    %c1_i32_33 = arith.constant 1 : i32
    %36 = arith.cmpi eq, %arg1, %c1_i32_33 : i32
    %37 = arith.extui %36 : i1 to i32
    %c0_i32_34 = arith.constant 0 : i32
    %38 = arith.cmpi ne, %37, %c0_i32_34 : i32
    scf.if %38 {
      %c9 = arith.constant 9 : index
      %c1_96 = arith.constant 1 : index
      %c4_97 = arith.constant 4 : index
      %103 = vector.load %arg7[%c9, %c1_96, %c4_97] : memref<10x18x8xbf16, #tpu.memory_space<vmem>>, vector<1x16x4xbf16>
      tpu.vector_store %arg7[%c9, %c1_96, %c4_97], %29 {strides = array<i32>} : memref<10x18x8xbf16, #tpu.memory_space<vmem>>, vector<1x16x4xbf16>,
    } else {
    }
    %c1_i32_35 = arith.constant 1 : i32
    %39 = arith.cmpi slt, %arg1, %c1_i32_35 : i32
    %40 = arith.extui %39 : i1 to i32
    %c0_i32_36 = arith.constant 0 : i32
    %41 = arith.cmpi ne, %40, %c0_i32_36 : i32
    scf.if %41 {
      %c8_i32_96 = arith.constant 8 : i32
      %103 = arith.addi %1, %c8_i32_96 : i32
      %c0_97 = arith.constant 0 : index
      %104 = arith.index_cast %103 : i32 to index
      %c0_98 = arith.constant 0 : index
      %c0_99 = arith.constant 0 : index
      %105 = vector.load %arg3[%c0_97, %104, %c0_98, %c0_99] : memref<1x16x16x4xbf16, #tpu.memory_space<vmem>>, vector<1x1x16x4xbf16>
      %106 = vector.shape_cast %105 : vector<1x1x16x4xbf16> to vector<1x16x4xbf16>
      %c9 = arith.constant 9 : index
      %c1_100 = arith.constant 1 : index
      %c4_101 = arith.constant 4 : index
      %107 = vector.load %arg7[%c9, %c1_100, %c4_101] : memref<10x18x8xbf16, #tpu.memory_space<vmem>>, vector<1x16x4xbf16>
      tpu.vector_store %arg7[%c9, %c1_100, %c4_101], %106 {strides = array<i32>} : memref<10x18x8xbf16, #tpu.memory_space<vmem>>, vector<1x16x4xbf16>,
    } else {
    }
    %c0_37 = arith.constant 0 : index
    %c0_38 = arith.constant 0 : index
    %c0_39 = arith.constant 0 : index
    %42 = vector.load %arg7[%c0_37, %c0_38, %c0_39] : memref<10x18x8xbf16, #tpu.memory_space<vmem>>, vector<8x16x8xbf16>
    %43 = vector.shape_cast %42 : vector<8x16x8xbf16> to vector<128x8xbf16>
    %c0_40 = arith.constant 0 : index
    %c0_41 = arith.constant 0 : index
    %44 = vector.load %arg4[%c0_40, %c0_41] : memref<72x4xbf16, #tpu.memory_space<vmem>>, vector<8x4xbf16>
    %cst_42 = arith.constant dense<0.000000e+00> : vector<128x4xf32>
    %45 = tpu.matmul %43, %44, %cst_42 {dimension_numbers = #tpu.dot_dimension_numbers<[1], [0], [0], [1], [0, 0, 1, 1], [], []>} : vector<128x8xbf16>, vector<8x4xbf16>, vector<128x4xf32> -> vector<128x4xf32>
    %c0_43 = arith.constant 0 : index
    %c1_44 = arith.constant 1 : index
    %c0_45 = arith.constant 0 : index
    %46 = vector.load %arg7[%c0_43, %c1_44, %c0_45] : memref<10x18x8xbf16, #tpu.memory_space<vmem>>, vector<8x16x8xbf16>
    %47 = vector.shape_cast %46 : vector<8x16x8xbf16> to vector<128x8xbf16>
    %c8 = arith.constant 8 : index
    %c0_46 = arith.constant 0 : index
    %48 = vector.load %arg4[%c8, %c0_46] : memref<72x4xbf16, #tpu.memory_space<vmem>>, vector<8x4xbf16>
    %cst_47 = arith.constant dense<0.000000e+00> : vector<128x4xf32>
    %49 = tpu.matmul %47, %48, %cst_47 {dimension_numbers = #tpu.dot_dimension_numbers<[1], [0], [0], [1], [0, 0, 1, 1], [], []>} : vector<128x8xbf16>, vector<8x4xbf16>, vector<128x4xf32> -> vector<128x4xf32>
    %50 = arith.addf %45, %49 : vector<128x4xf32>
    %c0_48 = arith.constant 0 : index
    %c2 = arith.constant 2 : index
    %c0_49 = arith.constant 0 : index
    %51 = vector.load %arg7[%c0_48, %c2, %c0_49] : memref<10x18x8xbf16, #tpu.memory_space<vmem>>, vector<8x16x8xbf16>
    %52 = vector.shape_cast %51 : vector<8x16x8xbf16> to vector<128x8xbf16>
    %c16 = arith.constant 16 : index
    %c0_50 = arith.constant 0 : index
    %53 = vector.load %arg4[%c16, %c0_50] : memref<72x4xbf16, #tpu.memory_space<vmem>>, vector<8x4xbf16>
    %cst_51 = arith.constant dense<0.000000e+00> : vector<128x4xf32>
    %54 = tpu.matmul %52, %53, %cst_51 {dimension_numbers = #tpu.dot_dimension_numbers<[1], [0], [0], [1], [0, 0, 1, 1], [], []>} : vector<128x8xbf16>, vector<8x4xbf16>, vector<128x4xf32> -> vector<128x4xf32>
    %55 = arith.addf %50, %54 : vector<128x4xf32>
    %c1_52 = arith.constant 1 : index
    %c0_53 = arith.constant 0 : index
    %c0_54 = arith.constant 0 : index
    %56 = vector.load %arg7[%c1_52, %c0_53, %c0_54] : memref<10x18x8xbf16, #tpu.memory_space<vmem>>, vector<8x16x8xbf16>
    %57 = vector.shape_cast %56 : vector<8x16x8xbf16> to vector<128x8xbf16>
    %c24 = arith.constant 24 : index
    %c0_55 = arith.constant 0 : index
    %58 = vector.load %arg4[%c24, %c0_55] : memref<72x4xbf16, #tpu.memory_space<vmem>>, vector<8x4xbf16>
    %cst_56 = arith.constant dense<0.000000e+00> : vector<128x4xf32>
    %59 = tpu.matmul %57, %58, %cst_56 {dimension_numbers = #tpu.dot_dimension_numbers<[1], [0], [0], [1], [0, 0, 1, 1], [], []>} : vector<128x8xbf16>, vector<8x4xbf16>, vector<128x4xf32> -> vector<128x4xf32>
    %60 = arith.addf %55, %59 : vector<128x4xf32>
    %c1_57 = arith.constant 1 : index
    %c1_58 = arith.constant 1 : index
    %c0_59 = arith.constant 0 : index
    %61 = vector.load %arg7[%c1_57, %c1_58, %c0_59] : memref<10x18x8xbf16, #tpu.memory_space<vmem>>, vector<8x16x8xbf16>
    %62 = vector.shape_cast %61 : vector<8x16x8xbf16> to vector<128x8xbf16>
    %c32 = arith.constant 32 : index
    %c0_60 = arith.constant 0 : index
    %63 = vector.load %arg4[%c32, %c0_60] : memref<72x4xbf16, #tpu.memory_space<vmem>>, vector<8x4xbf16>
    %cst_61 = arith.constant dense<0.000000e+00> : vector<128x4xf32>
    %64 = tpu.matmul %62, %63, %cst_61 {dimension_numbers = #tpu.dot_dimension_numbers<[1], [0], [0], [1], [0, 0, 1, 1], [], []>} : vector<128x8xbf16>, vector<8x4xbf16>, vector<128x4xf32> -> vector<128x4xf32>
    %65 = arith.addf %60, %64 : vector<128x4xf32>
    %c1_62 = arith.constant 1 : index
    %c2_63 = arith.constant 2 : index
    %c0_64 = arith.constant 0 : index
    %66 = vector.load %arg7[%c1_62, %c2_63, %c0_64] : memref<10x18x8xbf16, #tpu.memory_space<vmem>>, vector<8x16x8xbf16>
    %67 = vector.shape_cast %66 : vector<8x16x8xbf16> to vector<128x8xbf16>
    %c40 = arith.constant 40 : index
    %c0_65 = arith.constant 0 : index
    %68 = vector.load %arg4[%c40, %c0_65] : memref<72x4xbf16, #tpu.memory_space<vmem>>, vector<8x4xbf16>
    %cst_66 = arith.constant dense<0.000000e+00> : vector<128x4xf32>
    %69 = tpu.matmul %67, %68, %cst_66 {dimension_numbers = #tpu.dot_dimension_numbers<[1], [0], [0], [1], [0, 0, 1, 1], [], []>} : vector<128x8xbf16>, vector<8x4xbf16>, vector<128x4xf32> -> vector<128x4xf32>
    %70 = arith.addf %65, %69 : vector<128x4xf32>
    %c2_67 = arith.constant 2 : index
    %c0_68 = arith.constant 0 : index
    %c0_69 = arith.constant 0 : index
    %71 = vector.load %arg7[%c2_67, %c0_68, %c0_69] : memref<10x18x8xbf16, #tpu.memory_space<vmem>>, vector<8x16x8xbf16>
    %72 = vector.shape_cast %71 : vector<8x16x8xbf16> to vector<128x8xbf16>
    %c48 = arith.constant 48 : index
    %c0_70 = arith.constant 0 : index
    %73 = vector.load %arg4[%c48, %c0_70] : memref<72x4xbf16, #tpu.memory_space<vmem>>, vector<8x4xbf16>
    %cst_71 = arith.constant dense<0.000000e+00> : vector<128x4xf32>
    %74 = tpu.matmul %72, %73, %cst_71 {dimension_numbers = #tpu.dot_dimension_numbers<[1], [0], [0], [1], [0, 0, 1, 1], [], []>} : vector<128x8xbf16>, vector<8x4xbf16>, vector<128x4xf32> -> vector<128x4xf32>
    %75 = arith.addf %70, %74 : vector<128x4xf32>
    %c2_72 = arith.constant 2 : index
    %c1_73 = arith.constant 1 : index
    %c0_74 = arith.constant 0 : index
    %76 = vector.load %arg7[%c2_72, %c1_73, %c0_74] : memref<10x18x8xbf16, #tpu.memory_space<vmem>>, vector<8x16x8xbf16>
    %77 = vector.shape_cast %76 : vector<8x16x8xbf16> to vector<128x8xbf16>
    %c56 = arith.constant 56 : index
    %c0_75 = arith.constant 0 : index
    %78 = vector.load %arg4[%c56, %c0_75] : memref<72x4xbf16, #tpu.memory_space<vmem>>, vector<8x4xbf16>
    %cst_76 = arith.constant dense<0.000000e+00> : vector<128x4xf32>
    %79 = tpu.matmul %77, %78, %cst_76 {dimension_numbers = #tpu.dot_dimension_numbers<[1], [0], [0], [1], [0, 0, 1, 1], [], []>} : vector<128x8xbf16>, vector<8x4xbf16>, vector<128x4xf32> -> vector<128x4xf32>
    %80 = arith.addf %75, %79 : vector<128x4xf32>
    %c2_77 = arith.constant 2 : index
    %c2_78 = arith.constant 2 : index
    %c0_79 = arith.constant 0 : index
    %81 = vector.load %arg7[%c2_77, %c2_78, %c0_79] : memref<10x18x8xbf16, #tpu.memory_space<vmem>>, vector<8x16x8xbf16>
    %82 = vector.shape_cast %81 : vector<8x16x8xbf16> to vector<128x8xbf16>
    %c64 = arith.constant 64 : index
    %c0_80 = arith.constant 0 : index
    %83 = vector.load %arg4[%c64, %c0_80] : memref<72x4xbf16, #tpu.memory_space<vmem>>, vector<8x4xbf16>
    %cst_81 = arith.constant dense<0.000000e+00> : vector<128x4xf32>
    %84 = tpu.matmul %82, %83, %cst_81 {dimension_numbers = #tpu.dot_dimension_numbers<[1], [0], [0], [1], [0, 0, 1, 1], [], []>} : vector<128x8xbf16>, vector<8x4xbf16>, vector<128x4xf32> -> vector<128x4xf32>
    %85 = arith.addf %80, %84 : vector<128x4xf32>
    %86 = arith.truncf %85 : vector<128x4xf32> to vector<128x4xbf16>
    %87 = vector.shape_cast %86 : vector<128x4xbf16> to vector<8x16x4xbf16>
    %c0_82 = arith.constant 0 : index
    %c0_83 = arith.constant 0 : index
    %c0_84 = arith.constant 0 : index
    %c0_85 = arith.constant 0 : index
    %88 = vector.load %arg5[%c0_82, %c0_83, %c0_84, %c0_85] : memref<1x8x16x4xbf16, #tpu.memory_space<vmem>>, vector<1x8x16x4xbf16>
    %89 = vector.shape_cast %88 : vector<1x8x16x4xbf16> to vector<8x16x4xbf16>
    %90 = vector.shape_cast %87 : vector<8x16x4xbf16> to vector<1x8x16x4xbf16>
    tpu.vector_store %arg5[%c0_82, %c0_83, %c0_84, %c0_85], %90 {strides = array<i32>} : memref<1x8x16x4xbf16, #tpu.memory_space<vmem>>, vector<1x8x16x4xbf16>,
    %91 = arith.extf %86 : vector<128x4xbf16> to vector<128x4xf32>
    %cst_86 = arith.constant dense<0.000000e+00> : vector<4xf32>
    %92 = vector.multi_reduction <add>, %91, %cst_86 [0] : vector<128x4xf32> to vector<4xf32>
    %93 = vector.shape_cast %92 : vector<4xf32> to vector<1x4xf32>
    %c0_87 = arith.constant 0 : index
    %c0_88 = arith.constant 0 : index
    %c0_89 = arith.constant 0 : index
    %c0_90 = arith.constant 0 : index
    %94 = vector.load %arg6[%c0_87, %c0_88, %c0_89, %c0_90] : memref<1x1x2x4xf32, #tpu.memory_space<vmem>>, vector<1x1x1x4xf32>
    %95 = vector.shape_cast %94 : vector<1x1x1x4xf32> to vector<1x4xf32>
    %96 = vector.shape_cast %93 : vector<1x4xf32> to vector<1x1x1x4xf32>
    tpu.vector_store %arg6[%c0_87, %c0_88, %c0_89, %c0_90], %96 {strides = array<i32>} : memref<1x1x2x4xf32, #tpu.memory_space<vmem>>, vector<1x1x1x4xf32>,
    %97 = arith.mulf %91, %91 : vector<128x4xf32>
    %cst_91 = arith.constant dense<0.000000e+00> : vector<4xf32>
    %98 = vector.multi_reduction <add>, %97, %cst_91 [0] : vector<128x4xf32> to vector<4xf32>
    %99 = vector.shape_cast %98 : vector<4xf32> to vector<1x4xf32>
    %c0_92 = arith.constant 0 : index
    %c0_93 = arith.constant 0 : index
    %c1_94 = arith.constant 1 : index
    %c0_95 = arith.constant 0 : index
    %100 = vector.load %arg6[%c0_92, %c0_93, %c1_94, %c0_95] : memref<1x1x2x4xf32, #tpu.memory_space<vmem>>, vector<1x1x1x4xf32>
    %101 = vector.shape_cast %100 : vector<1x1x1x4xf32> to vector<1x4xf32>
    %102 = vector.shape_cast %99 : vector<1x4xf32> to vector<1x1x1x4xf32>
    tpu.vector_store %arg6[%c0_92, %c0_93, %c1_94, %c0_95], %102 {strides = array<i32>} : memref<1x1x2x4xf32, #tpu.memory_space<vmem>>, vector<1x1x1x4xf32>,
    return
  }
  func.func @transform_0(%arg0: i32, %arg1: i32) -> (i32, i32, i32, i32) {
    %c0_i32 = arith.constant 0 : i32
    %c0_i32_0 = arith.constant 0 : i32
    %c0_i32_1 = arith.constant 0 : i32
    %c0_i32_2 = arith.constant 0 : i32
    return %arg0, %c0_i32, %c0_i32_0, %c0_i32_1 : i32, i32, i32, i32
  }
  func.func @transform_1(%arg0: i32, %arg1: i32) -> (i32, i32, i32, i32) {
    %c0_i32 = arith.constant 0 : i32
    %c0_i32_0 = arith.constant 0 : i32
    %c0_i32_1 = arith.constant 0 : i32
    %c0_i32_2 = arith.constant 0 : i32
    return %arg0, %c0_i32, %c0_i32_0, %c0_i32_1 : i32, i32, i32, i32
  }
  func.func @transform_2(%arg0: i32, %arg1: i32) -> (i32, i32) {
    %c0_i32 = arith.constant 0 : i32
    %c0_i32_0 = arith.constant 0 : i32
    %c0_i32_1 = arith.constant 0 : i32
    return %c0_i32, %c0_i32_0 : i32, i32
  }
  func.func @transform_3(%arg0: i32, %arg1: i32) -> (i32, i32, i32, i32) {
    %c0_i32 = arith.constant 0 : i32
    %c0_i32_0 = arith.constant 0 : i32
    %c0_i32_1 = arith.constant 0 : i32
    return %arg0, %arg1, %c0_i32, %c0_i32_0 : i32, i32, i32, i32
  }
  func.func @transform_4(%arg0: i32, %arg1: i32) -> (i32, i32, i32, i32) {
    %c0_i32 = arith.constant 0 : i32
    %c0_i32_0 = arith.constant 0 : i32
    %c0_i32_1 = arith.constant 0 : i32
    return %arg0, %arg1, %c0_i32, %c0_i32_0 : i32, i32, i32, i32
  }
}

module attributes {stable_mosaic.version = 11 : i64} {
  func.func @_bn_relu_kernel(%arg0: i32, %arg1: i32, %arg2: memref<1x8x16x8xbf16, #tpu.memory_space<vmem>>, %arg3: memref<1x8xf32, #tpu.memory_space<vmem>>, %arg4: memref<1x8xf32, #tpu.memory_space<vmem>>, %arg5: memref<1x8x16x8xf32, #tpu.memory_space<vmem>>) attributes {dimension_semantics = [#tpu.dimension_semantics<parallel>, #tpu.dimension_semantics<parallel>], iteration_bounds = array<i64: 2, 2>, scalar_prefetch = 0 : i64, scratch_operands = 0 : i64, tpu.core_type = #tpu.core_type<tc>, window_params = [{transform_indices = @transform_0, window_bounds = array<i64: 1, 8, 16, 8>}, {pipeline_mode = #tpu.pipeline_mode<synchronous>, transform_indices = @transform_1, window_bounds = array<i64: 1, 8>}, {pipeline_mode = #tpu.pipeline_mode<synchronous>, transform_indices = @transform_2, window_bounds = array<i64: 1, 8>}, {transform_indices = @transform_3, window_bounds = array<i64: 1, 8, 16, 8>}]} {
    %c0 = arith.constant 0 : index
    %c0_0 = arith.constant 0 : index
    %0 = vector.load %arg3[%c0, %c0_0] : memref<1x8xf32, #tpu.memory_space<vmem>>, vector<1x8xf32>
    %1 = vector.shape_cast %0 : vector<1x8xf32> to vector<1x1x8xf32>
    %c0_1 = arith.constant 0 : index
    %c0_2 = arith.constant 0 : index
    %2 = vector.load %arg4[%c0_1, %c0_2] : memref<1x8xf32, #tpu.memory_space<vmem>>, vector<1x8xf32>
    %3 = vector.shape_cast %2 : vector<1x8xf32> to vector<1x1x8xf32>
    %c0_3 = arith.constant 0 : index
    %c0_4 = arith.constant 0 : index
    %c0_5 = arith.constant 0 : index
    %c0_6 = arith.constant 0 : index
    %4 = vector.load %arg2[%c0_3, %c0_4, %c0_5, %c0_6] : memref<1x8x16x8xbf16, #tpu.memory_space<vmem>>, vector<1x8x16x8xbf16>
    %5 = vector.shape_cast %4 : vector<1x8x16x8xbf16> to vector<8x16x8xbf16>
    %6 = arith.extf %5 : vector<8x16x8xbf16> to vector<8x16x8xf32>
    %7 = vector.broadcast %1 : vector<1x1x8xf32> to vector<8x16x8xf32>
    %8 = arith.mulf %6, %7 : vector<8x16x8xf32>
    %9 = vector.broadcast %3 : vector<1x1x8xf32> to vector<8x16x8xf32>
    %10 = arith.addf %8, %9 : vector<8x16x8xf32>
    %cst = arith.constant 0.000000e+00 : f32
    %11 = vector.broadcast %cst : f32 to vector<8x16x8xf32>
    %12 = arith.maximumf %10, %11 : vector<8x16x8xf32>
    %c0_7 = arith.constant 0 : index
    %c0_8 = arith.constant 0 : index
    %c0_9 = arith.constant 0 : index
    %c0_10 = arith.constant 0 : index
    %13 = vector.load %arg5[%c0_7, %c0_8, %c0_9, %c0_10] : memref<1x8x16x8xf32, #tpu.memory_space<vmem>>, vector<1x8x16x8xf32>
    %14 = vector.shape_cast %13 : vector<1x8x16x8xf32> to vector<8x16x8xf32>
    %15 = vector.shape_cast %12 : vector<8x16x8xf32> to vector<1x8x16x8xf32>
    tpu.vector_store %arg5[%c0_7, %c0_8, %c0_9, %c0_10], %15 {strides = array<i32>} : memref<1x8x16x8xf32, #tpu.memory_space<vmem>>, vector<1x8x16x8xf32>,
    return
  }
  func.func @transform_0(%arg0: i32, %arg1: i32) -> (i32, i32, i32, i32) {
    %c0_i32 = arith.constant 0 : i32
    %c0_i32_0 = arith.constant 0 : i32
    %c0_i32_1 = arith.constant 0 : i32
    return %arg0, %arg1, %c0_i32, %c0_i32_0 : i32, i32, i32, i32
  }
  func.func @transform_1(%arg0: i32, %arg1: i32) -> (i32, i32) {
    %c0_i32 = arith.constant 0 : i32
    %c0_i32_0 = arith.constant 0 : i32
    %c0_i32_1 = arith.constant 0 : i32
    return %c0_i32, %c0_i32_0 : i32, i32
  }
  func.func @transform_2(%arg0: i32, %arg1: i32) -> (i32, i32) {
    %c0_i32 = arith.constant 0 : i32
    %c0_i32_0 = arith.constant 0 : i32
    %c0_i32_1 = arith.constant 0 : i32
    return %c0_i32, %c0_i32_0 : i32, i32
  }
  func.func @transform_3(%arg0: i32, %arg1: i32) -> (i32, i32, i32, i32) {
    %c0_i32 = arith.constant 0 : i32
    %c0_i32_0 = arith.constant 0 : i32
    %c0_i32_1 = arith.constant 0 : i32
    return %arg0, %arg1, %c0_i32, %c0_i32_0 : i32, i32, i32, i32
  }
}

</mosaic_0001>

<bundles_post_ra>
// kernel: up_forward.5
= control target key start
LH: loop header
LB: loop body
LE: loop exit
PB: predicated region body
PF: predicated region fallthrough
CT: control target
= control target key end

     0   :  { %s581_s12 = smov 0   ;;  %s583_s13 = smov 0   ;;  %s722_s0 = inlined_call_operand.vmem [shape: bf16[2,16,16,8], index: 0, kind: input, shape index: {}]   ;;  %s723_s1 = inlined_call_operand.vmem [shape: f32[1,8], index: 1, kind: input, shape index: {}]   ;;  %s724_s2 = inlined_call_operand.vmem [shape: f32[1,8], index: 2, kind: input, shape index: {}]   ;;  %s725_s3 = inlined_call_operand.vmem [shape: f32[2,16,16,8], index: 3, kind: output, shape index: {}]  }
   0x1   :  { %s585_s14 = smov 0   ;;  %s587_s15 = smov 0  }
   0x2   :  { %s589_s16 = smov 0  }
   0x3 LB: > { %s22_s17 = sadd.s32 1, %s551_s14  ;;  %s25_s18 = sadd.s32 1, %s555_s15  ;;  %s559_s16 = sphi %s589_s16, %s13_s16   ;;  %s555_s15 = sphi %s587_s15, %s729_s15   ;;  %s551_s14 = sphi %s585_s14, %s728_s14   ;;  %s547_s13 = sphi %s583_s13, %s727_s13   ;;  %s543_s12 = sphi %s581_s12, %s726_s12  }
   0x4   : > { %p23_p0 = scmp.ge.s32.totalorder %s22_s17, 2  ;;  %p429_p1 = scmp.ge.s32.totalorder %s559_s16, 1 }
   0x5   : > { %p159_p2 = scmp.lt.s32.totalorder %s559_s16, 5 }
   0x6   : > { %s731_s17 = smov (%p23_p0, %s22_s17), 0  ;;  %s733_s18 = smov (!%p23_p0, %s25_s18), %s555_s15 }
   0x7   : > { %p160_p3 = pnand %p429_p1, %p159_p2  ;;  %p27_p4 = scmp.ge.s32.totalorder %s733_s18, 2 }
   0x8   : > { %s430_s19 = sshll.u32 (!%p160_p3), %s543_s12, 3  ;;  %p194_p5 = scmp.lt.s32.totalorder (!%p160_p3), %s547_s13, 1  ;;  %v622_v0 = vld [vmem:[%s723_s1] ss:$0 sm:$0xff] (!%p160_p3)  ;;  %vm309_vm0 = vcmask (!%p160_p3), 64512  }
   0x9   : > { %s735_s18 = smov (%p27_p4, %s733_s18), 0  ;;  %163 = sbr.rel (%p160_p3) target bundleno = 42 (0x2a), region = 32 }
   0xa   : > { %p196_p6 = scmp.lt.s32.totalorder (!%p160_p3), %s430_s19, 15  ;;  %v631_v9 = vld [vmem:[%s724_s2] ss:$0 sm:$0xff] (!%p160_p3) }
  0x10   : > { %s737_s13 = smov (!%p194_p5, %s547_s13), 1  ;;  %s739_s19 = smov (!%p196_p6, %s430_s19), 15 }
  0x11   : > { %s432_s20 = sshll.u32 %s737_s13, 5  ;;  %s431_s21 = sshll.u32 %s739_s19, 1 }
  0x12   : > { %s611_s22 = sadd.s32 %s432_s20, %s431_s21 }
  0x13   : > { %s433_s23 = sshll.u32 %s611_s22, 2  ;;  %s437_s4 = sshll.u32 %s611_s22, 3 }
  0x14   : > { %s617_s26 = scalar_lea.vmem %s722_s0, %s433_s23  ;;  %s649_s7 = scalar_lea.vmem %s725_s3, %s437_s4 }
  0x15   : > { %v443_v1 = vld [vmem:[%s617_s26] sm:$0xff]   ;;  %v474_v2 = vld [vmem:[%s617_s26 + $0x8] sm:$0xff]   ;;  %v475_v3 = vld [vmem:[%s617_s26 + $0x10] sm:$0xff]  }
  0x16   : > { %v444_v4 = vunpack.c.l.bf16 %v443_v1  ;;  %v445_v5 = vunpack.c.h.bf16 %v443_v1  ;;  %v448_v6 = vunpack.c.l.bf16 %v474_v2  ;;  %v449_v7 = vunpack.c.h.bf16 %v474_v2  ;;  %v476_v8 = vld [vmem:[%s617_s26 + $0x18] sm:$0xff]   ;;  %v477_v30 = vld [vmem:[%s617_s26 + $0x20] sm:$0xff]   ;;  %v478_v31 = vld [vmem:[%s617_s26 + $0x28] sm:$0xff]  }
  0x17   : > { %v452_v10 = vunpack.c.l.bf16 %v475_v3  ;;  %v453_v11 = vunpack.c.h.bf16 %v475_v3  ;;  %v456_v12 = vunpack.c.l.bf16 %v476_v8  ;;  %v457_v13 = vunpack.c.h.bf16 %v476_v8  ;;  %v479_v36 = vld [vmem:[%s617_s26 + $0x30] sm:$0xff]   ;;  %v480_v37 = vld [vmem:[%s617_s26 + $0x38] sm:$0xff]  }
  0x18   : > { %v255_v14 = vmul.f32 %v444_v4, %v622_v0  ;;  %v256_v15 = vmul.f32 %v445_v5, %v622_v0  ;;  %v257_v16 = vmul.f32 %v448_v6, %v622_v0  ;;  %v258_v17 = vmul.f32 %v449_v7, %v622_v0 }
  0x19   : > { %v259_v18 = vmul.f32 %v452_v10, %v622_v0  ;;  %v260_v19 = vmul.f32 %v453_v11, %v622_v0  ;;  %v261_v20 = vmul.f32 %v456_v12, %v622_v0  ;;  %v262_v21 = vmul.f32 %v457_v13, %v622_v0 }
  0x1a   : > { %v277_v22 = vadd.f32 %v631_v9, %v255_v14  ;;  %v278_v23 = vadd.f32 %v631_v9, %v256_v15  ;;  %v279_v24 = vadd.f32 %v631_v9, %v257_v16  ;;  %v280_v25 = vadd.f32 %v631_v9, %v258_v17 }
  0x1b   : > { %v281_v26 = vadd.f32 %v631_v9, %v259_v18  ;;  %v282_v27 = vadd.f32 %v631_v9, %v260_v19  ;;  %v283_v28 = vadd.f32 %v631_v9, %v261_v20  ;;  %v284_v29 = vadd.f32 %v631_v9, %v262_v21 }
  0x1c   : > { %v293_v32 = vmax.f32 %v277_v22, 0.0  ;;  %v294_v33 = vmax.f32 %v278_v23, 0.0  ;;  %v295_v34 = vmax.f32 %v279_v24, 0.0  ;;  %v296_v35 = vmax.f32 %v280_v25, 0.0 }
  0x1d   : > { %v297_v38 = vmax.f32 %v281_v26, 0.0  ;;  %v298_v39 = vmax.f32 %v282_v27, 0.0  ;;  %v299_v40 = vmax.f32 %v283_v28, 0.0  ;;  %v300_v41 = vmax.f32 %v284_v29, 0.0 }
  0x1e   : > { %310 = vst.msk [vmem:[%s649_s7] sm:$0xff] %vm309_vm0, %v293_v32  ;;  %311 = vst.msk [vmem:[%s649_s7 + $0x8] sm:$0xff] %vm309_vm0, %v294_v33  ;;  %v460_v42 = vunpack.c.l.bf16 %v477_v30  ;;  %v461_v43 = vunpack.c.h.bf16 %v477_v30  ;;  %v464_v44 = vunpack.c.l.bf16 %v478_v31  ;;  %v465_v45 = vunpack.c.h.bf16 %v478_v31 }
  0x1f   : > { %312 = vst.msk [vmem:[%s649_s7 + $0x10] sm:$0xff] %vm309_vm0, %v295_v34  ;;  %313 = vst.msk [vmem:[%s649_s7 + $0x18] sm:$0xff] %vm309_vm0, %v296_v35  ;;  %v468_v46 = vunpack.c.l.bf16 %v479_v36  ;;  %v469_v47 = vunpack.c.h.bf16 %v479_v36  ;;  %v472_v48 = vunpack.c.l.bf16 %v480_v37  ;;  %v473_v49 = vunpack.c.h.bf16 %v480_v37 }
  0x20   : > { %314 = vst.msk [vmem:[%s649_s7 + $0x20] sm:$0xff] %vm309_vm0, %v297_v38  ;;  %315 = vst.msk [vmem:[%s649_s7 + $0x28] sm:$0xff] %vm309_vm0, %v298_v39  ;;  %v263_v50 = vmul.f32 %v460_v42, %v622_v0  ;;  %v264_v51 = vmul.f32 %v461_v43, %v622_v0  ;;  %v265_v52 = vmul.f32 %v464_v44, %v622_v0 }
  0x21   : > { %316 = vst.msk [vmem:[%s649_s7 + $0x30] sm:$0xff] %vm309_vm0, %v299_v40  ;;  %317 = vst.msk [vmem:[%s649_s7 + $0x38] sm:$0xff] %vm309_vm0, %v300_v41  ;;  %v266_v53 = vmul.f32 %v465_v45, %v622_v0  ;;  %v267_v54 = vmul.f32 %v468_v46, %v622_v0  ;;  %v268_v55 = vmul.f32 %v469_v47, %v622_v0 }
  0x22   : > { %v269_v56 = vmul.f32 %v472_v48, %v622_v0  ;;  %v270_v57 = vmul.f32 %v473_v49, %v622_v0  ;;  %v285_v58 = vadd.f32 %v631_v9, %v263_v50  ;;  %v286_v59 = vadd.f32 %v631_v9, %v264_v51 }
  0x23   : > { %v287_v60 = vadd.f32 %v631_v9, %v265_v52  ;;  %v288_v61 = vadd.f32 %v631_v9, %v266_v53  ;;  %v289_v62 = vadd.f32 %v631_v9, %v267_v54  ;;  %v290_v63 = vadd.f32 %v631_v9, %v268_v55 }
  0x24   : > { %v291_v0 = vadd.f32 %v631_v9, %v269_v56  ;;  %v292_v1 = vadd.f32 %v631_v9, %v270_v57  ;;  %v301_v2 = vmax.f32 %v285_v58, 0.0  ;;  %v302_v3 = vmax.f32 %v286_v59, 0.0 }
  0x25   : > { %v303_v4 = vmax.f32 %v287_v60, 0.0  ;;  %v304_v5 = vmax.f32 %v288_v61, 0.0  ;;  %v305_v6 = vmax.f32 %v289_v62, 0.0  ;;  %v306_v7 = vmax.f32 %v290_v63, 0.0 }
  0x26   : > { %v307_v8 = vmax.f32 %v291_v0, 0.0  ;;  %v308_v10 = vmax.f32 %v292_v1, 0.0  ;;  %318 = vst.msk [vmem:[%s649_s7 + $0x40] sm:$0xff] %vm309_vm0, %v301_v2  ;;  %319 = vst.msk [vmem:[%s649_s7 + $0x48] sm:$0xff] %vm309_vm0, %v302_v3 }
  0x27   : > { %320 = vst.msk [vmem:[%s649_s7 + $0x50] sm:$0xff] %vm309_vm0, %v303_v4  ;;  %321 = vst.msk [vmem:[%s649_s7 + $0x58] sm:$0xff] %vm309_vm0, %v304_v5 }
  0x28   : > { %322 = vst.msk [vmem:[%s649_s7 + $0x60] sm:$0xff] %vm309_vm0, %v305_v6  ;;  %323 = vst.msk [vmem:[%s649_s7 + $0x68] sm:$0xff] %vm309_vm0, %v306_v7 }
  0x29   : > { %324 = vst.msk [vmem:[%s649_s7 + $0x70] sm:$0xff] %vm309_vm0, %v307_v8  ;;  %325 = vst.msk [vmem:[%s649_s7 + $0x78] sm:$0xff] %vm309_vm0, %v308_v10 }
  0x2a PF: > { %s13_s16 = sadd.s32 1, %s559_s16   ;;  %s726_s12 = smov %s551_s14 }
  0x2b   : > { %p10_p7 = scmp.ge.s32.totalorder %s13_s16, 6   ;;  %s727_s13 = smov %s555_s15 }
  0x2c   : > { %s728_s14 = smov %s731_s17  ;;  %s729_s15 = smov %s735_s18 }
  0x2d   :  { %12 = sbr.rel (!%p10_p7) target bundleno = 3 (0x3), region = 62 }

// kernel: up_forward.4
= control target key start
LH: loop header
LB: loop body
LE: loop exit
PB: predicated region body
PF: predicated region fallthrough
CT: control target
= control target key end

     0   :  { %s4483_s18 = smov 0   ;;  %s4485_s19 = smov 0   ;;  %s5593_s0 = inlined_call_operand.vmem [shape: bf16[2,16,16,4], index: 0, kind: input, shape index: {}]   ;;  %s5594_s1 = inlined_call_operand.vmem [shape: f32[1,4], index: 1, kind: input, shape index: {}]   ;;  %s5595_s2 = inlined_call_operand.vmem [shape: f32[1,4], index: 2, kind: input, shape index: {}]   ;;  %s5596_s3 = inlined_call_operand.vmem [shape: bf16[36,8], index: 3, kind: input, shape index: {}]   ;;  %s5597_s4 = inlined_call_operand.vmem [shape: bf16[2,16,16,8], index: 4, kind: output, shape index: {0}]   ;;  %s5598_s5 = inlined_call_operand.vmem [shape: f32[2,2,2,8], index: 5, kind: output, shape index: {1}]  }
   0x1   :  { %s4487_s20 = smov 0   ;;  %s4489_s21 = smov 0  }
   0x2   :  { %s4491_s22 = smov 0  }
   0x3 LB: > { %s25_s23 = sadd.s32 1, %s4441_s20  ;;  %s28_s24 = sadd.s32 1, %s4445_s21  ;;  %s4449_s22 = sphi %s4491_s22, %s16_s22   ;;  %s4445_s21 = sphi %s4489_s21, %s5631_s21   ;;  %s4441_s20 = sphi %s4487_s20, %s5630_s20   ;;  %s4437_s19 = sphi %s4485_s19, %s5629_s19   ;;  %s4433_s18 = sphi %s4483_s18, %s5628_s18  }
   0x4   : > { %p26_p0 = scmp.ge.s32.totalorder %s25_s23, 2  ;;  %p3633_p1 = scmp.ge.s32.totalorder %s4449_s22, 1 }
   0x5   : > { %p206_p2 = scmp.lt.s32.totalorder %s4449_s22, 5 }
   0x6   : > { %s5633_s23 = smov (%p26_p0, %s25_s23), 0  ;;  %s5635_s24 = smov (!%p26_p0, %s28_s24), %s4445_s21 }
   0x7   : > { %p207_p3 = pnand %p3633_p1, %p206_p2  ;;  %p30_p4 = scmp.ge.s32.totalorder %s5635_s24, 2 }
   0x9   : > { %s5637_s24 = smov (%p30_p4, %s5635_s24), 0  ;;  %210 = sbr.rel (%p207_p3) target bundleno = 572 (0x23c), region = 36 }
  0x10   : > { %vm275_vm0 = vcmask 24576   ;;  %vm276_vm1 = vsmask.f32 256  ;;  %v281_v0 = vld [vmem:[#allocation2 + $0xc] sm:$0x1]  ;;  %p247_p5 = scmp.lt.s32.totalorder %s4437_s19, 1 }
  0x11   : > { %vm4517_vm2 = vmand %vm275_vm0, %vm276_vm1  ;;  %v284_v2 = vld [vmem:[#allocation2 + $0x18] sm:$0x1]  ;;  %v287_v3 = vld [vmem:[#allocation2 + $0x24] sm:$0x1]  ;;  %vm308_vm3 = vsmask.f32 7938 }
  0x12   : > { %v282_v4 = vsel %vm4517_vm2, 0, %v281_v0  ;;  %v285_v5 = vsel %vm4517_vm2, 0, %v284_v2  ;;  %v288_v6 = vsel %vm4517_vm2, 0, %v287_v3  ;;  %v290_v7 = vld [vmem:[#allocation2 + $0x30] sm:$0x1]  ;;  %s5639_s19 = smov (!%p247_p5, %s4437_s19), 1  ;;  %vm4533_vm4 = vmand %vm275_vm0, %vm308_vm3 }
  0x13   : > { %283 = vst [vmem:[#allocation2 + $0xc] sm:$0x1] %v282_v4  ;;  %286 = vst [vmem:[#allocation2 + $0x18] sm:$0x1] %v285_v5  ;;  %v291_v8 = vsel %vm4517_vm2, 0, %v290_v7  ;;  %s4538_s25 = sshll.u32 %s4433_s18, 3 }
  0x14   : > { %289 = vst [vmem:[#allocation2 + $0x24] sm:$0x1] %v288_v6  ;;  %v293_v9 = vld [vmem:[#allocation2 + $0x3c] sm:$0x1]  ;;  %v296_v10 = vld [vmem:[#allocation2 + $0x48] sm:$0x1] }
  0x15   : > { %292 = vst [vmem:[#allocation2 + $0x30] sm:$0x1] %v291_v8  ;;  %v294_v12 = vsel %vm4517_vm2, 0, %v293_v9  ;;  %v297_v13 = vsel %vm4517_vm2, 0, %v296_v10  ;;  %v299_v14 = vld [vmem:[#allocation2 + $0x54] sm:$0x1] }
  0x16   : > { %v302_v15 = vld [vmem:[#allocation2 + $0x60] sm:$0x1]  ;;  %295 = vst [vmem:[#allocation2 + $0x3c] sm:$0x1] %v294_v12  ;;  %298 = vst [vmem:[#allocation2 + $0x48] sm:$0x1] %v297_v13 }
  0x17   : > { %v300_v16 = vsel %vm4517_vm2, 0, %v299_v14  ;;  %v303_v17 = vsel %vm4517_vm2, 0, %v302_v15  ;;  %v313_v18 = vld [vmem:[#allocation2 + $0x14] sm:$0x1]  ;;  %v316_v19 = vld [vmem:[#allocation2 + $0x20] sm:$0x1] }
  0x18   : > { %301 = vst [vmem:[#allocation2 + $0x54] sm:$0x1] %v300_v16  ;;  %304 = vst [vmem:[#allocation2 + $0x60] sm:$0x1] %v303_v17  ;;  %v314_v20 = vsel %vm4533_vm4, 0, %v313_v18  ;;  %v317_v21 = vsel %vm4533_vm4, 0, %v316_v19 }
  0x19   : > { %v319_v22 = vld [vmem:[#allocation2 + $0x2c] sm:$0x1]  ;;  %v322_v23 = vld [vmem:[#allocation2 + $0x38] sm:$0x1]  ;;  %315 = vst [vmem:[#allocation2 + $0x14] sm:$0x1] %v314_v20 }
  0x1a   : > { %318 = vst [vmem:[#allocation2 + $0x20] sm:$0x1] %v317_v21  ;;  %v320_v24 = vsel %vm4533_vm4, 0, %v319_v22  ;;  %v323_v25 = vsel %vm4533_vm4, 0, %v322_v23  ;;  %v325_v26 = vld [vmem:[#allocation2 + $0x44] sm:$0x1] }
  0x1b   : > { %v328_v27 = vld [vmem:[#allocation2 + $0x50] sm:$0x1]  ;;  %321 = vst [vmem:[#allocation2 + $0x2c] sm:$0x1] %v320_v24  ;;  %324 = vst [vmem:[#allocation2 + $0x38] sm:$0x1] %v323_v25 }
  0x1c   : > { %v326_v28 = vsel %vm4533_vm4, 0, %v325_v26  ;;  %v329_v29 = vsel %vm4533_vm4, 0, %v328_v27  ;;  %v331_v30 = vld [vmem:[#allocation2 + $0x5c] sm:$0x1]  ;;  %v334_v31 = vld [vmem:[#allocation2 + $0x68] sm:$0x1] }
  0x1d   : > { %327 = vst [vmem:[#allocation2 + $0x44] sm:$0x1] %v326_v28  ;;  %330 = vst [vmem:[#allocation2 + $0x50] sm:$0x1] %v329_v29  ;;  %v332_v32 = vsel %vm4533_vm4, 0, %v331_v30  ;;  %v335_v33 = vsel %vm4533_vm4, 0, %v334_v31 }
  0x1e   : > { %v278_v34 = vld [vmem:[#allocation2] sm:$0x1]  ;;  %v305_v35 = vld [vmem:[#allocation2 + $0x6c] sm:$0x1]  ;;  %333 = vst [vmem:[#allocation2 + $0x5c] sm:$0x1] %v332_v32 }
  0x1f   : > { %336 = vst [vmem:[#allocation2 + $0x68] sm:$0x1] %v335_v33  ;;  %v279_v36 = vsel %vm4517_vm2, 0, %v278_v34  ;;  %v306_v37 = vsel %vm4517_vm2, 0, %v305_v35  ;;  %v310_v38 = vld [vmem:[#allocation2 + $0x8] sm:$0x1] }
  0x20   : > { %v337_v39 = vld [vmem:[#allocation2 + $0x74] sm:$0x1]  ;;  %280 = vst [vmem:[#allocation2] sm:$0x1] %v279_v36  ;;  %307 = vst [vmem:[#allocation2 + $0x6c] sm:$0x1] %v306_v37 }
  0x21   : > { %v311_v40 = vsel %vm4533_vm4, 0, %v310_v38  ;;  %v338_v41 = vsel %vm4533_vm4, 0, %v337_v39  ;;  %s3868_s26 = sshll.u32 %s5639_s19, 7  ;;  %p255_p6 = scmp.lt.s32.totalorder %s4538_s25, 15  ;;  %v4586_v42 = vld [vmem:[%s5594_s1] ss:$0 sm:$0xff] }
  0x22   : > { %312 = vst [vmem:[#allocation2 + $0x8] sm:$0x1] %v311_v40  ;;  %339 = vst [vmem:[#allocation2 + $0x74] sm:$0x1] %v338_v41  ;;  %s4577_s29 = scalar_lea.vmem %s5593_s0, %s3868_s26  ;;  %s3638_s30 = sshll.u32 %s5639_s19, 5  ;;  %vm646_vm5 = vcmask 27648  }
  0x23   : > { %s256_s6 = scalar_select %p255_p6, %s4538_s25, 15  ;;  %v4607_v51 = vld [vmem:[%s5595_s2] ss:$0 sm:$0xff]  ;;  %vm483_vm6 = vsmask.f32 4368  ;;  %vm4636_vm7 = vmand %vm646_vm5, %vm308_vm3 }
  0x24   : > { %p265_p7 = scmp.lt.s32.totalorder %s4433_s18, 1  ;;  %s3870_s8 = sshll.u32 %s4433_s18, 6  ;;  %v648_v35 = vld [vmem:[#allocation2 + $0xc] sm:$0xf]  ;;  %vm4642_vm8 = vmor %vm276_vm1, %vm483_vm6  ;;  %v653_v40 = vld [vmem:[#allocation2 + $0x14] sm:$0x1] }
  0x25   : > { %s3637_s7 = sshll.u32 %s256_s6, 1  ;;  %s4589_s12 = scalar_lea.vmem %s4577_s29, %s3870_s8 }
  0x26   : > { %s259_s9 = sadd.s32 %s3638_s30, %s3637_s7  ;;  %v3910_v43 = vld [vmem:[%s4589_s12] sm:$0xff]   ;;  %v3949_v44 = vld [vmem:[%s4589_s12 + $0x8] sm:$0xff]   ;;  %v3950_v45 = vld [vmem:[%s4589_s12 + $0x10] sm:$0xff]   ;;  %s3640_s17 = sshll.u32 %s5639_s19, 1 }
  0x27   : > { %s3639_s13 = sshll.u32 %s259_s9, 2  ;;  %v3911_v46 = vunpack.c.l.bf16 %v3910_v43  ;;  %v3912_v47 = vunpack.c.h.bf16 %v3910_v43  ;;  %v3915_v48 = vunpack.c.l.bf16 %v3949_v44  ;;  %v3916_v49 = vunpack.c.h.bf16 %v3949_v44  ;;  %v3951_v50 = vld [vmem:[%s4589_s12 + $0x18] sm:$0xff]   ;;  %p3663_p8 = scmp.ne.s32.totalorder %s4433_s18, 0 }
  0x28   : > { %s4597_s16 = scalar_lea.vmem %s5597_s4, %s3639_s13  ;;  %v3919_v52 = vunpack.c.l.bf16 %v3950_v45  ;;  %v3920_v53 = vunpack.c.h.bf16 %v3950_v45  ;;  %v3923_v54 = vunpack.c.l.bf16 %v3951_v50  ;;  %v3924_v55 = vunpack.c.h.bf16 %v3951_v50  ;;  %v656_v50 = vld [vmem:[#allocation2 + $0x18] sm:$0xf] }
  0x29   : > { %s266_s26 = scalar_select %p265_p7, %s4433_s18, 1  ;;  %v381_v56 = vmul.f32 %v3911_v46, %v4586_v42  ;;  %v382_v57 = vmul.f32 %v3912_v47, %v4586_v42  ;;  %v383_v58 = vmul.f32 %v3915_v48, %v4586_v42  ;;  %v384_v59 = vmul.f32 %v3916_v49, %v4586_v42 }
  0x2a   : > { %v385_v60 = vmul.f32 %v3919_v52, %v4586_v42  ;;  %v386_v61 = vmul.f32 %v3920_v53, %v4586_v42  ;;  %v387_v62 = vmul.f32 %v3923_v54, %v4586_v42  ;;  %v388_v63 = vmul.f32 %v3924_v55, %v4586_v42  ;;  %v660_v52 = vld [vmem:[#allocation2 + $0x20] sm:$0x1] }
  0x2b   : > { %s268_s19 = sadd.s32 %s3640_s17, %s266_s26  ;;  %v403_v0 = vadd.f32 %v4607_v51, %v381_v56  ;;  %v404_v2 = vadd.f32 %v4607_v51, %v382_v57  ;;  %v405_v3 = vadd.f32 %v4607_v51, %v383_v58  ;;  %v406_v4 = vadd.f32 %v4607_v51, %v384_v59 }
  0x2c   : > { %s3641_s30 = sshll.u32 %s268_s19, 1  ;;  %v407_v5 = vadd.f32 %v4607_v51, %v385_v60  ;;  %v408_v6 = vadd.f32 %v4607_v51, %v386_v61  ;;  %v409_v7 = vadd.f32 %v4607_v51, %v387_v62  ;;  %v410_v8 = vadd.f32 %v4607_v51, %v388_v63 }
  0x2d   : > { %s4624_s8 = scalar_lea.vmem %s5598_s5, %s3641_s30  ;;  %v419_v9 = vmax.f32 %v403_v0, 0.0  ;;  %v420_v10 = vmax.f32 %v404_v2, 0.0  ;;  %v421_v11 = vmax.f32 %v405_v3, 0.0  ;;  %v422_v12 = vmax.f32 %v406_v4, 0.0  ;;  %v663_v0 = vld [vmem:[#allocation2 + $0x24] sm:$0xf] }
  0x2e   : > { %v423_v13 = vmax.f32 %v407_v5, 0.0  ;;  %v424_v14 = vmax.f32 %v408_v6, 0.0  ;;  %v425_v15 = vmax.f32 %v409_v7, 0.0  ;;  %v426_v16 = vmax.f32 %v410_v8, 0.0  ;;  %v3952_v3 = vld [vmem:[%s4589_s12 + $0x20] sm:$0xff]  }
  0x2f   : > { %v3871_v17 = vpack.c.bf16 %v419_v9, %v419_v9  ;;  %v3872_v18 = vpack.c.bf16 %v420_v10, %v420_v10  ;;  %v3873_v19 = vpack.c.bf16 %v421_v11, %v421_v11  ;;  %v3874_v20 = vpack.c.bf16 %v422_v12, %v422_v12  ;;  %v667_v6 = vld [vmem:[#allocation2 + $0x2c] sm:$0x1] }
  0x30   : > { %v3875_v21 = vpack.c.bf16 %v423_v13, %v423_v13  ;;  %v3876_v22 = vpack.c.bf16 %v424_v14, %v424_v14  ;;  %v4630_v23 = vpack.c.bf16 %v425_v15, %v425_v15  ;;  %v4632_v24 = vpack.c.bf16 %v426_v16, %v426_v16  ;;  %v3953_v9 = vld [vmem:[%s4589_s12 + $0x28] sm:$0xff]  }
  0x31   : > { %v486_v25 = vshrl.u32 %v3871_v17, 16  ;;  %v489_v26 = vshll.u32 %v3871_v17, 16  ;;  %v494_v27 = vshrl.u32 %v3872_v18, 16  ;;  %v497_v28 = vshll.u32 %v3872_v18, 16 }
  0x32   : > { %v503_v29 = vshrl.u32 %v3873_v19, 16  ;;  %v506_v30 = vshll.u32 %v3873_v19, 16  ;;  %v511_v31 = vshrl.u32 %v3874_v20, 16  ;;  %v514_v32 = vshll.u32 %v3874_v20, 16  ;;  %v670_v20 = vld [vmem:[#allocation2 + $0x30] sm:$0xf] }
  0x33   : > { %v488_v33 = vrot.slane %v486_v25, 7  ;;  %v496_v36 = vrot.slane %v494_v27, 7  ;;  %v520_v37 = vshrl.u32 %v3875_v21, 16  ;;  %v523_v38 = vshll.u32 %v3875_v21, 16 }
  0x34   : > { %v505_v41 = vrot.slane %v503_v29, 7  ;;  %v513_v43 = vrot.slane %v511_v31, 7  ;;  %v528_v44 = vshrl.u32 %v3876_v22, 16  ;;  %v531_v45 = vshll.u32 %v3876_v22, 16 }
  0x35   : > { %v491_v46 = vor.u32 %v489_v26, %v488_v33  ;;  %v492_v47 = vrot.slane %v488_v33, 4  ;;  %v499_v48 = vor.u32 %v497_v28, %v496_v36  ;;  %v501_v49 = vrot.slane %v496_v36, 4  ;;  %v674_v26 = vld [vmem:[#allocation2 + $0x38] sm:$0x1] }
  0x36   : > { %v508_v53 = vor.u32 %v506_v30, %v505_v41  ;;  %v509_v54 = vrot.slane %v505_v41, 4  ;;  %v516_v55 = vor.u32 %v514_v32, %v513_v43  ;;  %v518_v56 = vrot.slane %v513_v43, 4 }
  0x37   : > { %v649_v57 = vsel %vm4636_vm7, %v491_v46, %v648_v35  ;;  %v500_v58 = vsel %vm4642_vm8, %v492_v47, %v499_v48  ;;  %v654_v59 = vsel %vm4517_vm2, %v501_v49, %v653_v40  ;;  %v522_v60 = vrot.slane %v520_v37, 7 }
  0x38   : > { %650 = vst [vmem:[#allocation2 + $0xc] sm:$0xf] %v649_v57  ;;  %652 = vst.msk [vmem:[#allocation2 + $0x10] sm:$0xf] %vm646_vm5, %v500_v58  ;;  %v657_v61 = vsel %vm4636_vm7, %v508_v53, %v656_v50  ;;  %v517_v62 = vsel %vm4642_vm8, %v509_v54, %v516_v55  ;;  %v661_v63 = vsel %vm4517_vm2, %v518_v56, %v660_v52  ;;  %v530_v2 = vrot.slane %v528_v44, 7 }
  0x39   : > { %655 = vst [vmem:[#allocation2 + $0x14] sm:$0x1] %v654_v59  ;;  %658 = vst [vmem:[#allocation2 + $0x18] sm:$0xf] %v657_v61  ;;  %v525_v4 = vor.u32 %v523_v38, %v522_v60  ;;  %v526_v5 = vrot.slane %v522_v60, 4  ;;  %v537_v7 = vshrl.u32 %v4630_v23, 16  ;;  %v3927_v16 = vunpack.c.l.bf16 %v3952_v3 }
  0x3a   : > { %659 = vst.msk [vmem:[#allocation2 + $0x1c] sm:$0xf] %vm646_vm5, %v517_v62  ;;  %662 = vst [vmem:[#allocation2 + $0x20] sm:$0x1] %v661_v63  ;;  %v540_v8 = vshll.u32 %v4630_v23, 16  ;;  %v533_v10 = vor.u32 %v531_v45, %v530_v2  ;;  %v535_v11 = vrot.slane %v530_v2, 4  ;;  %v3928_v17 = vunpack.c.h.bf16 %v3952_v3 }
  0x3b   : > { %v545_v12 = vshrl.u32 %v4632_v24, 16  ;;  %v548_v13 = vshll.u32 %v4632_v24, 16  ;;  %v664_v14 = vsel %vm4636_vm7, %v525_v4, %v663_v0  ;;  %v539_v15 = vrot.slane %v537_v7, 7  ;;  %v3954_v23 = vld [vmem:[%s4589_s12 + $0x30] sm:$0xff]   ;;  %v3955_v38 = vld [vmem:[%s4589_s12 + $0x38] sm:$0xff]  }
  0x3c   : > { %665 = vst [vmem:[#allocation2 + $0x24] sm:$0xf] %v664_v14  ;;  %v534_v18 = vsel %vm4642_vm8, %v526_v5, %v533_v10  ;;  %v668_v19 = vsel %vm4517_vm2, %v535_v11, %v667_v6  ;;  %v3931_v22 = vunpack.c.l.bf16 %v3953_v9  ;;  %v389_v27 = vmul.f32 %v3927_v16, %v4586_v42 }
  0x3d   : > { %v547_v21 = vrot.slane %v545_v12, 7  ;;  %666 = vst.msk [vmem:[#allocation2 + $0x28] sm:$0xf] %vm646_vm5, %v534_v18  ;;  %669 = vst [vmem:[#allocation2 + $0x2c] sm:$0x1] %v668_v19  ;;  %v542_v24 = vor.u32 %v540_v8, %v539_v15  ;;  %v543_v25 = vrot.slane %v539_v15, 4  ;;  %v390_v28 = vmul.f32 %v3928_v17, %v4586_v42 }
  0x3e   : > { %v391_v31 = vmul.f32 %v3931_v22, %v4586_v42  ;;  %v3932_v32 = vunpack.c.h.bf16 %v3953_v9  ;;  %v411_v35 = vadd.f32 %v4607_v51, %v389_v27  ;;  %v3935_v37 = vunpack.c.l.bf16 %v3954_v23  ;;  %v677_v8 = vld [vmem:[#allocation2 + $0x3c] sm:$0xf]  ;;  %v681_v12 = vld [vmem:[#allocation2 + $0x44] sm:$0x1] }
  0x3f   : > { %v550_v29 = vor.u32 %v548_v13, %v547_v21  ;;  %v552_v30 = vrot.slane %v547_v21, 4  ;;  %v671_v33 = vsel %vm4636_vm7, %v542_v24, %v670_v20  ;;  %v412_v36 = vadd.f32 %v4607_v51, %v390_v28  ;;  %v684_v21 = vld [vmem:[#allocation2 + $0x48] sm:$0xf] }
  0x40   : > { %672 = vst [vmem:[#allocation2 + $0x30] sm:$0xf] %v671_v33  ;;  %v413_v43 = vadd.f32 %v4607_v51, %v391_v31  ;;  %v392_v44 = vmul.f32 %v3932_v32, %v4586_v42  ;;  %v427_v45 = vmax.f32 %v411_v35, 0.0  ;;  %v393_v47 = vmul.f32 %v3935_v37, %v4586_v42 }
  0x41   : > { %v551_v40 = vsel %vm4642_vm8, %v543_v25, %v550_v29  ;;  %v675_v41 = vsel %vm4517_vm2, %v552_v30, %v674_v26  ;;  %v428_v46 = vmax.f32 %v412_v36, 0.0  ;;  %v3936_v48 = vunpack.c.h.bf16 %v3954_v23  ;;  %v688_v29 = vld [vmem:[#allocation2 + $0x50] sm:$0x1]  ;;  %v691_v36 = vld [vmem:[#allocation2 + $0x54] sm:$0xf] }
  0x42   : > { %673 = vst.msk [vmem:[#allocation2 + $0x34] sm:$0xf] %vm646_vm5, %v551_v40  ;;  %676 = vst [vmem:[#allocation2 + $0x38] sm:$0x1] %v675_v41  ;;  %v429_v49 = vmax.f32 %v413_v43, 0.0  ;;  %v414_v50 = vadd.f32 %v4607_v51, %v392_v44  ;;  %v3939_v52 = vunpack.c.l.bf16 %v3955_v38  ;;  %v3940_v53 = vunpack.c.h.bf16 %v3955_v38 }
  0x43   : > { %v3879_v54 = vpack.c.bf16 %v427_v45, %v427_v45  ;;  %v3880_v55 = vpack.c.bf16 %v428_v46, %v428_v46  ;;  %v415_v56 = vadd.f32 %v4607_v51, %v393_v47  ;;  %v394_v57 = vmul.f32 %v3936_v48, %v4586_v42 }
  0x44   : > { %v3881_v58 = vpack.c.bf16 %v429_v49, %v429_v49  ;;  %v430_v59 = vmax.f32 %v414_v50, 0.0  ;;  %v395_v60 = vmul.f32 %v3939_v52, %v4586_v42  ;;  %v396_v61 = vmul.f32 %v3940_v53, %v4586_v42 }
  0x45   : > { %v554_v62 = vshrl.u32 %v3879_v54, 16  ;;  %v557_v63 = vshll.u32 %v3879_v54, 16  ;;  %v562_v0 = vshrl.u32 %v3880_v55, 16  ;;  %v565_v2 = vshll.u32 %v3880_v55, 16 }
  0x46   : > { %v571_v3 = vshrl.u32 %v3881_v58, 16  ;;  %v574_v4 = vshll.u32 %v3881_v58, 16  ;;  %v3882_v5 = vpack.c.bf16 %v430_v59, %v430_v59  ;;  %v431_v6 = vmax.f32 %v415_v56, 0.0  ;;  %v695_v58 = vld [vmem:[#allocation2 + $0x5c] sm:$0x1] }
  0x47   : > { %v556_v7 = vrot.slane %v554_v62, 7  ;;  %v564_v9 = vrot.slane %v562_v0, 7  ;;  %v416_v10 = vadd.f32 %v4607_v51, %v394_v57  ;;  %v417_v11 = vadd.f32 %v4607_v51, %v395_v60  ;;  %v698_v59 = vld [vmem:[#allocation2 + $0x60] sm:$0xf] }
  0x48   : > { %v573_v13 = vrot.slane %v571_v3, 7  ;;  %v579_v14 = vshrl.u32 %v3882_v5, 16  ;;  %v582_v15 = vshll.u32 %v3882_v5, 16  ;;  %v3883_v16 = vpack.c.bf16 %v431_v6, %v431_v6 }
  0x49   : > { %v559_v17 = vor.u32 %v557_v63, %v556_v7  ;;  %v560_v18 = vrot.slane %v556_v7, 4  ;;  %v567_v19 = vor.u32 %v565_v2, %v564_v9  ;;  %v569_v20 = vrot.slane %v564_v9, 4  ;;  %v702_v7 = vld [vmem:[#allocation2 + $0x68] sm:$0x1] }
  0x4a   : > { %v576_v22 = vor.u32 %v574_v4, %v573_v13  ;;  %v577_v23 = vrot.slane %v573_v13, 4  ;;  %v581_v24 = vrot.slane %v579_v14, 7  ;;  %v588_v25 = vshrl.u32 %v3883_v16, 16  ;;  %v713_v13 = vld [vmem:[#allocation2 + $0x8] sm:$0x1] (!%p3663_p8) }
  0x4b   : > { %v678_v26 = vsel %vm4636_vm7, %v559_v17, %v677_v8  ;;  %v568_v27 = vsel %vm4642_vm8, %v560_v18, %v567_v19  ;;  %v682_v28 = vsel %vm4517_vm2, %v569_v20, %v681_v12  ;;  %v591_v30 = vshll.u32 %v3883_v16, 16  ;;  %v709_v12 = vld [vmem:[#allocation2] sm:$0xf] (!%p3663_p8) }
  0x4c   : > { %679 = vst [vmem:[#allocation2 + $0x3c] sm:$0xf] %v678_v26  ;;  %680 = vst.msk [vmem:[#allocation2 + $0x40] sm:$0xf] %vm646_vm5, %v568_v27  ;;  %v685_v31 = vsel %vm4636_vm7, %v576_v22, %v684_v21  ;;  %v584_v32 = vor.u32 %v582_v15, %v581_v24  ;;  %v586_v33 = vrot.slane %v581_v24, 4  ;;  %v590_v35 = vrot.slane %v588_v25, 7 }
  0x4d   : > { %683 = vst [vmem:[#allocation2 + $0x44] sm:$0x1] %v682_v28  ;;  %686 = vst [vmem:[#allocation2 + $0x48] sm:$0xf] %v685_v31  ;;  %v432_v37 = vmax.f32 %v416_v10, 0.0  ;;  %v433_v38 = vmax.f32 %v417_v11, 0.0  ;;  %v418_v40 = vadd.f32 %v4607_v51, %v396_v61 }
  0x4e   : > { %v585_v41 = vsel %vm4642_vm8, %v577_v23, %v584_v32  ;;  %v689_v43 = vsel %vm4517_vm2, %v586_v33, %v688_v29  ;;  %v593_v44 = vor.u32 %v591_v30, %v590_v35  ;;  %v594_v55 = vrot.slane %v590_v35, 4 }
  0x4f   : > { %687 = vst.msk [vmem:[#allocation2 + $0x4c] sm:$0xf] %vm646_vm5, %v585_v41  ;;  %690 = vst [vmem:[#allocation2 + $0x50] sm:$0x1] %v689_v43  ;;  %v3884_v45 = vpack.c.bf16 %v432_v37, %v432_v37  ;;  %v3885_v46 = vpack.c.bf16 %v433_v38, %v433_v38  ;;  %v434_v47 = vmax.f32 %v418_v40, 0.0  ;;  %v710_v14 = vsel (!%p3663_p8), %vm4636_vm7, 0, %v709_v12 }
  0x50   : > { %v692_v48 = vsel %vm4636_vm7, %v593_v44, %v691_v36  ;;  %v4451_v15 = vmov (!%p3663_p8), 0   ;;  %v714_v16 = vsel (!%p3663_p8), %vm4517_vm2, 0, %v713_v13  ;;  %711 = vst [vmem:[#allocation2] sm:$0xf] (!%p3663_p8), %v710_v14 }
  0x51   : > { %693 = vst [vmem:[#allocation2 + $0x54] sm:$0xf] %v692_v48  ;;  %v596_v49 = vshrl.u32 %v3884_v45, 16  ;;  %v599_v50 = vshll.u32 %v3884_v45, 16  ;;  %v605_v52 = vshrl.u32 %v3885_v46, 16  ;;  %v608_v53 = vshll.u32 %v3885_v46, 16 }
  0x52   : > { %v3886_v54 = vpack.c.bf16 %v434_v47, %v434_v47  ;;  %712 = vst.msk [vmem:[#allocation2 + $0x4] sm:$0xf] (!%p3663_p8), %vm646_vm5, %v4451_v15  ;;  %715 = vst [vmem:[#allocation2 + $0x8] sm:$0x1] (!%p3663_p8), %v714_v16 }
  0x53   : > { %v598_v56 = vrot.slane %v596_v49, 7  ;;  %v607_v57 = vrot.slane %v605_v52, 7 }
  0x54   : > { %v613_v60 = vshrl.u32 %v3886_v54, 16  ;;  %v616_v61 = vshll.u32 %v3886_v54, 16 }
  0x55   : > { %v601_v62 = vor.u32 %v599_v50, %v598_v56  ;;  %v603_v63 = vrot.slane %v598_v56, 4  ;;  %v610_v0 = vor.u32 %v608_v53, %v607_v57  ;;  %v611_v2 = vrot.slane %v607_v57, 4  ;;  %708 = sbr.rel (%p3663_p8) target bundleno = 92 (0x5c), region = 40 }
  0x56   : > { %v615_v3 = vrot.slane %v613_v60, 7 }
  0x57   : > { %v602_v4 = vsel %vm4642_vm8, %v594_v55, %v601_v62  ;;  %v696_v5 = vsel %vm4517_vm2, %v603_v63, %v695_v58  ;;  %v699_v6 = vsel %vm4636_vm7, %v610_v0, %v698_v59 }
  0x58   : > { %694 = vst.msk [vmem:[#allocation2 + $0x58] sm:$0xf] %vm646_vm5, %v602_v4  ;;  %697 = vst [vmem:[#allocation2 + $0x5c] sm:$0x1] %v696_v5  ;;  %v618_v8 = vor.u32 %v616_v61, %v615_v3  ;;  %v620_v9 = vrot.slane %v615_v3, 4 }
  0x59   : > { %700 = vst [vmem:[#allocation2 + $0x60] sm:$0xf] %v699_v6 }
  0x5a   : > { %v619_v10 = vsel %vm4642_vm8, %v611_v2, %v618_v8  ;;  %v703_v11 = vsel %vm4517_vm2, %v620_v9, %v702_v7 }
  0x5b   : > { %701 = vst.msk [vmem:[#allocation2 + $0x64] sm:$0xf] %vm646_vm5, %v619_v10  ;;  %704 = vst [vmem:[#allocation2 + $0x68] sm:$0x1] %v703_v11 }
  0x5c PF: > { %p3664_p9 = scmp.le.s32.totalorder %s4433_s18, 0 }
  0x5d   : > { %s3665_s9 = sadd.s32 (!%p3664_p9), 4294967295, %s4538_s25  ;;  %v760_v35 = vld [vmem:[#allocation2] sm:$0xf] (!%p3664_p9)  ;;  %v764_v36 = vld [vmem:[#allocation2 + $0x8] sm:$0x1] (!%p3664_p9) }
  0x5e   : > { %719 = sbr.rel (%p3664_p9) target bundleno = 116 (0x74), region = 44  ;;  %s3887_s10 = sshll.u32 (!%p3664_p9), %s3665_s9, 3 }
  0x5f   : > { %s723_s11 = scalar_lea.vmem (!%p3664_p9), %s4577_s29, %s3887_s10 }
  0x60   : > { %v3942_v17 = vld [vmem:[%s723_s11] sm:$0xff] (!%p3664_p9)  }
  0x61   : > { %v3943_v18 = vunpack.c.l.bf16 (!%p3664_p9), %v3942_v17  ;;  %v3944_v19 = vunpack.c.h.bf16 (!%p3664_p9), %v3942_v17 }
  0x63   : > { %v728_v20 = vmul.f32 (!%p3664_p9), %v3943_v18, %v4586_v42  ;;  %v729_v21 = vmul.f32 (!%p3664_p9), %v3944_v19, %v4586_v42 }
  0x65   : > { %v730_v22 = vadd.f32 %v4607_v51, %v728_v20  ;;  %v731_v23 = vadd.f32 %v4607_v51, %v729_v21 }
  0x67   : > { %v732_v24 = vmax.f32 %v730_v22, 0.0  ;;  %v733_v25 = vmax.f32 %v731_v23, 0.0 }
  0x69   : > { %v3888_v26 = vpack.c.bf16 %v732_v24, %v732_v24  ;;  %v3889_v27 = vpack.c.bf16 %v733_v25, %v733_v25 }
  0x6b   : > { %v741_v28 = vshrl.u32 %v3888_v26, 16  ;;  %v744_v29 = vshll.u32 %v3888_v26, 16  ;;  %v749_v30 = vshrl.u32 %v3889_v27, 16  ;;  %v752_v31 = vshll.u32 %v3889_v27, 16 }
  0x6d   : > { %v743_v32 = vrot.slane %v741_v28, 7  ;;  %v751_v33 = vrot.slane %v749_v30, 7 }
  0x6f   : > { %v746_v37 = vor.u32 %v744_v29, %v743_v32  ;;  %v747_v38 = vrot.slane %v743_v32, 4  ;;  %v754_v40 = vor.u32 %v752_v31, %v751_v33  ;;  %v756_v41 = vrot.slane %v751_v33, 4 }
  0x71   : > { %v761_v43 = vsel %vm4636_vm7, %v746_v37, %v760_v35  ;;  %v755_v44 = vsel %vm4642_vm8, %v747_v38, %v754_v40  ;;  %v765_v45 = vsel %vm4517_vm2, %v756_v41, %v764_v36 }
  0x72   : > { %762 = vst [vmem:[#allocation2] sm:$0xf] %v761_v43  ;;  %763 = vst.msk [vmem:[#allocation2 + $0x4] sm:$0xf] %vm646_vm5, %v755_v44 }
  0x73   : > { %766 = vst [vmem:[#allocation2 + $0x8] sm:$0x1] %v765_v45 }
  0x74 PF: > { %p3670_p10 = scmp.ne.s32.totalorder %s4433_s18, 1 }
  0x75   : > { %v772_v46 = vld [vmem:[#allocation2 + $0x6c] sm:$0xf] (!%p3670_p10)  ;;  %v776_v47 = vld [vmem:[#allocation2 + $0x74] sm:$0x1] (!%p3670_p10)  ;;  %v4452_v49 = vmov (!%p3670_p10), 0  }
  0x76   : > { %770 = sbr.rel (%p3670_p10) target bundleno = 125 (0x7d), region = 48  ;;  %v773_v48 = vsel (!%p3670_p10), %vm4636_vm7, 0, %v772_v46  ;;  %775 = vst.msk [vmem:[#allocation2 + $0x70] sm:$0xf] (!%p3670_p10), %vm646_vm5, %v4452_v49  ;;  %v777_v50 = vsel (!%p3670_p10), %vm4517_vm2, 0, %v776_v47 }
  0x77   : > { %774 = vst [vmem:[#allocation2 + $0x6c] sm:$0xf] (!%p3670_p10), %v773_v48  ;;  %778 = vst [vmem:[#allocation2 + $0x74] sm:$0x1] (!%p3670_p10), %v777_v50 }
  0x7d PF: > { %p3671_p11 = scmp.ge.s32.totalorder %s4433_s18, 1 }
  0x7e   : > { %v3956_v52 = vld [vmem:[%s4589_s12 + $0x40] sm:$0xff] (!%p3671_p11)   ;;  %v824_v6 = vld [vmem:[#allocation2 + $0x6c] sm:$0xf] (!%p3671_p11)  ;;  %v828_v7 = vld [vmem:[#allocation2 + $0x74] sm:$0x1] (!%p3671_p11) }
  0x7f   : > { %782 = sbr.rel (%p3671_p11) target bundleno = 146 (0x92), region = 52  ;;  %v3947_v53 = vunpack.c.l.bf16 (!%p3671_p11), %v3956_v52  ;;  %v3948_v54 = vunpack.c.h.bf16 (!%p3671_p11), %v3956_v52 }
  0x81   : > { %v791_v55 = vmul.f32 (!%p3671_p11), %v3947_v53, %v4586_v42  ;;  %v792_v56 = vmul.f32 (!%p3671_p11), %v3948_v54, %v4586_v42 }
  0x83   : > { %v793_v57 = vadd.f32 (!%p3671_p11), %v4607_v51, %v791_v55  ;;  %v794_v58 = vadd.f32 (!%p3671_p11), %v4607_v51, %v792_v56 }
  0x85   : > { %v795_v59 = vmax.f32 (!%p3671_p11), %v793_v57, 0.0  ;;  %v796_v60 = vmax.f32 (!%p3671_p11), %v794_v58, 0.0 }
  0x87   : > { %v3891_v61 = vpack.c.bf16 %v795_v59, %v795_v59  ;;  %v3892_v62 = vpack.c.bf16 %v796_v60, %v796_v60 }
  0x89   : > { %v804_v63 = vshrl.u32 %v3891_v61, 16  ;;  %v807_v0 = vshll.u32 %v3891_v61, 16  ;;  %v812_v2 = vshrl.u32 %v3892_v62, 16  ;;  %v815_v3 = vshll.u32 %v3892_v62, 16 }
  0x8b   : > { %v806_v4 = vrot.slane %v804_v63, 7  ;;  %v814_v5 = vrot.slane %v812_v2, 7 }
  0x8d   : > { %v809_v8 = vor.u32 %v807_v0, %v806_v4  ;;  %v810_v9 = vrot.slane %v806_v4, 4  ;;  %v817_v10 = vor.u32 %v815_v3, %v814_v5  ;;  %v819_v42 = vrot.slane %v814_v5, 4 }
  0x8f   : > { %v825_v11 = vsel %vm4636_vm7, %v809_v8, %v824_v6  ;;  %v818_v51 = vsel %vm4642_vm8, %v810_v9, %v817_v10  ;;  %v829_v12 = vsel %vm4517_vm2, %v819_v42, %v828_v7 }
  0x90   : > { %826 = vst [vmem:[#allocation2 + $0x6c] sm:$0xf] %v825_v11  ;;  %827 = vst.msk [vmem:[#allocation2 + $0x70] sm:$0xf] %vm646_vm5, %v818_v51 }
  0x91   : > { %830 = vst [vmem:[#allocation2 + $0x74] sm:$0x1] %v829_v12 }
  0x92 PF: > { %v4382_v13 = vld [vmem:[%s5596_s3] ss:$0 sps:$4 sm:$0xcc]   ;;  %vm1105_vm9 = vcmask 1041408   ;;  %v2035_v34 = vld [vmem:[%s5596_s3 + $0x8] sm:$0x3] }
  0x93   : > { %v4771_v14 = vld [vmem:[#allocation2] sm:$0xf]  ;;  %v4773_v39 = vld [vmem:[#allocation2 + $0x4] sm:$0xf]  ;;  %v1079_v1 = vrot.slane %v4382_v13, 2  ;;  %4334 = vmatprep.subr.msk.bf16.mxu0 %vm1105_vm9, %v2035_v34  ;;  %v4777_v15 = vsel %vm1105_vm9, %v2035_v34, 0 }
  0x94   : > { %v4779_v16 = vld [vmem:[#allocation2 + $0x8] sm:$0x1]  ;;  %vm856_vm10 = vsmask.f32 3328  ;;  %4111 = vmatpush3.bf16.msra.mxu0 %v4777_v15  ;;  %vm857_vm11 = vsmask.f32 7440 }
  0x95   : > { %v860_v17 = vshrl.u32 %v4771_v14, 16  ;;  %v863_v18 = vshll.u32 %v4771_v14, 16  ;;  %v869_v19 = vshll.u32 %v4773_v39, 16  ;;  %4330 = vmatprep.subr.msk.bf16.mxu1 %vm1105_vm9, %v1079_v1  ;;  %v1107_v20 = vsel %vm1105_vm9, %v1079_v1, 0  ;;  %v847_v23 = vld [vmem:[%s5596_s3] sm:$0x3]  ;;  %vm4800_vm13 = vmor %vm856_vm10, %vm857_vm11 }
  0x96   : > { %v873_v21 = vshrl.u32 %v4773_v39, 16  ;;  %v879_v22 = vshll.u32 %v4779_v16, 16  ;;  %4039 = vmatpush3.bf16.msra.mxu1 %v1107_v20  ;;  %v1819_v27 = vld [vmem:[#allocation2 + $0xc] sm:$0xf]  ;;  %vm1080_vm12 = vcmask 31744   ;;  %vm1394_vm14 = vcmask 1042432  }
  0x97   : > { %v862_v24 = vrot.slane %v860_v17, 4  ;;  %v865_v25 = vrot.slane %v863_v18, 5  ;;  %v871_v26 = vrot.slane %v869_v19, 5  ;;  %4331 = vmatprep.subr.msk.bf16.mxu1 %vm1105_vm9, %v847_v23  ;;  %v4793_v29 = vld [vmem:[#allocation2 + $0x10] sm:$0xf]  ;;  %v1844_v32 = vshrl.u32 %v1819_v27, 16 }
  0x98   : > { %v875_v28 = vrot.slane %v873_v21, 4  ;;  %v4795_v30 = vld [vmem:[#allocation2 + $0x14] sm:$0x1]  ;;  %v1847_v33 = vshll.u32 %v1819_v27, 16  ;;  %v1853_v35 = vshll.u32 %v4793_v29, 16  ;;  %v881_v38 = vrot.slane %v879_v22, 5 }
  0x99   : > { %v866_v31 = vor.u32 %v865_v25, %v862_v24  ;;  %v1857_v40 = vshrl.u32 %v4793_v29, 16  ;;  %v1863_v41 = vshll.u32 %v4795_v30, 16  ;;  %v4809_v43 = vld [vmem:[%s5596_s3 + $0x8] ss:$0 sps:$4 sm:$0xcc]   ;;  %v1846_v45 = vrot.slane %v1844_v32, 4 }
  0x9a   : > { %v876_v37 = vor.u32 %v875_v28, %v871_v26  ;;  %v1849_v46 = vrot.slane %v1847_v33, 5  ;;  %v1855_v47 = vrot.slane %v1853_v35, 5  ;;  %v4811_v48 = vld [vmem:[#allocation2 + $0xc] sm:$0xf]  ;;  %v2234_v53 = vrot.slane %v4793_v29, 5 }
  0x9b   : > { %v867_v44 = vrot.slane %v866_v31, 4  ;;  %v1859_v50 = vrot.slane %v1857_v40, 4  ;;  %v1865_v52 = vrot.slane %v1863_v41, 5  ;;  %v4814_v54 = vld [vmem:[#allocation2 + $0x10] sm:$0xf]  ;;  %v2316_v57 = vrot.slane %v4809_v43, 2 }
  0x9c   : > { %v877_v49 = vrot.slane %v876_v37, 4  ;;  %v1850_v56 = vor.u32 %v1849_v46, %v1846_v45  ;;  %v4819_v58 = vld [vmem:[#allocation2 + $0x14] sm:$0x1]  ;;  %v884_v59 = vshrl.u32 %v4811_v48, 16  ;;  %v887_v62 = vshll.u32 %v4811_v48, 16 }
  0x9d   : > { %v872_v55 = vsel %vm4800_vm13, %v867_v44, %v871_v26  ;;  %v1860_v61 = vor.u32 %v1859_v50, %v1855_v47  ;;  %v893_v63 = vshll.u32 %v4814_v54, 16  ;;  %4336 = vmatprep.subr.msk.bf16.mxu0 %vm1105_vm9, %v2316_v57  ;;  %v897_v4 = vshrl.u32 %v4814_v54, 16  ;;  %v1822_v9 = vld [vmem:[#allocation2 + $0x18] sm:$0xf]  ;;  %v4833_v51 = vld [vmem:[#allocation2 + $0x1c] sm:$0xf] }
  0x9e   : > { %v882_v60 = vsel %vm4800_vm13, %v877_v49, %v881_v38  ;;  %v1851_v2 = vrot.slane %v1850_v56, 4  ;;  %v886_v3 = vrot.slane %v884_v59, 4  ;;  %v889_v6 = vrot.slane %v887_v62, 5  ;;  %v4835_v12 = vld [vmem:[#allocation2 + $0x20] sm:$0x1] }
  0x9f   : > { %v3678_v0 = vcombine.low %v872_v55, %v882_v60  ;;  %v1861_v5 = vrot.slane %v1860_v61, 4  ;;  %v895_v7 = vrot.slane %v893_v63, 5  ;;  %v903_v8 = vshll.u32 %v4819_v58, 16  ;;  %v4845_v33 = vld [vmem:[#allocation2 + $0x18] sm:$0xf] }
  0xa0   : > { %v1856_v10 = vsel %vm4800_vm13, %v1851_v2, %v1855_v47  ;;  %v2237_v42 = vrot.slane %v4795_v30, 5  ;;  %v899_v11 = vrot.slane %v897_v4, 4  ;;  %v890_v34 = vor.u32 %v889_v6, %v886_v3  ;;  %v4849_v40 = vld [vmem:[#allocation2 + $0x1c] sm:$0xf]  ;;  %v4858_v46 = vld [vmem:[#allocation2 + $0x20] sm:$0x1] }
  0xa1   : > { %4040 = vmatprep.mubr.msk.bf16.mxu1 %vm1080_vm12, %v3678_v0  ;;  %v1866_v13 = vsel %vm4800_vm13, %v1861_v5, %v1865_v52  ;;  %v905_v1 = vrot.slane %v903_v8, 5  ;;  %v1271_v17 = vsel %vm1105_vm9, %v847_v23, 0  ;;  %v1868_v20 = vshrl.u32 %v1822_v9, 16  ;;  %v1825_v47 = vld [vmem:[#allocation2 + $0x24] sm:$0xf] }
  0xa2   : > { %v3752_v18 = vcombine.low %v1856_v10, %v1866_v13  ;;  %v900_v19 = vor.u32 %v899_v11, %v895_v7  ;;  %v1871_v21 = vshll.u32 %v1822_v9, 16  ;;  %v891_v22 = vrot.slane %v890_v34, 4  ;;  %v4865_v62 = vld [vmem:[#allocation2 + $0x28] sm:$0xf]  ;;  %v4869_v3 = vld [vmem:[#allocation2 + $0x2c] sm:$0x1] }
  0xa3   : > { %v1877_v24 = vshll.u32 %v4833_v51, 16  ;;  %v1881_v25 = vshrl.u32 %v4833_v51, 16  ;;  %v1887_v26 = vshll.u32 %v4835_v12, 16  ;;  %v1870_v28 = vrot.slane %v1868_v20, 4  ;;  %v4873_v8 = vld [vmem:[#allocation2 + $0x24] sm:$0xf] }
  0xa4   : > { %4112 = vmatprep.mubr.msk.bf16.mxu0 %vm1080_vm12, %v3752_v18  ;;  %v901_v27 = vrot.slane %v900_v19, 4  ;;  %v1873_v31 = vrot.slane %v1871_v21, 5  ;;  %v2241_v32 = vrot.slane %v4833_v51, 5  ;;  %v896_v23 = vsel %vm4800_vm13, %v891_v22, %v895_v7 }
  0xa5   : > { %v1879_v35 = vrot.slane %v1877_v24, 5  ;;  %v1883_v37 = vrot.slane %v1881_v25, 4  ;;  %v1889_v38 = vrot.slane %v1887_v26, 5  ;;  %v2244_v45 = vrot.slane %v4835_v12, 5  ;;  %v4886_v25 = vld [vmem:[%s5596_s3 + $0xc] sm:$0x3] }
  0xa6   : > { %v906_v41 = vsel %vm4800_vm13, %v901_v27, %v905_v1  ;;  %v1874_v43 = vor.u32 %v1873_v31, %v1870_v28  ;;  %v4855_v44 = vrot.slane %v2241_v32, 4  ;;  %v2342_v52 = vsel %vm1105_vm9, %v2316_v57, 0  ;;  %v4889_v31 = vld [vmem:[#allocation2 + $0x2c] sm:$0x1] }
  0xa7   : > { %v3679_v49 = vcombine.low %v896_v23, %v906_v41  ;;  %v1884_v50 = vor.u32 %v1883_v37, %v1879_v35  ;;  %v908_v55 = vshrl.u32 %v4845_v33, 16  ;;  %v911_v59 = vshll.u32 %v4845_v33, 16 }
  0xa8   : > { %v1875_v56 = vrot.slane %v1874_v43, 4  ;;  %v917_v60 = vshll.u32 %v4849_v40, 16  ;;  %v921_v61 = vshrl.u32 %v4849_v40, 16  ;;  %v927_v2 = vshll.u32 %v4858_v46, 16  ;;  %v1828_v43 = vld [vmem:[#allocation2 + $0x30] sm:$0xf] }
  0xa9   : > { %4041 = vmatmul.mubr.msk.bf16.vlgmr.msra.gmra.mrb[0].mxu1 %vm1080_vm12, %v3679_v49  ;;  %v1885_v63 = vrot.slane %v1884_v50, 4  ;;  %v910_v0 = vrot.slane %v908_v55, 4  ;;  %v1892_v57 = vshrl.u32 %v1825_v47, 16  ;;  %v913_v5 = vrot.slane %v911_v59, 5 }
  0xaa   : > { %4057 = vmatpush3.bf16.msra.mxu1 %v1271_v17  ;;  %v1880_v4 = vsel %vm4800_vm13, %v1875_v56, %v1879_v35  ;;  %v919_v6 = vrot.slane %v917_v60, 5  ;;  %v923_v7 = vrot.slane %v921_v61, 4  ;;  %v929_v10 = vrot.slane %v927_v2, 5  ;;  %v4878_v17 = vld [vmem:[#allocation2 + $0x28] sm:$0xf] }
  0xab   : > { %v1890_v9 = vsel %vm4800_vm13, %v1885_v63, %v1889_v38  ;;  %v1894_v11 = vrot.slane %v1892_v57, 4  ;;  %v1895_v13 = vshll.u32 %v1825_v47, 16  ;;  %v914_v1 = vor.u32 %v913_v5, %v910_v0  ;;  %v4900_v61 = vld [vmem:[#allocation2 + $0x34] sm:$0xf]  ;;  %v4903_v57 = vld [vmem:[#allocation2 + $0x38] sm:$0x1] }
  0xac   : > { %v3753_v34 = vcombine.low %v1880_v4, %v1890_v9  ;;  %v924_v18 = vor.u32 %v923_v7, %v919_v6  ;;  %v1901_v19 = vshll.u32 %v4865_v62, 16  ;;  %v1905_v21 = vshrl.u32 %v4865_v62, 16 }
  0xad   : > { %v1897_v20 = vrot.slane %v1895_v13, 5  ;;  %v1911_v22 = vshll.u32 %v4869_v3, 16  ;;  %v932_v24 = vshrl.u32 %v4873_v8, 16  ;;  %v915_v26 = vrot.slane %v914_v1, 4 }
  0xae   : > { %4113 = vmatmul.mubr.msk.bf16.vlgmr.msra.gmra.mrb[0].mxu0 %vm1080_vm12, %v3753_v34  ;;  %v925_v27 = vrot.slane %v924_v18, 4  ;;  %v1903_v28 = vrot.slane %v1901_v19, 5  ;;  %v935_v23 = vshll.u32 %v4873_v8, 16  ;;  %v1907_v37 = vrot.slane %v1905_v21, 4  ;;  %v4914_v18 = vld [vmem:[%s5596_s3 + $0x4] sm:$0x3] }
  0xaf   : > { %4129 = vmatpush3.bf16.msra.mxu0 %v2342_v52  ;;  %v1898_v35 = vor.u32 %v1897_v20, %v1894_v11  ;;  %v1913_v38 = vrot.slane %v1911_v22, 5  ;;  %v934_v41 = vrot.slane %v932_v24, 4  ;;  %v920_v47 = vsel %vm4800_vm13, %v915_v26, %v919_v6  ;;  %v4919_v24 = vld [vmem:[#allocation2 + $0x34] sm:$0xf]  ;;  %4332 = vmatprep.subr.msk.bf16.mxu1 %vm1105_vm9, %v4914_v18 }
  0xb0   : > { %v930_v49 = vsel %vm4800_vm13, %v925_v27, %v929_v10  ;;  %v937_v50 = vrot.slane %v935_v23, 5  ;;  %v941_v55 = vshll.u32 %v4878_v17, 16  ;;  %4337 = vmatprep.subr.msk.bf16.mxu0 %vm1105_vm9, %v4886_v25  ;;  %v1908_v52 = vor.u32 %v1907_v37, %v1903_v28  ;;  %v4908_v10 = vld [vmem:[#allocation2 + $0x30] sm:$0xf] }
  0xb1   : > { %v3680_v56 = vcombine.low %v920_v47, %v930_v49  ;;  %v1899_v59 = vrot.slane %v1898_v35, 4  ;;  %v945_v60 = vshrl.u32 %v4878_v17, 16  ;;  %v951_v2 = vshll.u32 %v4889_v31, 16  ;;  %v4928_v47 = vld [vmem:[#allocation2 + $0x38] sm:$0x1] }
  0xb2   : > { %v938_v63 = vor.u32 %v937_v50, %v934_v41  ;;  %v943_v0 = vrot.slane %v941_v55, 5  ;;  %v1916_v4 = vshrl.u32 %v1828_v43, 16  ;;  %v1909_v6 = vrot.slane %v1908_v52, 4 }
  0xb3   : > { %4044 = vmatprep.mubr.msk.bf16.mxu1 %vm1080_vm12, %v3680_v56  ;;  %v1904_v5 = vsel %vm4800_vm13, %v1899_v59, %v1903_v28  ;;  %v947_v7 = vrot.slane %v945_v60, 4  ;;  %v1919_v9 = vshll.u32 %v1828_v43, 16  ;;  %v953_v13 = vrot.slane %v951_v2, 5 }
  0xb4   : > { %v939_v11 = vrot.slane %v938_v63, 4  ;;  %v1918_v34 = vrot.slane %v1916_v4, 4  ;;  %v1925_v1 = vshll.u32 %v4900_v61, 16  ;;  %v1914_v19 = vsel %vm4800_vm13, %v1909_v6, %v1913_v38  ;;  %v2200_v63 = vld [vmem:[#allocation2 + $0xc] sm:$0xe] }
  0xb5   : > { %v948_v20 = vor.u32 %v947_v7, %v943_v0  ;;  %v1921_v21 = vrot.slane %v1919_v9, 5  ;;  %v1929_v22 = vshrl.u32 %v4900_v61, 16  ;;  %v3754_v26 = vcombine.low %v1904_v5, %v1914_v19  ;;  %v4935_v6 = vld [vmem:[#allocation2 + $0x3c] sm:$0xf]  ;;  %v4941_v19 = vld [vmem:[#allocation2 + $0x40] sm:$0xf] }
  0xb6   : > { %v944_v27 = vsel %vm4800_vm13, %v939_v11, %v943_v0  ;;  %v1927_v28 = vrot.slane %v1925_v1, 5  ;;  %v1935_v23 = vshll.u32 %v4903_v57, 16  ;;  %v956_v38 = vshrl.u32 %v4908_v10, 16 }
  0xb7   : > { %v949_v35 = vrot.slane %v948_v20, 4  ;;  %v1922_v37 = vor.u32 %v1921_v21, %v1918_v34  ;;  %v1931_v41 = vrot.slane %v1929_v22, 4  ;;  %4116 = vmatprep.mubr.msk.bf16.mxu0 %vm1080_vm12, %v3754_v26  ;;  %v959_v49 = vshll.u32 %v4908_v10, 16  ;;  %v4943_v20 = vld [vmem:[#allocation2 + $0x44] sm:$0x1] }
  0xb8   : > { %v1937_v43 = vrot.slane %v1935_v23, 5  ;;  %v965_v50 = vshll.u32 %v4919_v24, 16  ;;  %v969_v55 = vshrl.u32 %v4919_v24, 16  ;;  %v958_v60 = vrot.slane %v956_v38, 4  ;;  %v2201_v23 = vld [vmem:[#allocation2 + $0x18] sm:$0xe] }
  0xb9   : > { %v954_v56 = vsel %vm4800_vm13, %v949_v35, %v953_v13  ;;  %v1923_v59 = vrot.slane %v1922_v37, 4  ;;  %v1932_v52 = vor.u32 %v1931_v41, %v1927_v28  ;;  %v961_v2 = vrot.slane %v959_v49, 5 }
  0xba   : > { %v3681_v0 = vcombine.low %v944_v27, %v954_v56  ;;  %v967_v4 = vrot.slane %v965_v50, 5  ;;  %v971_v5 = vrot.slane %v969_v55, 4  ;;  %v975_v11 = vshll.u32 %v4928_v47, 16 }
  0xbb   : > { %v1928_v7 = vsel %vm4800_vm13, %v1923_v59, %v1927_v28  ;;  %v1933_v9 = vrot.slane %v1932_v52, 4  ;;  %v962_v13 = vor.u32 %v961_v2, %v958_v60  ;;  %vm1395_vm15 = vcmask 1046532   ;;  %v4966_v59 = vld [vmem:[#allocation2 + $0x4c] sm:$0xf]  ;;  %v4975_v2 = vld [vmem:[#allocation2 + $0x50] sm:$0x1] }
  0xbc   : > { %4045 = vmatmul.mubr.msk.bf16.gmra.mrb[4].mxu1 %vm1080_vm12, %v3681_v0  ;;  %v972_v34 = vor.u32 %v971_v5, %v967_v4  ;;  %v3768_v1 = vrot.slane %v2200_v63, 9  ;;  %v977_v22 = vrot.slane %v975_v11, 5  ;;  %vm4947_vm0 = vmor %vm1394_vm14, %vm1395_vm15  ;;  %v2236_v27 = vrot.slane %v2234_v53, 4 }
  0xbd   : > { %v1938_v21 = vsel %vm4800_vm13, %v1933_v9, %v1937_v43  ;;  %v980_v28 = vshrl.u32 %v4935_v6, 16  ;;  %v963_v37 = vrot.slane %v962_v13, 4  ;;  %v4958_v43 = vld [vmem:[#allocation2 + $0x48] sm:$0xf]  ;;  %v983_v55 = vshll.u32 %v4935_v6, 16 }
  0xbe   : > { %v3755_v35 = vcombine.low %v1928_v7, %v1938_v21  ;;  %v973_v41 = vrot.slane %v972_v34, 4  ;;  %v2235_v38 = vsel %vm4947_vm0, %v3768_v1, %v2234_v53  ;;  %v2238_v49 = vsel %vm4947_vm0, %v2236_v27, %v2237_v42 }
  0xbf   : > { %v982_v50 = vrot.slane %v980_v28, 4  ;;  %v989_v56 = vshll.u32 %v4941_v19, 16  ;;  %v968_v29 = vsel %vm4800_vm13, %v963_v37, %v967_v4  ;;  %v3776_v52 = vcombine.low %v2235_v38, %v2238_v49 }
  0xc0   : > { %4117 = vmatmul.mubr.msk.bf16.gmra.mrb[4].mxu0 %vm1080_vm12, %v3755_v35  ;;  %v978_v53 = vsel %vm4800_vm13, %v973_v41, %v977_v22  ;;  %v993_v30 = vshrl.u32 %v4941_v19, 16  ;;  %v985_v42 = vrot.slane %v983_v55, 5  ;;  %v999_v0 = vshll.u32 %v4943_v20, 16  ;;  %v4998_v55 = vld [vmem:[#allocation2 + $0x54] sm:$0xf] }
  0xc1   : > { %v3682_v60 = vcombine.low %v968_v29, %v978_v53  ;;  %v991_v63 = vrot.slane %v989_v56, 5  ;;  %4130 = vmatprep.mubr.msk.bf16.mxu0 %vm1080_vm12, %v3776_v52  ;;  %v3769_v7 = vrot.slane %v2201_v23, 9  ;;  %v2245_v4 = vsel %vm4947_vm0, %v4855_v44, %v2244_v45  ;;  %v2202_v45 = vld [vmem:[#allocation2 + $0x24] sm:$0xe]  ;;  %v5000_v56 = vld [vmem:[#allocation2 + $0x58] sm:$0xf] }
  0xc2   : > { %v995_v5 = vrot.slane %v993_v30, 4  ;;  %v2540_v9 = vsel %vm1105_vm9, %v4886_v25, 0  ;;  %v986_v11 = vor.u32 %v985_v42, %v982_v50  ;;  %v1001_v13 = vrot.slane %v999_v0, 5 }
  0xc3   : > { %4048 = vmatprep.mubr.msk.bf16.mxu1 %vm1080_vm12, %v3682_v60  ;;  %v1004_v34 = vshrl.u32 %v4958_v43, 16  ;;  %v1007_v1 = vshll.u32 %v4958_v43, 16  ;;  %v2242_v12 = vsel %vm4947_vm0, %v3769_v7, %v2241_v32  ;;  %v1013_v22 = vshll.u32 %v4966_v59, 16  ;;  %v5006_v60 = vld [vmem:[#allocation2 + $0x5c] sm:$0x1] }
  0xc4   : > { %v996_v21 = vor.u32 %v995_v5, %v991_v63  ;;  %v1017_v44 = vshrl.u32 %v4966_v59, 16  ;;  %v987_v25 = vrot.slane %v986_v11, 4  ;;  %v3777_v27 = vcombine.low %v2242_v12, %v2245_v4  ;;  %v2203_v5 = vld [vmem:[#allocation2 + $0x30] sm:$0xe] }
  0xc5   : > { %v1006_v28 = vrot.slane %v1004_v34, 4  ;;  %v1009_v23 = vrot.slane %v1007_v1, 5  ;;  %v1015_v37 = vrot.slane %v1013_v22, 5  ;;  %v1023_v38 = vshll.u32 %v4975_v2, 16  ;;  %v5013_v34 = vld [vmem:[#allocation2 + $0x40] sm:$0xf] }
  0xc6   : > { %v997_v35 = vrot.slane %v996_v21, 4  ;;  %v1019_v41 = vrot.slane %v1017_v44, 4  ;;  %v992_v51 = vsel %vm4800_vm13, %v987_v25, %v991_v63  ;;  %v3770_v50 = vrot.slane %v2202_v45, 9 }
  0xc7   : > { %v1010_v49 = vor.u32 %v1009_v23, %v1006_v28  ;;  %v2248_v32 = vrot.slane %v4865_v62, 5  ;;  %v1025_v52 = vrot.slane %v1023_v38, 5  ;;  %v2251_v30 = vrot.slane %v4869_v3, 5  ;;  %v5015_v3 = vld [vmem:[#allocation2 + $0x44] sm:$0x1] }
  0xc8   : > { %v1002_v29 = vsel %vm4800_vm13, %v997_v35, %v1001_v13  ;;  %4131 = vmatmul.mubr.msk.bf16.vlgmr.msra.gmra.mrb[0].mxu0 %vm1080_vm12, %v3777_v27  ;;  %v1020_v53 = vor.u32 %v1019_v41, %v1015_v37  ;;  %v1028_v4 = vshrl.u32 %v4998_v55, 16  ;;  %v1031_v11 = vshll.u32 %v4998_v55, 16  ;;  %v2204_v27 = vld [vmem:[#allocation2 + $0x3c] sm:$0xe] }
  0xc9   : > { %v3683_v42 = vcombine.low %v992_v51, %v1002_v29  ;;  %4147 = vmatpush3.bf16.msra.mxu0 %v2540_v9  ;;  %v1011_v63 = vrot.slane %v1010_v49, 4  ;;  %v2249_v62 = vsel %vm4947_vm0, %v3770_v50, %v2248_v32  ;;  %v2250_v0 = vrot.slane %v2248_v32, 4 }
  0xca   : > { %v1021_v7 = vrot.slane %v1020_v53, 4  ;;  %v1037_v13 = vshll.u32 %v5000_v56, 16  ;;  %v1041_v21 = vshrl.u32 %v5000_v56, 16  ;;  %v1047_v12 = vshll.u32 %v5006_v60, 16 }
  0xcb   : > { %4049 = vmatmul.mubr.msk.bf16.gmra.mrb[8].mxu1 %vm1080_vm12, %v3683_v42  ;;  %v1016_v9 = vsel %vm4800_vm13, %v1011_v63, %v1015_v37  ;;  %v2252_v1 = vsel %vm4947_vm0, %v2250_v0, %v2251_v30  ;;  %v1030_v45 = vrot.slane %v1028_v4, 4  ;;  %v1033_v25 = vrot.slane %v1031_v11, 5  ;;  %v2205_v4 = vld [vmem:[#allocation2 + $0x48] sm:$0xe] }
  0xcc   : > { %v1026_v22 = vsel %vm4800_vm13, %v1021_v7, %v1025_v52  ;;  %v3778_v44 = vcombine.low %v2249_v62, %v2252_v1  ;;  %v1039_v23 = vrot.slane %v1037_v13, 5  ;;  %v1043_v35 = vrot.slane %v1041_v21, 4  ;;  %v5042_v7 = vld [vmem:[#allocation2 + $0x50] sm:$0x1]  ;;  %v5050_v21 = vld [vmem:[#allocation2 + $0x58] sm:$0xf] }
  0xcd   : > { %v3684_v28 = vcombine.low %v1016_v9, %v1026_v22  ;;  %v1049_v41 = vrot.slane %v1047_v12, 5  ;;  %v1034_v37 = vor.u32 %v1033_v25, %v1030_v45  ;;  %v3771_v38 = vrot.slane %v2203_v5, 9  ;;  %v5040_v5 = vld [vmem:[#allocation2 + $0x4c] sm:$0xf]  ;;  %v2206_v12 = vld [vmem:[#allocation2 + $0x54] sm:$0xe] }
  0xce   : > { %4134 = vmatprep.mubr.msk.bf16.mxu0 %vm1080_vm12, %v3778_v44  ;;  %v2255_v51 = vrot.slane %v4900_v61, 5  ;;  %v2258_v49 = vrot.slane %v4903_v57, 5  ;;  %v1044_v50 = vor.u32 %v1043_v35, %v1039_v23  ;;  %v3772_v32 = vrot.slane %v2204_v27, 9  ;;  %v5052_v45 = vld [vmem:[#allocation2 + $0x5c] sm:$0x1] }
  0xcf   : > { %4052 = vmatprep.mubr.msk.bf16.mxu1 %vm1080_vm12, %v3684_v28  ;;  %v2262_v29 = vrot.slane %v5013_v34, 5  ;;  %v2265_v53 = vrot.slane %v5015_v3, 5  ;;  %v1035_v52 = vrot.slane %v1034_v37, 4  ;;  %v3695_v9 = vcombine.low %v4771_v14, %v4773_v39  ;;  %5616 = vst [vmem:[#allocation3_spill] sm:$0xff] %v5052_v45  ;;  %v5054_v25 = vld [vmem:[#allocation2 + $0x64] sm:$0xf] }
  0xd0   : > { %v2256_v30 = vsel %vm4947_vm0, %v3771_v38, %v2255_v51  ;;  %v2257_v42 = vrot.slane %v2255_v51, 4  ;;  %v1045_v63 = vrot.slane %v1044_v50, 4  ;;  %5617 = vst [vmem:[#allocation4_spill] sm:$0xff] %v5054_v25  ;;  %v3773_v27 = vrot.slane %v2205_v4, 9  ;;  %v2207_v14 = vld [vmem:[#allocation2 + $0x60] sm:$0xe] }
  0xd1   : > { %v2263_v62 = vsel %vm4947_vm0, %v3772_v32, %v2262_v29  ;;  %v2264_v61 = vrot.slane %v2262_v29, 4  ;;  %v1040_v57 = vsel %vm4800_vm13, %v1035_v52, %v1039_v23  ;;  %v2269_v28 = vrot.slane %v5040_v5, 5  ;;  %v5065_v37 = vld [vmem:[%s5596_s3 + $0xc] ss:$0 sps:$4 sm:$0xcc]  }
  0xd2   : > { %v2259_v0 = vsel %vm4947_vm0, %v2257_v42, %v2258_v49  ;;  %v1050_v11 = vsel %vm4800_vm13, %v1045_v63, %v1049_v41  ;;  %v2272_v23 = vrot.slane %v5042_v7, 5  ;;  %v3774_v35 = vrot.slane %v2206_v12, 9  ;;  %v5071_v50 = vld [vmem:[#allocation2 + $0x68] sm:$0x1] }
  0xd3   : > { %v3779_v13 = vcombine.low %v2256_v30, %v2259_v0  ;;  %v2266_v1 = vsel %vm4947_vm0, %v2264_v61, %v2265_v53  ;;  %v3685_v22 = vcombine.low %v1040_v57, %v1050_v11  ;;  %v2276_v41 = vrot.slane %v5050_v21, 5  ;;  %5618 = vst [vmem:[#allocation5_spill] sm:$0xff] %v5071_v50  ;;  %v5079_v52 = vld [vmem:[%s5596_s3 + $0x4] ss:$0 sps:$4 sm:$0xcc]  }
  0xd4   : > { %v3780_v44 = vcombine.low %v2263_v62, %v2266_v1  ;;  %v2270_v38 = vsel %vm4947_vm0, %v3773_v27, %v2269_v28  ;;  %v2271_v51 = vrot.slane %v2269_v28, 4  ;;  %v2279_v49 = vrot.slane %v5052_v45, 5  ;;  %v1371_v11 = vld [vmem:[#allocation2 + $0xc] sm:$0xe]  ;;  %v1372_v1 = vld [vmem:[#allocation2 + $0x18] sm:$0xe] }
  0xd5   : > { %4135 = vmatmul.mubr.msk.bf16.gmra.mrb[4].mxu0 %vm1080_vm12, %v3779_v13  ;;  %4053 = vmatmul.mubr.msk.bf16.gmra.mrb[12].mxu1 %vm1080_vm12, %v3685_v22  ;;  %v1406_v32 = vrot.slane %v4814_v54, 5  ;;  %v2277_v29 = vsel %vm4947_vm0, %v3774_v35, %v2276_v41  ;;  %v2278_v53 = vrot.slane %v2276_v41, 4  ;;  %v3696_v30 = vcombine.low %v4811_v48, %v4814_v54 }
  0xd6   : > { %4138 = vmatprep.mubr.msk.bf16.mxu0 %vm1080_vm12, %v3780_v44  ;;  %4058 = vmatprep.mubr.msk.bf16.mxu1 %vm1080_vm12, %v3695_v9  ;;  %v2273_v42 = vsel %vm4947_vm0, %v2271_v51, %v2272_v23  ;;  %v3775_v63 = vrot.slane %v2207_v14, 9  ;;  %v2283_v62 = vrot.slane %v5054_v25, 5  ;;  %v2286_v0 = vrot.slane %v5071_v50, 5  ;;  %v1374_v23 = vld [vmem:[#allocation2 + $0x30] sm:$0xe] }
  0xd7   : > { %v3781_v61 = vcombine.low %v2270_v38, %v2273_v42  ;;  %v2280_v57 = vsel %vm4947_vm0, %v2278_v53, %v2279_v49  ;;  %v2899_v4 = vrot.slane %v5065_v37, 2  ;;  %v1409_v13 = vrot.slane %v4819_v58, 5  ;;  %v1373_v58 = vld [vmem:[#allocation2 + $0x24] sm:$0xe]  ;;  %v4389_v53 = vld [vmem:[#allocation2 + $0x18] sm:$0xff]  }
  0xd8   : > { %v3697_v48 = vcombine.low %v4845_v33, %v4849_v40  ;;  %v3782_v54 = vcombine.low %v2277_v29, %v2280_v57  ;;  %v2285_v9 = vrot.slane %v2283_v62, 4  ;;  %v1503_v12 = vsel %vm1105_vm9, %v4914_v18, 0  ;;  %v1370_v57 = vld [vmem:[#allocation2] sm:$0xe] }
  0xd9   : > { %4338 = vmatprep.subr.msk.bf16.mxu0 %vm1105_vm9, %v2899_v4  ;;  %v1678_v22 = vrot.slane %v5079_v52, 2  ;;  %v3712_v44 = vrot.slane %v1371_v11, 9  ;;  %v1408_v27 = vrot.slane %v1406_v32, 4  ;;  %v2284_v33 = vsel %vm4947_vm0, %v3775_v63, %v2283_v62 }
  0xda   : > { %v2287_v18 = vsel %vm4947_vm0, %v2285_v9, %v2286_v0  ;;  %v3713_v28 = vrot.slane %v1372_v1, 9  ;;  %v3698_v14 = vcombine.low %v4873_v8, %v4878_v17  ;;  %v1413_v38 = vrot.slane %v4849_v40, 5 }
  0xdb   : > { %v5111_v35 = vsel %vm4947_vm0, %v3712_v44, %v1406_v32  ;;  %v5115_v41 = vsel %vm4947_vm0, %v1408_v27, %v1409_v13  ;;  %v3699_v51 = vcombine.low %v4908_v10, %v4919_v24  ;;  %v1416_v49 = vrot.slane %v4858_v46, 5 }
  0xdc   : > { %v3720_v8 = vcombine.low %v5111_v35, %v5115_v41  ;;  %v3714_v32 = vrot.slane %v1373_v58, 9  ;;  %v3783_v29 = vcombine.low %v2284_v33, %v2287_v18  ;;  %v1415_v40 = vrot.slane %v1413_v38, 4  ;;  %v4401_v35 = vld [vmem:[#allocation2 + $0x6c] sm:$0xff]  }
  0xdd   : > { %4139 = vmatmul.mubr.msk.bf16.gmra.mrb[8].mxu0 %vm1080_vm12, %v3781_v61  ;;  %4059 = vmatmul.mubr.msk.bf16.vlgmr.msra.gmra.mrb[0].mxu1 %vm1080_vm12, %v3696_v30  ;;  %v5128_v30 = vsel %vm4947_vm0, %v3713_v28, %v1413_v38  ;;  %v1420_v42 = vrot.slane %v4878_v17, 5  ;;  %v1423_v10 = vrot.slane %v4889_v31, 5  ;;  %v3715_v63 = vrot.slane %v1374_v23, 9 }
  0xde   : > { %4142 = vmatprep.mubr.msk.bf16.mxu0 %vm1080_vm12, %v3782_v54  ;;  %4075 = vmatpush3.bf16.msra.mxu1 %v1503_v12  ;;  %v1427_v62 = vrot.slane %v4919_v24, 5  ;;  %v1430_v61 = vrot.slane %v4928_v47, 5  ;;  %v1399_v46 = vrot.slane %v4773_v39, 5  ;;  %v5137_v0 = vsel %vm4947_vm0, %v1415_v40, %v1416_v49  ;;  %v1375_v47 = vld [vmem:[#allocation2 + $0x3c] sm:$0xe] }
  0xdf   : > { %4062 = vmatprep.mubr.msk.bf16.mxu1 %vm1080_vm12, %v3697_v48  ;;  %4333 = vmatprep.subr.msk.bf16.mxu1 %vm1105_vm9, %v1678_v22  ;;  %v5141_v11 = vsel %vm4947_vm0, %v3714_v32, %v1420_v42  ;;  %v1422_v13 = vrot.slane %v1420_v42, 4  ;;  %v3721_v17 = vcombine.low %v5128_v30, %v5137_v0  ;;  %v2655_v48 = vld [vmem:[#allocation2 + $0x18] sm:$0xf]  ;;  %v1402_v54 = vrot.slane %v4779_v16, 5  ;;  %v5163_v12 = vld [vmem:[#allocation2 + $0x1c] sm:$0xf] }
  0xe0   : > { %v5147_v31 = vsel %vm4947_vm0, %v3715_v63, %v1427_v62  ;;  %v1429_v24 = vrot.slane %v1427_v62, 4  ;;  %v3711_v44 = vrot.slane %v1370_v57, 9  ;;  %v1401_v27 = vrot.slane %v1399_v46, 4  ;;  %v4394_v42 = vld [vmem:[#allocation2 + $0x30] sm:$0xff]   ;;  %v5185_v63 = vld [vmem:[#allocation2 + $0x20] sm:$0x1] }
  0xe1   : > { %v5152_v39 = vsel %vm4947_vm0, %v1422_v13, %v1423_v10  ;;  %v3716_v58 = vrot.slane %v1375_v47, 9  ;;  %v2680_v33 = vshrl.u32 %v2655_v48, 16  ;;  %v2683_v18 = vshll.u32 %v2655_v48, 16  ;;  %v2670_v30 = vld [vmem:[#allocation2 + $0x54] sm:$0xf] }
  0xe2   : > { %v3722_v9 = vcombine.low %v5141_v11, %v5152_v39  ;;  %v5161_v1 = vsel %vm4947_vm0, %v1429_v24, %v1430_v61  ;;  %v1434_v28 = vrot.slane %v4941_v19, 5  ;;  %v1437_v23 = vrot.slane %v4943_v20, 5 }
  0xe3   : > { %v2689_v38 = vshll.u32 %v5163_v12, 16  ;;  %v2693_v49 = vshrl.u32 %v5163_v12, 16  ;;  %v2925_v40 = vsel %vm1105_vm9, %v2899_v4, 0  ;;  %v3701_v20 = vcombine.low %v4958_v43, %v4966_v59 }
  0xe4   : > { %v5176_v32 = vsel %vm4947_vm0, %v3716_v58, %v1434_v28  ;;  %v1400_v10 = vsel %vm4947_vm0, %v3711_v44, %v1399_v46  ;;  %v1403_v62 = vsel %vm4947_vm0, %v1401_v27, %v1402_v54  ;;  %v2682_v61 = vrot.slane %v2680_v33, 4  ;;  %v5201_v46 = vld [vmem:[%s5596_s3 + $0x10] sm:$0x3] }
  0xe5   : > { %4143 = vmatmul.mubr.msk.bf16.gmra.mrb[12].mxu0 %vm1080_vm12, %v3783_v29  ;;  %4063 = vmatmul.mubr.msk.bf16.gmra.mrb[4].mxu1 %vm1080_vm12, %v3698_v14  ;;  %v4392_v14 = vld [vmem:[#allocation2 + $0x24] sm:$0xff]   ;;  %v1436_v29 = vrot.slane %v1434_v28, 4  ;;  %v2685_v57 = vrot.slane %v2683_v18, 5  ;;  %v5196_v43 = vrot.slane %v2689_v38, 5  ;;  %v2695_v4 = vrot.slane %v2693_v49, 4  ;;  %v4396_v38 = vld [vmem:[#allocation2 + $0x3c] sm:$0xff]  }
  0xe6   : > { %4148 = vmatprep.mubr.msk.bf16.mxu0 %vm1080_vm12, %v4389_v53  ;;  %4066 = vmatprep.mubr.msk.bf16.mxu1 %vm1080_vm12, %v3699_v51  ;;  %v3700_v51 = vcombine.low %v4935_v6, %v4941_v19  ;;  %v2658_v53 = vld [vmem:[#allocation2 + $0x24] sm:$0xf]  ;;  %v5187_v6 = vld [vmem:[#allocation2 + $0x28] sm:$0xf]  ;;  %v1441_v27 = vrot.slane %v4966_v59, 5  ;;  %v1444_v58 = vrot.slane %v4975_v2, 5  ;;  %v3702_v33 = vcombine.low %v4998_v55, %v5000_v56 }
  0xe7   : > { %v1376_v19 = vld [vmem:[#allocation2 + $0x48] sm:$0xe]  ;;  %v5193_v37 = vsel %vm4947_vm0, %v1436_v29, %v1437_v23  ;;  %v2704_v24 = vshrl.u32 %v2658_v53, 16  ;;  %v2707_v47 = vshll.u32 %v2658_v53, 16  ;;  %v2713_v48 = vshll.u32 %v5187_v6, 16 }
  0xe8   : > { %v2717_v54 = vshrl.u32 %v5187_v6, 16  ;;  %v3717_v44 = vrot.slane %v1376_v19, 9  ;;  %v3719_v18 = vcombine.low %v1400_v10, %v1403_v62  ;;  %v2699_v28 = vshll.u32 %v5185_v63, 16  ;;  %v2661_v23 = vld [vmem:[#allocation2 + $0x30] sm:$0xf]  ;;  %v4398_v55 = vld [vmem:[#allocation2 + $0x48] sm:$0xff]  }
  0xe9   : > { %v2686_v49 = vor.u32 %v2685_v57, %v2682_v61  ;;  %v1443_v2 = vrot.slane %v1441_v27, 4  ;;  %v5222_v29 = vld [vmem:[#allocation2 + $0x34] sm:$0xf]  ;;  %v2706_v53 = vrot.slane %v2704_v24, 4  ;;  %v2728_v19 = vshrl.u32 %v2661_v23, 16 }
  0xea   : > { %v5220_v59 = vsel %vm4947_vm0, %v3717_v44, %v1441_v27  ;;  %v2731_v62 = vshll.u32 %v2661_v23, 16  ;;  %v5230_v57 = vld [vmem:[#allocation2 + $0x2c] sm:$0x1]  ;;  %v2737_v44 = vshll.u32 %v5222_v29, 16  ;;  %v2741_v24 = vshrl.u32 %v5222_v29, 16 }
  0xeb   : > { %v5228_v10 = vsel %vm4947_vm0, %v1443_v2, %v1444_v58  ;;  %v2687_v27 = vrot.slane %v2686_v49, 4  ;;  %vm3357_vm1 = vcmask 60416   ;;  %vm3390_vm2 = vcmask 64512  }
  0xec   : > { %vm3428_vm3 = vcmask 57344  }
  0xed   : > { %4149 = vmatmul.mubr.msk.bf16.vlgmr.msra.gmra.mrb[0].mxu0 %vm1080_vm12, %v4392_v14  ;;  %4067 = vmatmul.mubr.msk.bf16.gmra.mrb[8].mxu1 %vm1080_vm12, %v3700_v51  ;;  %v1377_v14 = vld [vmem:[#allocation2 + $0x54] sm:$0xe]  ;;  %v2696_v51 = vor.u32 %v2695_v4, %v5196_v43  ;;  %v5248_v4 = vrot.slane %v2737_v44, 5 }
  0xee   : > { %4165 = vmatpush3.bf16.msra.mxu0 %v2925_v40  ;;  %4070 = vmatprep.mubr.msk.bf16.mxu1 %vm1080_vm12, %v3701_v20  ;;  %v2709_v40 = vrot.slane %v2707_v47, 5  ;;  %v5224_v20 = vrot.slane %v2713_v48, 5  ;;  %v3718_v61 = vrot.slane %v1377_v14, 9  ;;  %v1448_v47 = vrot.slane %v5000_v56, 5 }
  0xef   : > { %4152 = vmatprep.mubr.msk.bf16.mxu0 %vm1080_vm12, %v4394_v42  ;;  %4339 = vmatprep.subr.msk.bf16.mxu0 %vm1105_vm9, %v5201_v46  ;;  %v2719_v42 = vrot.slane %v2717_v54, 4  ;;  %v2701_v48 = vrot.slane %v2699_v28, 5  ;;  %v1451_v54 = vrot.slane %v5006_v60, 5  ;;  %v2697_v58 = vrot.slane %v2696_v51, 4  ;;  %v4399_v51 = vld [vmem:[#allocation2 + $0x54] sm:$0xff]  }
  0xf0   : > { %v5243_v23 = vsel %vm4947_vm0, %v3718_v61, %v1448_v47  ;;  %v1450_v14 = vrot.slane %v1448_v47, 4  ;;  %v2710_v2 = vor.u32 %v2709_v40, %v2706_v53  ;;  %v2723_v56 = vshll.u32 %v5230_v57, 16  ;;  %v4400_v40 = vld [vmem:[#allocation2 + $0x60] sm:$0xff]   ;;  %v2667_v47 = vld [vmem:[#allocation2 + $0x48] sm:$0xf] }
  0xf1   : > { %v2733_v28 = vrot.slane %v2731_v62, 5  ;;  %v2720_v60 = vor.u32 %v2719_v42, %v5224_v20  ;;  %v1704_v53 = vsel %vm1105_vm9, %v1678_v22, 0  ;;  %v5261_v42 = vld [vmem:[#allocation2 + $0x40] sm:$0xf]  ;;  %v2692_v62 = vsel %vm4800_vm13, %v2687_v27, %v5196_v43 }
  0xf2   : > { %v5252_v49 = vsel %vm4947_vm0, %v1450_v14, %v1451_v54  ;;  %v2702_v61 = vsel %vm4800_vm13, %v2697_v58, %v2701_v48  ;;  %v2725_v44 = vrot.slane %v2723_v56, 5  ;;  %v5268_v54 = vld [vmem:[#allocation2 + $0x4c] sm:$0xf]  ;;  %v2711_v14 = vrot.slane %v2710_v2, 4 }
  0xf3   : > { %v2721_v52 = vrot.slane %v2720_v60, 4  ;;  %v2761_v43 = vshll.u32 %v5261_v42, 16  ;;  %v2765_v27 = vshrl.u32 %v5261_v42, 16  ;;  %v2776_v48 = vshrl.u32 %v2667_v47, 16 }
  0xf4   : > { %v2779_v58 = vshll.u32 %v2667_v47, 16  ;;  %v2785_v2 = vshll.u32 %v5268_v54, 16  ;;  %v2789_v56 = vshrl.u32 %v5268_v54, 16  ;;  %v3809_v41 = vcombine.low %v2692_v62, %v2702_v61  ;;  %v5303_v61 = vld [vmem:[#allocation2 + $0x50] sm:$0x1] }
  0xf5   : > { %4153 = vmatmul.mubr.msk.bf16.gmra.mrb[4].mxu0 %vm1080_vm12, %v4396_v38  ;;  %4071 = vmatmul.mubr.msk.bf16.gmra.mrb[12].mxu1 %vm1080_vm12, %v3702_v33  ;;  %v2730_v38 = vrot.slane %v2728_v19, 4  ;;  %v2743_v33 = vrot.slane %v2741_v24, 4  ;;  %v2664_v19 = vld [vmem:[#allocation2 + $0x3c] sm:$0xf]  ;;  %v2716_v60 = vsel %vm4800_vm13, %v2711_v14, %v5224_v20  ;;  %v2767_v62 = vrot.slane %v2765_v27, 4 }
  0xf6   : > { %4156 = vmatprep.mubr.msk.bf16.mxu0 %vm1080_vm12, %v4398_v55  ;;  %4076 = vmatprep.mubr.msk.bf16.mxu1 %vm1080_vm12, %v3719_v18  ;;  %v5254_v55 = vld [vmem:[#allocation2 + $0x38] sm:$0x1]  ;;  %v2752_v13 = vshrl.u32 %v2664_v19, 16  ;;  %v2755_v16 = vshll.u32 %v2664_v19, 16  ;;  %v5293_v19 = vld [vmem:[#allocation2 + $0x44] sm:$0x1] }
  0xf7   : > { %v2734_v24 = vor.u32 %v2733_v28, %v2730_v38  ;;  %v2744_v22 = vor.u32 %v2743_v33, %v5248_v4  ;;  %v2747_v18 = vshll.u32 %v5254_v55, 16  ;;  %v1973_v38 = vshll.u32 %v5040_v5, 16  ;;  %v5301_v20 = vld [vmem:[#allocation2 + $0x58] sm:$0xf] }
  0xf8   : > { %v1977_v28 = vshrl.u32 %v5040_v5, 16  ;;  %v2726_v33 = vsel %vm4800_vm13, %v2721_v52, %v2725_v44  ;;  %v4410_v5 = vld [vmem:[%s5596_s3 + $0x8] sm:$0x3]  ;;  %v2754_v0 = vrot.slane %v2752_v13, 4  ;;  %v2778_v44 = vrot.slane %v2776_v48, 4 }
  0xf9   : > { %v2791_v47 = vrot.slane %v2789_v56, 4  ;;  %v5307_v14 = vrot.slane %v1973_v38, 5  ;;  %v2673_v13 = vld [vmem:[#allocation2 + $0x60] sm:$0xf]  ;;  %v2803_v27 = vshll.u32 %v2670_v30, 16  ;;  %v2813_v48 = vshrl.u32 %v5301_v20, 16 }
  0xfa   : > { %v5309_v52 = vrot.slane %v1977_v28, 4  ;;  %v2771_v38 = vshll.u32 %v5293_v19, 16  ;;  %v2795_v28 = vshll.u32 %v5303_v61, 16  ;;  %v2824_v11 = vshrl.u32 %v2673_v13, 16 }
  0xfb   : > { %v2827_v39 = vshll.u32 %v2673_v13, 16  ;;  %v5343_v13 = vld [vmem:[#allocation2 + $0x70] sm:$0xf] }
  0xfc   : > { %v2826_v45 = vrot.slane %v2824_v11, 4  ;;  %v5622_v11 = vcombine.low %v5220_v59, %v5228_v10 }
  0xfd   : > { %4157 = vmatmul.mubr.msk.bf16.gmra.mrb[8].mxu0 %vm1080_vm12, %v4399_v51  ;;  %4077 = vmatmul.mubr.msk.bf16.vlgmr.msra.gmra.mrb[0].mxu1 %vm1080_vm12, %v3720_v8  ;;  %v2735_v8 = vrot.slane %v2734_v24, 4  ;;  %v2745_v51 = vrot.slane %v2744_v22, 4  ;;  %v5305_v24 = vrot.slane %v2785_v2, 5  ;;  %v3810_v22 = vcombine.low %v2716_v60, %v2726_v33 }
  0xfe   : > { %4160 = vmatprep.mubr.msk.bf16.mxu0 %vm1080_vm12, %v4400_v40  ;;  %4093 = vmatpush3.bf16.msra.mxu1 %v1704_v53  ;;  %v2749_v40 = vrot.slane %v2747_v18, 5  ;;  %v5299_v53 = vrot.slane %v2761_v43, 5  ;;  %v2781_v18 = vrot.slane %v2779_v58, 5  ;;  %v2800_v43 = vshrl.u32 %v2670_v30, 16  ;;  %v5316_v58 = vld [vmem:[#allocation2 + $0x64] sm:$0xf] }
  0xff   : > { %4080 = vmatprep.mubr.msk.bf16.mxu1 %vm1080_vm12, %v3721_v17  ;;  %4335 = vmatprep.subr.msk.bf16.mxu1 %vm1105_vm9, %v4410_v5  ;;  %v2757_v17 = vrot.slane %v2755_v16, 5  ;;  %v2740_v16 = vsel %vm4800_vm13, %v2735_v8, %v5248_v4  ;;  %v2809_v5 = vshll.u32 %v5301_v20, 16  ;;  %5619 = vst [vmem:[#allocation6_spill] sm:$0xff] %v5316_v58  ;;  %v3178_v4 = vsel %vm1105_vm9, %v5201_v46, 0 }
 0x100   : > { %v2750_v2 = vsel %vm4800_vm13, %v2745_v51, %v2749_v40  ;;  %v2782_v8 = vor.u32 %v2781_v18, %v2778_v44  ;;  %v2792_v60 = vor.u32 %v2791_v47, %v5305_v24  ;;  %v5620_v33 = vcombine.low %v5147_v31, %v5161_v1  ;;  %v5336_v51 = vld [vmem:[#allocation2 + $0x5c] sm:$0x1]  ;;  %v2676_v31 = vld [vmem:[#allocation2 + $0x6c] sm:$0xf] }
 0x101   : > { %v2758_v56 = vor.u32 %v2757_v17, %v2754_v0  ;;  %v2802_v40 = vrot.slane %v2800_v43, 4  ;;  %v2805_v46 = vrot.slane %v2803_v27, 5  ;;  %v5340_v30 = vrot.slane %v2809_v5, 5 }
 0x102   : > { %v2815_v0 = vrot.slane %v2813_v48, 4  ;;  %v3811_v17 = vcombine.low %v2740_v16, %v2750_v2  ;;  %v2773_v44 = vrot.slane %v2771_v38, 5  ;;  %v2797_v18 = vrot.slane %v2795_v28, 5  ;;  %v5348_v16 = vld [vmem:[#allocation2 + $0x68] sm:$0x1] }
 0x103   : > { %v2783_v47 = vrot.slane %v2782_v8, 4  ;;  %v2819_v50 = vshll.u32 %v5336_v51, 16  ;;  %v2829_v25 = vrot.slane %v2827_v39, 5  ;;  %v2806_v27 = vor.u32 %v2805_v46, %v2802_v40  ;;  %v5379_v46 = vld [vmem:[#allocation2 + $0x74] sm:$0x1] }
 0x104   : > { %v2816_v5 = vor.u32 %v2815_v0, %v5340_v30  ;;  %v2848_v48 = vshrl.u32 %v2676_v31, 16  ;;  %v2851_v2 = vshll.u32 %v2676_v31, 16  ;;  %v1983_v38 = vshll.u32 %v5042_v7, 16 }
 0x105   : > { %4161 = vmatmul.mubr.msk.bf16.gmra.mrb[12].mxu0 %vm1080_vm12, %v4401_v35  ;;  %4081 = vmatmul.mubr.msk.bf16.gmra.mrb[4].mxu1 %vm1080_vm12, %v3722_v9  ;;  %v2768_v35 = vor.u32 %v2767_v62, %v5299_v53  ;;  %v2833_v9 = vshll.u32 %v5316_v58, 16  ;;  %v2759_v62 = vrot.slane %v2758_v56, 4  ;;  %v1980_v56 = vor.u32 %v5309_v52, %v5307_v14 }
 0x106   : > { %4166 = vmatprep.mubr.msk.bf16.mxu0 %vm1080_vm12, %v3809_v41  ;;  %4084 = vmatprep.mubr.msk.bf16.mxu1 %vm1080_vm12, %v5620_v33  ;;  %v2837_v41 = vshrl.u32 %v5316_v58, 16  ;;  %v2793_v33 = vrot.slane %v2792_v60, 4  ;;  %v2857_v28 = vshll.u32 %v5343_v13, 16  ;;  %v5621_v8 = vcombine.low %v5176_v32, %v5193_v37 }
 0x107   : > { %v2769_v1 = vrot.slane %v2768_v35, 4  ;;  %v5345_v58 = vrot.slane %v2833_v9, 5  ;;  %v2861_v35 = vshrl.u32 %v5343_v13, 16  ;;  %v2764_v60 = vsel %vm4800_vm13, %v2759_v62, %v5299_v53 }
 0x108   : > { %v2839_v43 = vrot.slane %v2837_v41, 4  ;;  %v2788_v7 = vsel %vm4800_vm13, %v2783_v47, %v5305_v24  ;;  %v2798_v32 = vsel %vm4800_vm13, %v2793_v33, %v2797_v18  ;;  %v2830_v37 = vor.u32 %v2829_v25, %v2826_v45  ;;  %v3040_v47 = vld [vmem:[#allocation2 + $0x18] sm:$0xe] }
 0x109   : > { %v2774_v52 = vsel %vm4800_vm13, %v2769_v1, %v2773_v44  ;;  %v2807_v39 = vrot.slane %v2806_v27, 4  ;;  %v2817_v9 = vrot.slane %v2816_v5, 4  ;;  %v2850_v41 = vrot.slane %v2848_v48, 4  ;;  %v1834_v5 = vld [vmem:[#allocation2 + $0x48] sm:$0xf] }
 0x10a   : > { %v2840_v53 = vor.u32 %v2839_v43, %v5345_v58  ;;  %v2853_v24 = vrot.slane %v2851_v2, 5  ;;  %v5377_v40 = vrot.slane %v2857_v28, 5  ;;  %v2863_v59 = vrot.slane %v2861_v35, 4 }
 0x10b   : > { %v3813_v10 = vcombine.low %v2788_v7, %v2798_v32  ;;  %v5381_v0 = vrot.slane %v1983_v38, 5  ;;  %v2831_v62 = vrot.slane %v2830_v37, 4  ;;  %v1981_v44 = vrot.slane %v1980_v56, 4  ;;  %v4403_v7 = vld [vmem:[#allocation2 + $0x18] sm:$0xff]   ;;  %v4404_v37 = vld [vmem:[#allocation2 + $0x24] sm:$0xff]  }
 0x10c   : > { %v2841_v45 = vrot.slane %v2840_v53, 4  ;;  %v2812_v18 = vsel %vm4800_vm13, %v2807_v39, %v5340_v30  ;;  %v2854_v1 = vor.u32 %v2853_v24, %v2850_v41  ;;  %v2864_v33 = vor.u32 %v2863_v59, %v5377_v40  ;;  %v3041_v39 = vld [vmem:[#allocation2 + $0x24] sm:$0xe] }
 0x10d   : > { %4167 = vmatmul.mubr.msk.bf16.vlgmr.msra.gmra.mrb[0].mxu0 %vm1080_vm12, %v3810_v22  ;;  %4085 = vmatmul.mubr.msk.bf16.gmra.mrb[8].mxu1 %vm1080_vm12, %v5621_v8  ;;  %v2821_v22 = vrot.slane %v2819_v50, 5  ;;  %v3812_v50 = vcombine.low %v2764_v60, %v2774_v52  ;;  %v2867_v43 = vshll.u32 %v5379_v46, 16  ;;  %v3074_v27 = vrot.slane %v5163_v12, 5 }
 0x10e   : > { %4183 = vmatpush3.bf16.msra.mxu0 %v3178_v4  ;;  %4088 = vmatprep.mubr.msk.bf16.mxu1 %vm1080_vm12, %v5622_v11  ;;  %v2843_v4 = vshll.u32 %v5348_v16, 16  ;;  %v5623_v48 = vcombine.low %v5243_v23, %v5252_v49  ;;  %v2836_v2 = vsel %vm4800_vm13, %v2831_v62, %v5345_v58  ;;  %v3826_v38 = vrot.slane %v3040_v47, 9  ;;  %v1831_v11 = vld [vmem:[#allocation2 + $0x3c] sm:$0xf] }
 0x10f   : > { %4170 = vmatprep.mubr.msk.bf16.mxu0 %vm1080_vm12, %v3811_v17  ;;  %v4402_v17 = vld [vmem:[#allocation2 + $0xc] sm:$0xff]   ;;  %v2822_v31 = vsel %vm4800_vm13, %v2817_v9, %v2821_v22  ;;  %v2855_v12 = vrot.slane %v2854_v1, 4  ;;  %v1964_v28 = vshrl.u32 %v1834_v5, 16  ;;  %v1967_v35 = vshll.u32 %v1834_v5, 16 }
 0x110   : > { %v2845_v25 = vrot.slane %v2843_v4, 5  ;;  %v3814_v30 = vcombine.low %v2812_v18, %v2822_v31  ;;  %v1986_v23 = vsel %vm4800_vm13, %v1981_v44, %v5381_v0  ;;  %v2865_v49 = vrot.slane %v2864_v33, 4  ;;  %v4405_v33 = vld [vmem:[#allocation2 + $0x30] sm:$0xff]  }
 0x111   : > { %v2869_v8 = vrot.slane %v2867_v43, 5  ;;  %v3076_v60 = vrot.slane %v3074_v27, 4  ;;  %v3077_v52 = vrot.slane %v5185_v63, 5  ;;  %v1966_v58 = vrot.slane %v1964_v28, 4 }
 0x112   : > { %v2846_v56 = vsel %vm4800_vm13, %v2841_v45, %v2845_v25  ;;  %v1969_v32 = vrot.slane %v1967_v35, 5  ;;  %v2860_v53 = vsel %vm4800_vm13, %v2855_v12, %v5377_v40  ;;  %v3075_v4 = vsel %vm4947_vm0, %v3826_v38, %v3074_v27  ;;  %v1837_v38 = vld [vmem:[#allocation2 + $0x54] sm:$0xf] }
 0x113   : > { %v3815_v22 = vcombine.low %v2836_v2, %v2846_v56  ;;  %v3081_v9 = vrot.slane %v5187_v6, 5  ;;  %v2870_v63 = vsel %vm4800_vm13, %v2865_v49, %v2869_v8  ;;  %v3078_v24 = vsel %vm4947_vm0, %v3076_v60, %v3077_v52 }
 0x114   : > { %v1970_v41 = vor.u32 %v1969_v32, %v1966_v58  ;;  %v3088_v59 = vrot.slane %v5222_v29, 5  ;;  %v1943_v40 = vshll.u32 %v1831_v11, 16  ;;  %v1949_v6 = vshll.u32 %v5013_v34, 16 }
 0x115   : > { %4171 = vmatmul.mubr.msk.bf16.gmra.mrb[4].mxu0 %vm1080_vm12, %v3812_v50  ;;  %4089 = vmatmul.mubr.msk.bf16.gmra.mrb[12].mxu1 %vm1080_vm12, %v5623_v48  ;;  %v3042_v50 = vld [vmem:[#allocation2 + $0x30] sm:$0xe]  ;;  %v1953_v0 = vshrl.u32 %v5013_v34, 16  ;;  %v3827_v62 = vrot.slane %v3041_v39, 9  ;;  %v3084_v45 = vrot.slane %v5230_v57, 5  ;;  %v3083_v25 = vrot.slane %v3081_v9, 4 }
 0x116   : > { %4174 = vmatprep.mubr.msk.bf16.mxu0 %vm1080_vm12, %v3813_v10  ;;  %4094 = vmatprep.mubr.msk.bf16.mxu1 %vm1080_vm12, %v4402_v17  ;;  %v1940_v10 = vshrl.u32 %v1831_v11, 16  ;;  %v1971_v17 = vrot.slane %v1970_v41, 4  ;;  %v3828_v29 = vrot.slane %v3042_v50, 9  ;;  %v3091_v44 = vrot.slane %v5254_v55, 5  ;;  %v4406_v57 = vld [vmem:[#allocation2 + $0x3c] sm:$0xff]   ;;  %v4408_v41 = vld [vmem:[#allocation2 + $0x54] sm:$0xff]  }
 0x117   : > { %v3816_v31 = vcombine.low %v2860_v53, %v2870_v63  ;;  %v3834_v1 = vcombine.low %v3075_v4, %v3078_v24  ;;  %v3090_v47 = vrot.slane %v3088_v59, 4  ;;  %v1945_v43 = vrot.slane %v1943_v40, 5  ;;  %v4407_v53 = vld [vmem:[#allocation2 + $0x48] sm:$0xff]  }
 0x118   : > { %v1976_v18 = vsel %vm4800_vm13, %v1971_v17, %v5307_v14  ;;  %v5432_v27 = vrot.slane %v1949_v6, 5  ;;  %v1955_v5 = vrot.slane %v1953_v0, 4  ;;  %v3082_v48 = vsel %vm4947_vm0, %v3827_v62, %v3081_v9  ;;  %v3045_v62 = vld [vmem:[#allocation2 + $0x54] sm:$0xe] }
 0x119   : > { %v5430_v34 = vcombine.low %v1976_v18, %v1986_v23  ;;  %v3085_v55 = vsel %vm4947_vm0, %v3083_v25, %v3084_v45  ;;  %v3089_v14 = vsel %vm4947_vm0, %v3828_v29, %v3088_v59  ;;  %v3095_v2 = vrot.slane %v5261_v42, 5  ;;  %v3044_v23 = vld [vmem:[#allocation2 + $0x48] sm:$0xe]  ;;  %v1840_v59 = vld [vmem:[#allocation2 + $0x60] sm:$0xf]  ;;  %v5624_v45 = vld [vmem:[#allocation6_spill] sm:$0xff] }
 0x11a   : > { %v1959_v56 = vshll.u32 %v5015_v3, 16  ;;  %v3092_v12 = vsel %vm4947_vm0, %v3090_v47, %v3091_v44  ;;  %v1956_v35 = vor.u32 %v1955_v5, %v5432_v27  ;;  %v3102_v49 = vrot.slane %v5268_v54, 5  ;;  %v5625_v18 = vld [vmem:[#allocation4_spill] sm:$0xff] }
 0x11b   : > { %v3835_v8 = vcombine.low %v3082_v48, %v3085_v55  ;;  %v3098_v3 = vrot.slane %v5293_v19, 5  ;;  %v1988_v60 = vshrl.u32 %v1837_v38, 16  ;;  %v1991_v52 = vshll.u32 %v1837_v38, 16 }
 0x11c   : > { %v3836_v11 = vcombine.low %v3089_v14, %v3092_v12  ;;  %v3097_v58 = vrot.slane %v3095_v2, 4  ;;  %v1961_v32 = vrot.slane %v1959_v56, 5  ;;  %v1957_v39 = vrot.slane %v1956_v35, 4 }
 0x11d   : > { %4175 = vmatmul.mubr.msk.bf16.gmra.mrb[8].mxu0 %vm1080_vm12, %v3814_v30  ;;  %4095 = vmatmul.mubr.msk.bf16.vlgmr.msra.gmra.mrb[0].mxu1 %vm1080_vm12, %v4403_v7  ;;  %v3043_v30 = vld [vmem:[#allocation2 + $0x3c] sm:$0xe]  ;;  %v1997_v7 = vshll.u32 %v5050_v21, 16  ;;  %v3104_v54 = vrot.slane %v3102_v49, 4  ;;  %v3105_v9 = vrot.slane %v5303_v61, 5  ;;  %v1990_v63 = vrot.slane %v1988_v60, 4 }
 0x11e   : > { %4178 = vmatprep.mubr.msk.bf16.mxu0 %vm1080_vm12, %v3815_v22  ;;  %4201 = vmatpush3.bf16.msra.mxu1 %v4777_v15  ;;  %v1942_v15 = vrot.slane %v1940_v10, 4  ;;  %v3829_v42 = vrot.slane %v3043_v30, 9  ;;  %v2001_v22 = vshrl.u32 %v5050_v21, 16  ;;  %v1993_v24 = vrot.slane %v1991_v52, 5  ;;  %v4409_v30 = vld [vmem:[#allocation2 + $0x60] sm:$0xff]  }
 0x11f   : > { %4098 = vmatprep.mubr.msk.bf16.mxu1 %vm1080_vm12, %v4404_v37  ;;  %v3830_v37 = vrot.slane %v3044_v23, 9  ;;  %v1999_v19 = vrot.slane %v1997_v7, 5  ;;  %v3099_v10 = vsel %vm4947_vm0, %v3097_v58, %v3098_v3  ;;  %v3109_v6 = vrot.slane %v5301_v20, 5  ;;  %v3046_v20 = vld [vmem:[#allocation2 + $0x60] sm:$0xe] }
 0x120   : > { %v1946_v28 = vor.u32 %v1945_v43, %v1942_v15  ;;  %v2003_v50 = vrot.slane %v2001_v22, 4  ;;  %v3096_v21 = vsel %vm4947_vm0, %v3829_v42, %v3095_v2  ;;  %v1962_v0 = vsel %vm4800_vm13, %v1957_v39, %v1961_v32  ;;  %v5626_v43 = vld [vmem:[#allocation3_spill] sm:$0xff]  ;;  %v3047_v32 = vld [vmem:[#allocation2 + $0x6c] sm:$0xe] }
 0x121   : > { %v3103_v40 = vsel %vm4947_vm0, %v3830_v37, %v3102_v49  ;;  %v3106_v17 = vsel %vm4947_vm0, %v3104_v54, %v3105_v9  ;;  %v3116_v25 = vrot.slane %v5624_v45, 5  ;;  %v2012_v29 = vshrl.u32 %v1840_v59, 16 }
 0x122   : > { %v1947_v4 = vrot.slane %v1946_v28, 4  ;;  %v2015_v44 = vshll.u32 %v1840_v59, 16  ;;  %v3837_v47 = vcombine.low %v3096_v21, %v3099_v10  ;;  %v2004_v15 = vor.u32 %v2003_v50, %v1999_v19 }
 0x123   : > { %v3838_v5 = vcombine.low %v3103_v40, %v3106_v17  ;;  %v3111_v48 = vrot.slane %v3109_v6, 4  ;;  %v3112_v55 = vrot.slane %v5336_v51, 5  ;;  %v3832_v2 = vrot.slane %v3046_v20, 9 }
 0x124   : > { %v1952_v61 = vsel %vm4800_vm13, %v1947_v4, %v5432_v27  ;;  %v2007_v27 = vshll.u32 %v5626_v43, 16  ;;  %v3118_v56 = vrot.slane %v3116_v25, 4  ;;  %v3119_v38 = vrot.slane %v5348_v16, 5 }
 0x125   : > { %4179 = vmatmul.mubr.msk.bf16.gmra.mrb[12].mxu0 %vm1080_vm12, %v3816_v31  ;;  %4099 = vmatmul.mubr.msk.bf16.gmra.mrb[4].mxu1 %vm1080_vm12, %v4405_v33  ;;  %v2021_v31 = vshll.u32 %v5625_v18, 16  ;;  %v1994_v33 = vor.u32 %v1993_v24, %v1990_v63  ;;  %v3756_v14 = vcombine.low %v1952_v61, %v1962_v0  ;;  %v2014_v12 = vrot.slane %v2012_v29, 4 }
 0x126   : > { %4184 = vmatprep.mubr.msk.bf16.mxu0 %vm1080_vm12, %v3834_v1  ;;  %4102 = vmatprep.mubr.msk.bf16.mxu1 %vm1080_vm12, %v4406_v57  ;;  %v2025_v1 = vshrl.u32 %v5625_v18, 16  ;;  %v3831_v57 = vrot.slane %v3045_v62, 9  ;;  %v2017_v28 = vrot.slane %v2015_v44, 5  ;;  %v2009_v42 = vrot.slane %v2007_v27, 5 }
 0x127   : > { %v2023_v35 = vrot.slane %v2021_v31, 5  ;;  %v1995_v49 = vrot.slane %v1994_v33, 4  ;;  %v3113_v3 = vsel %vm4947_vm0, %v3111_v48, %v3112_v55  ;;  %v3117_v16 = vsel %vm4947_vm0, %v3832_v2, %v3116_v25 }
 0x128   : > { %v2027_v23 = vrot.slane %v2025_v1, 4  ;;  %v3110_v51 = vsel %vm4947_vm0, %v3831_v57, %v3109_v6  ;;  %v3123_v60 = vrot.slane %v5343_v13, 5  ;;  %v3120_v52 = vsel %vm4947_vm0, %v3118_v56, %v3119_v38 }
 0x129   : > { %v2018_v7 = vor.u32 %v2017_v28, %v2014_v12  ;;  %v2000_v37 = vsel %vm4800_vm13, %v1995_v49, %v1999_v19  ;;  %v3839_v4 = vcombine.low %v3110_v51, %v3113_v3  ;;  %v3840_v39 = vcombine.low %v3117_v16, %v3120_v52 }
 0x12a   : > { %v2028_v22 = vor.u32 %v2027_v23, %v2023_v35  ;;  %v3833_v54 = vrot.slane %v3047_v32, 9  ;;  %v3125_v13 = vrot.slane %v3123_v60, 4  ;;  %v3126_v9 = vrot.slane %v5379_v46, 5 }
 0x12b   : > { %v2019_v63 = vrot.slane %v2018_v7, 4 }
 0x12c   : > { %v2029_v24 = vrot.slane %v2028_v22, 4  ;;  %v3124_v19 = vsel %vm4947_vm0, %v3833_v54, %v3123_v60  ;;  %v3127_v59 = vsel %vm4947_vm0, %v3125_v13, %v3126_v9 }
 0x12d   : > { %4185 = vmatmul.mubr.msk.bf16.vlgmr.msra.gmra.mrb[0].mxu0 %vm1080_vm12, %v3835_v8  ;;  %4103 = vmatmul.mubr.msk.bf16.gmra.mrb[8].mxu1 %vm1080_vm12, %v4407_v53  ;;  %v2005_v8 = vrot.slane %v2004_v15, 4  ;;  %v2024_v46 = vsel %vm4800_vm13, %v2019_v63, %v2023_v35  ;;  %v3841_v10 = vcombine.low %v3124_v19, %v3127_v59 }
 0x12e   : > { %4188 = vmatprep.mubr.msk.bf16.mxu0 %vm1080_vm12, %v3836_v11  ;;  %4106 = vmatprep.mubr.msk.bf16.mxu1 %vm1080_vm12, %v4408_v41  ;;  %v5627_v11 = vld [vmem:[#allocation5_spill] sm:$0xff] }
 0x12f   : > { %v2031_v58 = vshll.u32 %v5627_v11, 16  ;;  %v2010_v53 = vsel %vm4800_vm13, %v2005_v8, %v2009_v42 }
 0x130   : > { %v3758_v41 = vcombine.low %v2000_v37, %v2010_v53 }
 0x131   : > { %v2033_v50 = vrot.slane %v2031_v58, 5 }
 0x133   : > { %v2034_v21 = vsel %vm4800_vm13, %v2029_v24, %v2033_v50 }
 0x134   : > { %v3759_v40 = vcombine.low %v2024_v46, %v2034_v21 }
 0x135   : > { %4189 = vmatmul.mubr.msk.bf16.gmra.mrb[4].mxu0 %vm1080_vm12, %v3837_v47  ;;  %4107 = vmatmul.mubr.msk.bf16.gmra.mrb[12].mxu1 %vm1080_vm12, %v4409_v30 }
 0x136   : > { %4192 = vmatprep.mubr.msk.bf16.mxu0 %vm1080_vm12, %v3838_v5  ;;  %4120 = vmatprep.mubr.msk.bf16.mxu1 %vm1080_vm12, %v3756_v14 }
 0x13d   : > { %4193 = vmatmul.mubr.msk.bf16.gmra.mrb[8].mxu0 %vm1080_vm12, %v3839_v4  ;;  %4121 = vmatmul.mubr.msk.bf16.vlgmr.msra.gmra.mrb[8].mxu1 %vm1080_vm12, %v5430_v34 }
 0x13e   : > { %4196 = vmatprep.mubr.msk.bf16.mxu0 %vm1080_vm12, %v3840_v39  ;;  %4124 = vmatprep.mubr.msk.bf16.mxu1 %vm1080_vm12, %v3758_v41 }
 0x145   : > { %4197 = vmatmul.mubr.msk.bf16.gmra.mrb[12].mxu0 %vm1080_vm12, %v3841_v10  ;;  %4125 = vmatmul.mubr.msk.bf16.gmra.mrb[12].mxu1 %vm1080_vm12, %v3759_v40 }
 0x1f0   : > { %v4096_v34 = vpop.f32.mrb[0].mxu1 }
 0x1f1   : > { %v1740_v6 = vpop.f32.mrb[1].mxu1 }
 0x1f2   : > { %v4097_v61 = vpop.f32.mrb[2].mxu1 }
 0x1f3   : > { %v1743_v0 = vpop.f32.mrb[3].mxu1 }
 0x1f8   : > { %v4100_v26 = vpop.f32.mrb[4].mxu1 }
 0x1f9   : > { %v1756_v17 = vpop.f32.mrb[5].mxu1 }
 0x1fa   : > { %v4101_v62 = vpop.f32.mrb[6].mxu1 }
 0x1fb   : > { %v1759_v45 = vpop.f32.mrb[7].mxu1 }
 0x200   : > { %v4186_v25 = vpop.f32.mrb[0].mxu0 }
 0x201   : > { %v4202_v20 = vadd.f32 %v4186_v25, %v4096_v34  ;;  %v3214_v36 = vpop.f32.mrb[1].mxu0 }
 0x202   : > { %v4203_v29 = vadd.f32 %v3214_v36, %v1740_v6  ;;  %v4187_v44 = vpop.f32.mrb[2].mxu0 }
 0x203   : > { %v3895_v18 = vpack.c.bf16 %v4202_v20, %v4202_v20  ;;  %v4204_v31 = vadd.f32 %v4187_v44, %v4097_v61  ;;  %v3217_v1 = vpop.f32.mrb[3].mxu0 }
 0x204   : > { %v3893_v47 = vpack.c.bf16 %v4203_v29, %v4203_v29  ;;  %v4205_v33 = vadd.f32 %v3217_v1, %v1743_v0 }
 0x205   : > { %3360 = vst.msk [vmem:[%s4597_s16 + $0x8] sm:$0xf] %vm3357_vm1, %v3895_v18  ;;  %v3294_v15 = vpack.c.bf16 %v4204_v31, %v4202_v20  ;;  %v3896_v43 = vpack.c.bf16 %v4204_v31, %v4204_v31 }
 0x206   : > { %3358 = vst.msk [vmem:[%s4597_s16] sm:$0xf] %vm3357_vm1, %v3893_v47  ;;  %v3293_v27 = vpack.c.bf16 %v4205_v33, %v4203_v29  ;;  %v3894_v5 = vpack.c.bf16 %v4205_v33, %v4205_v33 }
 0x207   : > { %3361 = vst.msk [vmem:[%s4597_s16 + $0xc] sm:$0xf] %vm3357_vm1, %v3896_v43  ;;  %v3376_v57 = vunpack.c.l.bf16 %v3294_v15  ;;  %v3377_v48 = vunpack.c.h.bf16 %v3294_v15 }
 0x208   : > { %3359 = vst.msk [vmem:[%s4597_s16 + $0x4] sm:$0xf] %vm3357_vm1, %v3894_v5  ;;  %v3374_v55 = vunpack.c.l.bf16 %v3293_v27  ;;  %v3375_v30 = vunpack.c.h.bf16 %v3293_v27  ;;  %v4190_v14 = vpop.f32.mrb[4].mxu0 }
 0x209   : > { %v3394_v2 = vsel %vm3390_vm2, %v3376_v57, 0.0  ;;  %v3432_v56 = vmul.f32 %v3376_v57, %v3376_v57  ;;  %v3230_v38 = vpop.f32.mrb[5].mxu0  ;;  %v3396_v8 = vsel %vm3390_vm2, %v3377_v48, 0.0  ;;  %v3433_v42 = vmul.f32 %v3377_v48, %v3377_v48 }
 0x20a   : > { %v3391_v12 = vsel %vm3390_vm2, %v3374_v55, 0.0  ;;  %v3392_v28 = vsel %vm3390_vm2, %v3375_v30, 0.0  ;;  %v3430_v35 = vmul.f32 %v3374_v55, %v3374_v55  ;;  %v3431_v23 = vmul.f32 %v3375_v30, %v3375_v30  ;;  %v4191_v49 = vpop.f32.mrb[6].mxu0 }
 0x20b   : > { %v3393_v51 = vadd.f32 %v3392_v28, %v3391_v12  ;;  %v4206_v3 = vadd.f32 %v4190_v14, %v4100_v26  ;;  %v3233_v16 = vpop.f32.mrb[7].mxu0  ;;  %v4207_v7 = vadd.f32 %v3230_v38, %v1756_v17  ;;  %v4208_v22 = vadd.f32 %v4191_v49, %v4101_v62 }
 0x20c   : > { %v3446_v60 = vsel %vm3390_vm2, %v3430_v35, 0.0  ;;  %v3447_v52 = vsel %vm3390_vm2, %v3431_v23, 0.0  ;;  %v4209_v37 = vadd.f32 %v3233_v16, %v1759_v45  ;;  %v3449_v53 = vsel %vm3390_vm2, %v3432_v56, 0.0 }
 0x20d   : > { %v3395_v11 = vadd.f32 %v3394_v2, %v3393_v51  ;;  %v3448_v58 = vadd.f32 %v3447_v52, %v3446_v60  ;;  %v3899_v32 = vpack.c.bf16 %v4206_v3, %v4206_v3  ;;  %v3897_v4 = vpack.c.bf16 %v4207_v7, %v4207_v7 }
 0x20e   : > { %v3296_v39 = vpack.c.bf16 %v4208_v22, %v4206_v3  ;;  %v3900_v54 = vpack.c.bf16 %v4208_v22, %v4208_v22  ;;  %v3295_v9 = vpack.c.bf16 %v4209_v37, %v4207_v7  ;;  %v3898_v41 = vpack.c.bf16 %v4209_v37, %v4209_v37 }
 0x20f   : > { %v3450_v13 = vadd.f32 %v3449_v53, %v3448_v58  ;;  %3364 = vst.msk [vmem:[%s4597_s16 + $0x18] sm:$0xf] %vm3357_vm1, %v3899_v32  ;;  %v3397_v63 = vadd.f32 %v3396_v8, %v3395_v11  ;;  %v3451_v24 = vsel %vm3390_vm2, %v3433_v42, 0.0  ;;  %3362 = vst.msk [vmem:[%s4597_s16 + $0x10] sm:$0xf] %vm3357_vm1, %v3897_v4 }
 0x210   : > { %3365 = vst.msk [vmem:[%s4597_s16 + $0x1c] sm:$0xf] %vm3357_vm1, %v3900_v54  ;;  %v3380_v50 = vunpack.c.l.bf16 %v3296_v39  ;;  %v3381_v19 = vunpack.c.h.bf16 %v3296_v39  ;;  %v4194_v59 = vpop.f32.mrb[8].mxu0  ;;  %3363 = vst.msk [vmem:[%s4597_s16 + $0x14] sm:$0xf] %vm3357_vm1, %v3898_v41  ;;  %v3378_v46 = vunpack.c.l.bf16 %v3295_v9  ;;  %v3379_v21 = vunpack.c.h.bf16 %v3295_v9  ;;  %v4122_v40 = vpop.f32.mrb[8].mxu1 }
 0x211   : > { %v3452_v10 = vadd.f32 %v3451_v24, %v3450_v13  ;;  %v3246_v34 = vpop.f32.mrb[9].mxu0  ;;  %v2153_v6 = vpop.f32.mrb[9].mxu1  ;;  %v4210_v44 = vadd.f32 %v4194_v59, %v4122_v40 }
 0x212   : > { %v4195_v61 = vpop.f32.mrb[10].mxu0  ;;  %v3402_v0 = vsel %vm3390_vm2, %v3380_v50, 0.0  ;;  %v3398_v26 = vsel %vm3390_vm2, %v3378_v46, 0.0  ;;  %v3434_v17 = vmul.f32 %v3378_v46, %v3378_v46  ;;  %v3435_v62 = vmul.f32 %v3379_v21, %v3379_v21  ;;  %v4123_v45 = vpop.f32.mrb[10].mxu1 }
 0x213   : > { %v3249_v25 = vpop.f32.mrb[11].mxu0  ;;  %v3436_v20 = vmul.f32 %v3380_v50, %v3380_v50  ;;  %v3437_v36 = vmul.f32 %v3381_v19, %v3381_v19  ;;  %v3399_v29 = vadd.f32 %v3398_v26, %v3397_v63  ;;  %v2156_v18 = vpop.f32.mrb[11].mxu1  ;;  %v3400_v31 = vsel %vm3390_vm2, %v3379_v21, 0.0 }
 0x214   : > { %v3453_v1 = vsel %vm3390_vm2, %v3434_v17, 0.0  ;;  %v4211_v47 = vadd.f32 %v3246_v34, %v2153_v6  ;;  %v4212_v33 = vadd.f32 %v4195_v61, %v4123_v45  ;;  %v3903_v27 = vpack.c.bf16 %v4210_v44, %v4210_v44 }
 0x215   : > { %v3401_v15 = vadd.f32 %v3400_v31, %v3399_v29  ;;  %v3454_v43 = vadd.f32 %v3453_v1, %v3452_v10  ;;  %v4213_v5 = vadd.f32 %v3249_v25, %v2156_v18  ;;  %v3455_v57 = vsel %vm3390_vm2, %v3435_v62, 0.0 }
 0x216   : > { %v3901_v48 = vpack.c.bf16 %v4211_v47, %v4211_v47  ;;  %v3298_v55 = vpack.c.bf16 %v4212_v33, %v4210_v44  ;;  %v3904_v30 = vpack.c.bf16 %v4212_v33, %v4212_v33  ;;  %3368 = vst.msk [vmem:[%s4597_s16 + $0x28] sm:$0xf] %vm3357_vm1, %v3903_v27  ;;  %v3404_v28 = vsel %vm3390_vm2, %v3381_v19, 0.0 }
 0x217   : > { %v3403_v14 = vadd.f32 %v3402_v0, %v3401_v15  ;;  %v3456_v2 = vadd.f32 %v3455_v57, %v3454_v43  ;;  %v3297_v56 = vpack.c.bf16 %v4213_v5, %v4211_v47  ;;  %v3902_v38 = vpack.c.bf16 %v4213_v5, %v4213_v5 }
 0x218   : > { %v4198_v12 = vpop.f32.mrb[12].mxu0  ;;  %v3457_v35 = vsel %vm3390_vm2, %v3436_v20, 0.0  ;;  %3366 = vst.msk [vmem:[%s4597_s16 + $0x20] sm:$0xf] %vm3357_vm1, %v3901_v48  ;;  %3369 = vst.msk [vmem:[%s4597_s16 + $0x2c] sm:$0xf] %vm3357_vm1, %v3904_v30  ;;  %v3384_v23 = vunpack.c.l.bf16 %v3298_v55  ;;  %v3385_v58 = vunpack.c.h.bf16 %v3298_v55 }
 0x219   : > { %v4126_v49 = vpop.f32.mrb[12].mxu1  ;;  %v3262_v8 = vpop.f32.mrb[13].mxu0  ;;  %v3458_v42 = vadd.f32 %v3457_v35, %v3456_v2  ;;  %3367 = vst.msk [vmem:[%s4597_s16 + $0x24] sm:$0xf] %vm3357_vm1, %v3902_v38  ;;  %v3382_v51 = vunpack.c.l.bf16 %v3297_v56  ;;  %v3383_v3 = vunpack.c.h.bf16 %v3297_v56  ;;  %v3405_v16 = vadd.f32 %v3404_v28, %v3403_v14 }
 0x21a   : > { %v2169_v60 = vpop.f32.mrb[13].mxu1  ;;  %v4199_v52 = vpop.f32.mrb[14].mxu0  ;;  %v3459_v7 = vsel %vm3390_vm2, %v3437_v36, 0.0  ;;  %v3410_v39 = vsel %vm3390_vm2, %v3384_v23, 0.0  ;;  %v3440_v54 = vmul.f32 %v3384_v23, %v3384_v23  ;;  %v4214_v24 = vadd.f32 %v4198_v12, %v4126_v49 }
 0x21b   : > { %v4127_v22 = vpop.f32.mrb[14].mxu1  ;;  %v3265_v11 = vpop.f32.mrb[15].mxu0  ;;  %v3406_v32 = vsel %vm3390_vm2, %v3382_v51, 0.0  ;;  %v3438_v37 = vmul.f32 %v3382_v51, %v3382_v51  ;;  %v3439_v53 = vmul.f32 %v3383_v3, %v3383_v3  ;;  %v3460_v9 = vadd.f32 %v3459_v7, %v3458_v42 }
 0x21c   : > { %v2172_v4 = vpop.f32.mrb[15].mxu1  ;;  %v3407_v13 = vadd.f32 %v3406_v32, %v3405_v16  ;;  %v3408_v41 = vsel %vm3390_vm2, %v3383_v3, 0.0  ;;  %v4215_v50 = vadd.f32 %v3262_v8, %v2169_v60  ;;  %v4216_v46 = vadd.f32 %v4199_v52, %v4127_v22 }
 0x21d   : > { %v3461_v63 = vsel %vm3390_vm2, %v3438_v37, 0.0  ;;  %v4217_v21 = vadd.f32 %v3265_v11, %v2172_v4  ;;  %v3441_v10 = vmul.f32 %v3385_v58, %v3385_v58  ;;  %v3463_v40 = vsel %vm3390_vm2, %v3439_v53, 0.0 }
 0x21e   : > { %v3409_v19 = vadd.f32 %v3408_v41, %v3407_v13  ;;  %v3462_v59 = vadd.f32 %v3461_v63, %v3460_v9  ;;  %v3907_v34 = vpack.c.bf16 %v4214_v24, %v4214_v24  ;;  %v3905_v6 = vpack.c.bf16 %v4215_v50, %v4215_v50 }
 0x21f   : > { %v3300_v26 = vpack.c.bf16 %v4216_v46, %v4214_v24  ;;  %v3908_v17 = vpack.c.bf16 %v4216_v46, %v4216_v46  ;;  %v3412_v62 = vsel %vm3390_vm2, %v3385_v58, 0.0  ;;  %v3465_v45 = vsel %vm3390_vm2, %v3440_v54, 0.0 }
 0x220   : > { %v3411_v61 = vadd.f32 %v3410_v39, %v3409_v19  ;;  %v3464_v0 = vadd.f32 %v3463_v40, %v3462_v59  ;;  %3372 = vst.msk [vmem:[%s4597_s16 + $0x38] sm:$0xf] %vm3357_vm1, %v3907_v34  ;;  %3370 = vst.msk [vmem:[%s4597_s16 + $0x30] sm:$0xf] %vm3357_vm1, %v3905_v6  ;;  %v3299_v25 = vpack.c.bf16 %v4217_v21, %v4215_v50  ;;  %v3467_v1 = vsel %vm3390_vm2, %v3441_v10, 0.0 }
 0x221   : > { %v3906_v20 = vpack.c.bf16 %v4217_v21, %v4217_v21  ;;  %3373 = vst.msk [vmem:[%s4597_s16 + $0x3c] sm:$0xf] %vm3357_vm1, %v3908_v17  ;;  %v3388_v44 = vunpack.c.l.bf16 %v3300_v26  ;;  %v3389_v47 = vunpack.c.h.bf16 %v3300_v26 }
 0x222   : > { %v3466_v36 = vadd.f32 %v3465_v45, %v3464_v0  ;;  %v3413_v29 = vadd.f32 %v3412_v62, %v3411_v61  ;;  %v3386_v18 = vunpack.c.l.bf16 %v3299_v25  ;;  %v3387_v31 = vunpack.c.h.bf16 %v3299_v25 }
 0x223   : > { %3371 = vst.msk [vmem:[%s4597_s16 + $0x34] sm:$0xf] %vm3357_vm1, %v3906_v20  ;;  %v3444_v57 = vmul.f32 %v3388_v44, %v3388_v44  ;;  %v3418_v2 = vsel %vm3390_vm2, %v3388_v44, 0.0  ;;  %v3445_v56 = vmul.f32 %v3389_v47, %v3389_v47  ;;  %v3420_v35 = vsel %vm3390_vm2, %v3389_v47, 0.0 }
 0x224   : > { %v3414_v33 = vsel %vm3390_vm2, %v3386_v18, 0.0  ;;  %v3442_v15 = vmul.f32 %v3386_v18, %v3386_v18  ;;  %v3443_v43 = vmul.f32 %v3387_v31, %v3387_v31  ;;  %v3468_v5 = vadd.f32 %v3467_v1, %v3466_v36 }
 0x225   : > { %v3415_v27 = vadd.f32 %v3414_v33, %v3413_v29  ;;  %v3416_v48 = vsel %vm3390_vm2, %v3387_v31, 0.0  ;;  %v3473_v23 = vsel %vm3390_vm2, %v3444_v57, 0.0  ;;  %v3475_v42 = vsel %vm3390_vm2, %v3445_v56, 0.0 }
 0x226   : > { %v3469_v55 = vsel %vm3390_vm2, %v3442_v15, 0.0  ;;  %v3471_v38 = vsel %vm3390_vm2, %v3443_v43, 0.0 }
 0x227   : > { %v3417_v30 = vadd.f32 %v3416_v48, %v3415_v27  ;;  %v3470_v14 = vadd.f32 %v3469_v55, %v3468_v5 }
 0x229   : > { %v3419_v12 = vadd.f32 %v3418_v2, %v3417_v30  ;;  %v3472_v28 = vadd.f32 %v3471_v38, %v3470_v14 }
 0x22b   : > { %v3421_v49 = vadd.f32 %v3420_v35, %v3419_v12  ;;  %v3474_v8 = vadd.f32 %v3473_v23, %v3472_v28 }
 0x22d   : > { %v3422_v51 = vrot.slane %v3421_v49, 4  ;;  %v3476_v3 = vadd.f32 %v3475_v42, %v3474_v8 }
 0x22f   : > { %v3423_v16 = vadd.f32 %v3422_v51, %v3421_v49  ;;  %v3477_v60 = vrot.slane %v3476_v3, 4 }
 0x231   : > { %v3424_v52 = vrot.slane %v3423_v16, 2  ;;  %v3478_v7 = vadd.f32 %v3477_v60, %v3476_v3 }
 0x233   : > { %v3425_v22 = vadd.f32 %v3424_v52, %v3423_v16  ;;  %v3479_v11 = vrot.slane %v3478_v7, 2 }
 0x235   : > { %v3426_v58 = vrot.slane %v3425_v22, 1  ;;  %v3480_v32 = vadd.f32 %v3479_v11, %v3478_v7 }
 0x237   : > { %v3427_v37 = vadd.f32 %v3426_v58, %v3425_v22  ;;  %v3481_v53 = vrot.slane %v3480_v32, 1 }
 0x239   : > { %3429 = vst.msk [vmem:[%s4624_s8] sm:$0x1] %vm3428_vm3, %v3427_v37  ;;  %v3482_v4 = vadd.f32 %v3481_v53, %v3480_v32 }
 0x23b   : > { %3483 = vst.msk [vmem:[%s4624_s8 + $0x1] sm:$0x1] %vm3428_vm3, %v3482_v4 }
 0x23c PF: > { %s16_s22 = sadd.s32 1, %s4449_s22   ;;  %s5628_s18 = smov %s4441_s20 }
 0x23d   : > { %p13_p12 = scmp.ge.s32.totalorder %s16_s22, 6   ;;  %s5629_s19 = smov %s4445_s21 }
 0x23e   : > { %s5630_s20 = smov %s5633_s23  ;;  %s5631_s21 = smov %s5637_s24 }
 0x23f   :  { %15 = sbr.rel (!%p13_p12) target bundleno = 3 (0x3), region = 101 }

// kernel: up_forward.3
= control target key start
LH: loop header
LB: loop body
LE: loop exit
PB: predicated region body
PF: predicated region fallthrough
CT: control target
= control target key end

     0   :  { %s4704_s15 = smov 0   ;;  %s4706_s16 = smov 0   ;;  %s6071_s0 = inlined_call_operand.vmem [shape: bf16[2,16,16,4], index: 0, kind: input, shape index: {}]   ;;  %s6072_s1 = inlined_call_operand.vmem [shape: bf16[2,16,16,4], index: 1, kind: input, shape index: {}]   ;;  %s6073_s2 = inlined_call_operand.vmem [shape: bf16[72,4], index: 2, kind: input, shape index: {}]   ;;  %s6074_s3 = inlined_call_operand.vmem [shape: bf16[2,16,16,4], index: 3, kind: output, shape index: {0}]   ;;  %s6075_s4 = inlined_call_operand.vmem [shape: f32[2,2,2,4], index: 4, kind: output, shape index: {1}]  }
   0x1   :  { %s4708_s17 = smov 0   ;;  %s4710_s18 = smov 0  }
   0x2   :  { %s4712_s19 = smov 0  }
   0x3 LB: > { %s24_s20 = sadd.s32 1, %s4662_s17  ;;  %s27_s21 = sadd.s32 1, %s4666_s18  ;;  %s4670_s19 = sphi %s4712_s19, %s15_s19   ;;  %s4666_s18 = sphi %s4710_s18, %s6114_s18   ;;  %s4662_s17 = sphi %s4708_s17, %s6113_s17   ;;  %s4658_s16 = sphi %s4706_s16, %s6112_s16   ;;  %s4654_s15 = sphi %s4704_s15, %s6111_s15  }
   0x4   : > { %p25_p0 = scmp.ge.s32.totalorder %s24_s20, 2  ;;  %p3929_p1 = scmp.ge.s32.totalorder %s4670_s19, 1 }
   0x5   : > { %p191_p2 = scmp.lt.s32.totalorder %s4670_s19, 5 }
   0x6   : > { %s6116_s20 = smov (%p25_p0, %s24_s20), 0  ;;  %s6118_s21 = smov (!%p25_p0, %s27_s21), %s4666_s18 }
   0x7   : > { %p192_p3 = pnand %p3929_p1, %p191_p2  ;;  %p29_p4 = scmp.ge.s32.totalorder %s6118_s21, 2 }
   0x9   : > { %s6120_s21 = smov (%p29_p4, %s6118_s21), 0  ;;  %195 = sbr.rel (%p192_p3) target bundleno = 967 (0x3c7), region = 32 }
  0x10   : > { %vm266_vm0 = vcmask 24576   ;;  %vm267_vm1 = vsmask.f32 256  ;;  %v272_v0 = vld [vmem:[#allocation2 + $0xc] sm:$0x1]  ;;  %p235_p5 = scmp.lt.s32.totalorder %s4658_s16, 1 }
  0x11   : > { %vm4738_vm2 = vmand %vm266_vm0, %vm267_vm1  ;;  %v275_v2 = vld [vmem:[#allocation2 + $0x18] sm:$0x1]  ;;  %v278_v3 = vld [vmem:[#allocation2 + $0x24] sm:$0x1]  ;;  %vm299_vm3 = vsmask.f32 7938 }
  0x12   : > { %v273_v4 = vsel %vm4738_vm2, 0, %v272_v0  ;;  %v276_v5 = vsel %vm4738_vm2, 0, %v275_v2  ;;  %v279_v6 = vsel %vm4738_vm2, 0, %v278_v3  ;;  %v281_v7 = vld [vmem:[#allocation2 + $0x30] sm:$0x1]  ;;  %s6122_s16 = smov (!%p235_p5, %s4658_s16), 1  ;;  %vm4754_vm4 = vmand %vm266_vm0, %vm299_vm3 }
  0x13   : > { %274 = vst [vmem:[#allocation2 + $0xc] sm:$0x1] %v273_v4  ;;  %277 = vst [vmem:[#allocation2 + $0x18] sm:$0x1] %v276_v5  ;;  %v282_v8 = vsel %vm4738_vm2, 0, %v281_v7  ;;  %s4759_s22 = sshll.u32 %s4654_s15, 3 }
  0x14   : > { %280 = vst [vmem:[#allocation2 + $0x24] sm:$0x1] %v279_v6  ;;  %v284_v9 = vld [vmem:[#allocation2 + $0x3c] sm:$0x1]  ;;  %v287_v10 = vld [vmem:[#allocation2 + $0x48] sm:$0x1] }
  0x15   : > { %283 = vst [vmem:[#allocation2 + $0x30] sm:$0x1] %v282_v8  ;;  %v285_v12 = vsel %vm4738_vm2, 0, %v284_v9  ;;  %v288_v13 = vsel %vm4738_vm2, 0, %v287_v10  ;;  %v290_v14 = vld [vmem:[#allocation2 + $0x54] sm:$0x1] }
  0x16   : > { %v293_v15 = vld [vmem:[#allocation2 + $0x60] sm:$0x1]  ;;  %286 = vst [vmem:[#allocation2 + $0x3c] sm:$0x1] %v285_v12  ;;  %289 = vst [vmem:[#allocation2 + $0x48] sm:$0x1] %v288_v13 }
  0x17   : > { %v291_v16 = vsel %vm4738_vm2, 0, %v290_v14  ;;  %v294_v17 = vsel %vm4738_vm2, 0, %v293_v15  ;;  %v304_v18 = vld [vmem:[#allocation2 + $0x14] sm:$0x1]  ;;  %v307_v19 = vld [vmem:[#allocation2 + $0x20] sm:$0x1] }
  0x18   : > { %292 = vst [vmem:[#allocation2 + $0x54] sm:$0x1] %v291_v16  ;;  %295 = vst [vmem:[#allocation2 + $0x60] sm:$0x1] %v294_v17  ;;  %v305_v20 = vsel %vm4754_vm4, 0, %v304_v18  ;;  %v308_v21 = vsel %vm4754_vm4, 0, %v307_v19 }
  0x19   : > { %v310_v22 = vld [vmem:[#allocation2 + $0x2c] sm:$0x1]  ;;  %v313_v23 = vld [vmem:[#allocation2 + $0x38] sm:$0x1]  ;;  %306 = vst [vmem:[#allocation2 + $0x14] sm:$0x1] %v305_v20 }
  0x1a   : > { %309 = vst [vmem:[#allocation2 + $0x20] sm:$0x1] %v308_v21  ;;  %v311_v24 = vsel %vm4754_vm4, 0, %v310_v22  ;;  %v314_v25 = vsel %vm4754_vm4, 0, %v313_v23  ;;  %v316_v26 = vld [vmem:[#allocation2 + $0x44] sm:$0x1] }
  0x1b   : > { %v319_v27 = vld [vmem:[#allocation2 + $0x50] sm:$0x1]  ;;  %312 = vst [vmem:[#allocation2 + $0x2c] sm:$0x1] %v311_v24  ;;  %315 = vst [vmem:[#allocation2 + $0x38] sm:$0x1] %v314_v25 }
  0x1c   : > { %v317_v28 = vsel %vm4754_vm4, 0, %v316_v26  ;;  %v320_v29 = vsel %vm4754_vm4, 0, %v319_v27  ;;  %v322_v30 = vld [vmem:[#allocation2 + $0x5c] sm:$0x1]  ;;  %v325_v31 = vld [vmem:[#allocation2 + $0x68] sm:$0x1] }
  0x1d   : > { %318 = vst [vmem:[#allocation2 + $0x44] sm:$0x1] %v317_v28  ;;  %321 = vst [vmem:[#allocation2 + $0x50] sm:$0x1] %v320_v29  ;;  %v323_v32 = vsel %vm4754_vm4, 0, %v322_v30  ;;  %v326_v33 = vsel %vm4754_vm4, 0, %v325_v31 }
  0x1e   : > { %v269_v34 = vld [vmem:[#allocation2] sm:$0x1]  ;;  %v296_v35 = vld [vmem:[#allocation2 + $0x6c] sm:$0x1]  ;;  %324 = vst [vmem:[#allocation2 + $0x5c] sm:$0x1] %v323_v32 }
  0x1f   : > { %327 = vst [vmem:[#allocation2 + $0x68] sm:$0x1] %v326_v33  ;;  %v270_v36 = vsel %vm4738_vm2, 0, %v269_v34  ;;  %v297_v37 = vsel %vm4738_vm2, 0, %v296_v35  ;;  %v301_v38 = vld [vmem:[#allocation2 + $0x8] sm:$0x1] }
  0x20   : > { %v328_v39 = vld [vmem:[#allocation2 + $0x74] sm:$0x1]  ;;  %271 = vst [vmem:[#allocation2] sm:$0x1] %v270_v36  ;;  %298 = vst [vmem:[#allocation2 + $0x6c] sm:$0x1] %v297_v37 }
  0x21   : > { %v302_v40 = vsel %vm4754_vm4, 0, %v301_v38  ;;  %v329_v41 = vsel %vm4754_vm4, 0, %v328_v39  ;;  %s4152_s23 = sshll.u32 %s6122_s16, 7  ;;  %p248_p6 = scmp.lt.s32.totalorder %s4759_s22, 15  ;;  %vm513_vm5 = vcmask 27648  }
  0x22   : > { %303 = vst [vmem:[#allocation2 + $0x8] sm:$0x1] %v302_v40  ;;  %330 = vst [vmem:[#allocation2 + $0x74] sm:$0x1] %v329_v41  ;;  %s4798_s26 = scalar_lea.vmem %s6071_s0, %s4152_s23  ;;  %s4803_s29 = scalar_lea.vmem %s6072_s1, %s4152_s23  ;;  %vm350_vm6 = vsmask.f32 4368 }
  0x23   : > { %s249_s30 = scalar_select %p248_p6, %s4759_s22, 15  ;;  %v515_v49 = vld [vmem:[#allocation2 + $0xc] sm:$0xf]  ;;  %v520_v50 = vld [vmem:[#allocation2 + $0x14] sm:$0x1]  ;;  %vm4828_vm7 = vmand %vm513_vm5, %vm299_vm3 }
  0x24   : > { %s3936_s5 = sshll.u32 %s6122_s16, 5  ;;  %p258_p7 = scmp.lt.s32.totalorder %s4654_s15, 1  ;;  %vm4835_vm8 = vmor %vm267_vm1, %vm350_vm6  ;;  %v523_v7 = vld [vmem:[#allocation2 + $0x18] sm:$0xf]  ;;  %v530_v8 = vld [vmem:[#allocation2 + $0x24] sm:$0xf] }
  0x25   : > { %s3935_s6 = sshll.u32 %s249_s30, 1  ;;  %s3938_s7 = sshll.u32 %s6122_s16, 1  ;;  %v527_v17 = vld [vmem:[#allocation2 + $0x20] sm:$0x1]  ;;  %v534_v19 = vld [vmem:[#allocation2 + $0x2c] sm:$0x1] }
  0x26   : > { %s252_s8 = sadd.s32 %s3936_s5, %s3935_s6  ;;  %s4155_s9 = sshll.u32 %s4654_s15, 6  ;;  %v537_v40 = vld [vmem:[#allocation2 + $0x30] sm:$0xf] }
  0x27   : > { %s3937_s10 = sshll.u32 %s252_s8, 2  ;;  %s4813_s11 = scalar_lea.vmem %s4798_s26, %s4155_s9 }
  0x28   : > { %s4818_s14 = scalar_lea.vmem %s6074_s3, %s3937_s10  ;;  %v334_v42 = vld [vmem:[%s4813_s11] sm:$0xf]  ;;  %v335_v43 = vld [vmem:[%s4813_s11 + $0x4] sm:$0xf]  ;;  %v336_v44 = vld [vmem:[%s4813_s11 + $0x8] sm:$0xf] }
  0x29   : > { %s259_s16 = scalar_select %p258_p7, %s4654_s15, 1  ;;  %v353_v45 = vshrl.u32 %v334_v42, 16  ;;  %v356_v46 = vshll.u32 %v334_v42, 16  ;;  %v361_v47 = vshrl.u32 %v335_v43, 16  ;;  %v364_v48 = vshll.u32 %v335_v43, 16 }
  0x2a   : > { %v370_v51 = vshrl.u32 %v336_v44, 16  ;;  %v373_v52 = vshll.u32 %v336_v44, 16  ;;  %v337_v53 = vld [vmem:[%s4813_s11 + $0xc] sm:$0xf]  ;;  %v338_v54 = vld [vmem:[%s4813_s11 + $0x10] sm:$0xf] }
  0x2b   : > { %s261_s23 = sadd.s32 %s3938_s7, %s259_s16  ;;  %v355_v55 = vrot.slane %v353_v45, 7  ;;  %v363_v57 = vrot.slane %v361_v47, 7  ;;  %v378_v58 = vshrl.u32 %v337_v53, 16  ;;  %v381_v59 = vshll.u32 %v337_v53, 16  ;;  %v339_v60 = vld [vmem:[%s4813_s11 + $0x14] sm:$0xf] }
  0x2c   : > { %s3939_s24 = sshll.u32 %s261_s23, 1  ;;  %v372_v62 = vrot.slane %v370_v51, 7  ;;  %v387_v63 = vshrl.u32 %v338_v54, 16  ;;  %v390_v0 = vshll.u32 %v338_v54, 16  ;;  %v395_v2 = vshrl.u32 %v339_v60, 16  ;;  %p3943_p8 = scmp.ne.s32.totalorder %s4654_s15, 0 }
  0x2d   : > { %s4842_s28 = scalar_lea.vmem %s6075_s4, %s3939_s24  ;;  %v358_v3 = vor.u32 %v356_v46, %v355_v55  ;;  %v359_v4 = vrot.slane %v355_v55, 4  ;;  %v366_v5 = vor.u32 %v364_v48, %v363_v57  ;;  %v368_v6 = vrot.slane %v363_v57, 4  ;;  %v340_v13 = vld [vmem:[%s4813_s11 + $0x18] sm:$0xf]  ;;  %v341_v24 = vld [vmem:[%s4813_s11 + $0x1c] sm:$0xf] }
  0x2e   : > { %v375_v9 = vor.u32 %v373_v52, %v372_v62  ;;  %v376_v10 = vrot.slane %v372_v62, 4  ;;  %v380_v11 = vrot.slane %v378_v58, 7  ;;  %v389_v12 = vrot.slane %v387_v63, 7  ;;  %v342_v25 = vld [vmem:[%s4813_s11 + $0x20] sm:$0xf] }
  0x2f   : > { %v516_v14 = vsel %vm4828_vm7, %v358_v3, %v515_v49  ;;  %v367_v15 = vsel %vm4835_vm8, %v359_v4, %v366_v5  ;;  %v521_v16 = vsel %vm4738_vm2, %v368_v6, %v520_v50  ;;  %v397_v18 = vrot.slane %v395_v2, 7  ;;  %v343_v30 = vld [vmem:[%s4813_s11 + $0x24] sm:$0xf]  ;;  %v344_v39 = vld [vmem:[%s4813_s11 + $0x28] sm:$0xf] }
  0x30   : > { %517 = vst [vmem:[#allocation2 + $0xc] sm:$0xf] %v516_v14  ;;  %519 = vst.msk [vmem:[#allocation2 + $0x10] sm:$0xf] %vm513_vm5, %v367_v15  ;;  %v524_v20 = vsel %vm4828_vm7, %v375_v9, %v523_v7  ;;  %v383_v21 = vor.u32 %v381_v59, %v380_v11  ;;  %v385_v22 = vrot.slane %v380_v11, 4  ;;  %v392_v23 = vor.u32 %v390_v0, %v389_v12 }
  0x31   : > { %522 = vst [vmem:[#allocation2 + $0x14] sm:$0x1] %v521_v16  ;;  %525 = vst [vmem:[#allocation2 + $0x18] sm:$0xf] %v524_v20  ;;  %v393_v26 = vrot.slane %v389_v12, 4  ;;  %v398_v27 = vshll.u32 %v339_v60, 16 }
  0x32   : > { %v402_v28 = vrot.slane %v397_v18, 4  ;;  %v404_v29 = vshrl.u32 %v340_v13, 16  ;;  %v384_v31 = vsel %vm4835_vm8, %v376_v10, %v383_v21  ;;  %v528_v32 = vsel %vm4738_vm2, %v385_v22, %v527_v17  ;;  %v541_v49 = vld [vmem:[#allocation2 + $0x38] sm:$0x1]  ;;  %v345_v54 = vld [vmem:[%s4813_s11 + $0x2c] sm:$0xf] }
  0x33   : > { %v531_v33 = vsel %vm4828_vm7, %v392_v23, %v530_v8  ;;  %v407_v34 = vshll.u32 %v340_v13, 16  ;;  %526 = vst.msk [vmem:[#allocation2 + $0x1c] sm:$0xf] %vm513_vm5, %v384_v31  ;;  %529 = vst [vmem:[#allocation2 + $0x20] sm:$0x1] %v528_v32  ;;  %v400_v35 = vor.u32 %v398_v27, %v397_v18  ;;  %v412_v38 = vshrl.u32 %v341_v24, 16 }
  0x34   : > { %532 = vst [vmem:[#allocation2 + $0x24] sm:$0xf] %v531_v33  ;;  %v535_v36 = vsel %vm4738_vm2, %v402_v28, %v534_v19  ;;  %v406_v37 = vrot.slane %v404_v29, 7  ;;  %v415_v41 = vshll.u32 %v341_v24, 16  ;;  %v421_v42 = vshrl.u32 %v342_v25, 16 }
  0x35   : > { %536 = vst [vmem:[#allocation2 + $0x2c] sm:$0x1] %v535_v36  ;;  %v424_v43 = vshll.u32 %v342_v25, 16  ;;  %v429_v44 = vshrl.u32 %v343_v30, 16  ;;  %v401_v45 = vsel %vm4835_vm8, %v393_v26, %v400_v35  ;;  %v414_v48 = vrot.slane %v412_v38, 7 }
  0x36   : > { %v409_v46 = vor.u32 %v407_v34, %v406_v37  ;;  %v410_v47 = vrot.slane %v406_v37, 4  ;;  %533 = vst.msk [vmem:[#allocation2 + $0x28] sm:$0xf] %vm513_vm5, %v401_v45  ;;  %v423_v50 = vrot.slane %v421_v42, 7  ;;  %v432_v52 = vshll.u32 %v343_v30, 16 }
  0x37   : > { %v431_v51 = vrot.slane %v429_v44, 7  ;;  %v438_v53 = vshrl.u32 %v344_v39, 16  ;;  %v417_v57 = vor.u32 %v415_v41, %v414_v48  ;;  %v419_v58 = vrot.slane %v414_v48, 4  ;;  %v544_v59 = vld [vmem:[#allocation2 + $0x3c] sm:$0xf] }
  0x38   : > { %v538_v55 = vsel %vm4828_vm7, %v409_v46, %v537_v40  ;;  %v548_v60 = vld [vmem:[#allocation2 + $0x44] sm:$0x1]  ;;  %v441_v62 = vshll.u32 %v344_v39, 16  ;;  %v426_v63 = vor.u32 %v424_v43, %v423_v50  ;;  %v427_v0 = vrot.slane %v423_v50, 4  ;;  %v346_v4 = vld [vmem:[%s4813_s11 + $0x30] sm:$0xf] }
  0x39   : > { %539 = vst [vmem:[#allocation2 + $0x30] sm:$0xf] %v538_v55  ;;  %v434_v2 = vor.u32 %v432_v52, %v431_v51  ;;  %v436_v3 = vrot.slane %v431_v51, 4  ;;  %v418_v5 = vsel %vm4835_vm8, %v410_v47, %v417_v57  ;;  %v542_v6 = vsel %vm4738_vm2, %v419_v58, %v541_v49  ;;  %v347_v9 = vld [vmem:[%s4813_s11 + $0x34] sm:$0xf] }
  0x3a   : > { %v440_v7 = vrot.slane %v438_v53, 7  ;;  %v446_v8 = vshrl.u32 %v345_v54, 16  ;;  %v348_v10 = vld [vmem:[%s4813_s11 + $0x38] sm:$0xf]  ;;  %540 = vst.msk [vmem:[#allocation2 + $0x34] sm:$0xf] %vm513_vm5, %v418_v5  ;;  %v545_v11 = vsel %vm4828_vm7, %v426_v63, %v544_v59 }
  0x3b   : > { %543 = vst [vmem:[#allocation2 + $0x38] sm:$0x1] %v542_v6  ;;  %v435_v12 = vsel %vm4835_vm8, %v427_v0, %v434_v2  ;;  %v549_v13 = vsel %vm4738_vm2, %v436_v3, %v548_v60  ;;  %v551_v14 = vld [vmem:[#allocation2 + $0x48] sm:$0xf]  ;;  %v449_v15 = vshll.u32 %v345_v54, 16  ;;  %v455_v19 = vshrl.u32 %v346_v4, 16 }
  0x3c   : > { %546 = vst [vmem:[#allocation2 + $0x3c] sm:$0xf] %v545_v11  ;;  %547 = vst.msk [vmem:[#allocation2 + $0x40] sm:$0xf] %vm513_vm5, %v435_v12  ;;  %v443_v16 = vor.u32 %v441_v62, %v440_v7  ;;  %v444_v17 = vrot.slane %v440_v7, 4  ;;  %v448_v18 = vrot.slane %v446_v8, 7 }
  0x3d   : > { %550 = vst [vmem:[#allocation2 + $0x44] sm:$0x1] %v549_v13  ;;  %v349_v20 = vld [vmem:[%s4813_s11 + $0x3c] sm:$0xf]  ;;  %v555_v21 = vld [vmem:[#allocation2 + $0x50] sm:$0x1] }
  0x3e   : > { %v458_v22 = vshll.u32 %v346_v4, 16  ;;  %v463_v23 = vshrl.u32 %v347_v9, 16  ;;  %v466_v24 = vshll.u32 %v347_v9, 16  ;;  %v472_v25 = vshrl.u32 %v348_v10, 16  ;;  %v558_v30 = vld [vmem:[#allocation2 + $0x54] sm:$0xf] }
  0x3f   : > { %v552_v26 = vsel %vm4828_vm7, %v443_v16, %v551_v14  ;;  %v451_v27 = vor.u32 %v449_v15, %v448_v18  ;;  %v453_v28 = vrot.slane %v448_v18, 4  ;;  %v457_v29 = vrot.slane %v455_v19, 7  ;;  %v562_v39 = vld [vmem:[#allocation2 + $0x5c] sm:$0x1]  ;;  %v565_v40 = vld [vmem:[#allocation2 + $0x60] sm:$0xf] }
  0x40   : > { %553 = vst [vmem:[#allocation2 + $0x48] sm:$0xf] %v552_v26  ;;  %v465_v31 = vrot.slane %v463_v23, 7  ;;  %v474_v32 = vrot.slane %v472_v25, 7  ;;  %v475_v33 = vshll.u32 %v348_v10, 16  ;;  %v480_v34 = vshrl.u32 %v349_v20, 16 }
  0x41   : > { %v452_v35 = vsel %vm4835_vm8, %v444_v17, %v451_v27  ;;  %v556_v36 = vsel %vm4738_vm2, %v453_v28, %v555_v21  ;;  %v460_v37 = vor.u32 %v458_v22, %v457_v29  ;;  %v461_v38 = vrot.slane %v457_v29, 4  ;;  %v569_v51 = vld [vmem:[#allocation2 + $0x68] sm:$0x1]  ;;  %v576_v57 = vld [vmem:[#allocation2] sm:$0xf] (!%p3943_p8) }
  0x42   : > { %554 = vst.msk [vmem:[#allocation2 + $0x4c] sm:$0xf] %vm513_vm5, %v452_v35  ;;  %557 = vst [vmem:[#allocation2 + $0x50] sm:$0x1] %v556_v36  ;;  %v468_v41 = vor.u32 %v466_v24, %v465_v31  ;;  %v470_v42 = vrot.slane %v465_v31, 4  ;;  %v477_v43 = vor.u32 %v475_v33, %v474_v32  ;;  %v478_v45 = vrot.slane %v474_v32, 4 }
  0x43   : > { %v559_v44 = vsel %vm4828_vm7, %v460_v37, %v558_v30  ;;  %v482_v46 = vrot.slane %v480_v34, 7  ;;  %v483_v47 = vshll.u32 %v349_v20, 16  ;;  %575 = sbr.rel (%p3943_p8) target bundleno = 74 (0x4a), region = 36  ;;  %v580_v58 = vld [vmem:[#allocation2 + $0x8] sm:$0x1] (!%p3943_p8)  ;;  %v577_v59 = vsel (!%p3943_p8), %vm4828_vm7, 0, %v576_v57 }
  0x44   : > { %560 = vst [vmem:[#allocation2 + $0x54] sm:$0xf] %v559_v44  ;;  %v469_v48 = vsel %vm4835_vm8, %v461_v38, %v468_v41  ;;  %v563_v49 = vsel %vm4738_vm2, %v470_v42, %v562_v39  ;;  %v566_v50 = vsel %vm4828_vm7, %v477_v43, %v565_v40  ;;  %v4672_v60 = vmov (!%p3943_p8), 0   ;;  %578 = vst [vmem:[#allocation2] sm:$0xf] (!%p3943_p8), %v577_v59 }
  0x45   : > { %561 = vst.msk [vmem:[#allocation2 + $0x58] sm:$0xf] %vm513_vm5, %v469_v48  ;;  %564 = vst [vmem:[#allocation2 + $0x5c] sm:$0x1] %v563_v49  ;;  %v485_v52 = vor.u32 %v483_v47, %v482_v46  ;;  %v487_v53 = vrot.slane %v482_v46, 4  ;;  %v581_v62 = vsel (!%p3943_p8), %vm4738_vm2, 0, %v580_v58 }
  0x46   : > { %567 = vst [vmem:[#allocation2 + $0x60] sm:$0xf] %v566_v50  ;;  %579 = vst.msk [vmem:[#allocation2 + $0x4] sm:$0xf] (!%p3943_p8), %vm513_vm5, %v4672_v60 }
  0x47   : > { %v486_v54 = vsel %vm4835_vm8, %v478_v45, %v485_v52  ;;  %v570_v55 = vsel %vm4738_vm2, %v487_v53, %v569_v51  ;;  %582 = vst [vmem:[#allocation2 + $0x8] sm:$0x1] (!%p3943_p8), %v581_v62 }
  0x48   : > { %568 = vst.msk [vmem:[#allocation2 + $0x64] sm:$0xf] %vm513_vm5, %v486_v54  ;;  %571 = vst [vmem:[#allocation2 + $0x68] sm:$0x1] %v570_v55 }
  0x4a PF: > { %p3944_p9 = scmp.le.s32.totalorder %s4654_s15, 0 }
  0x4b   : > { %s3945_s30 = sadd.s32 (!%p3944_p9), 4294967295, %s4759_s22  ;;  %v613_v8 = vld [vmem:[#allocation2] sm:$0xf] (!%p3944_p9) }
  0x4c   : > { %586 = sbr.rel (%p3944_p9) target bundleno = 88 (0x58), region = 40  ;;  %s4156_s5 = sshll.u32 (!%p3944_p9), %s3945_s30, 3 }
  0x4d   : > { %s590_s6 = scalar_lea.vmem (!%p3944_p9), %s4798_s26, %s4156_s5 }
  0x4e   : > { %v591_v63 = vld [vmem:[%s590_s6] sm:$0xf] (!%p3944_p9)  ;;  %v592_v0 = vld [vmem:[%s590_s6 + $0x4] sm:$0xf] (!%p3944_p9)  ;;  %v617_v9 = vld [vmem:[#allocation2 + $0x8] sm:$0x1] (!%p3944_p9) }
  0x4f   : > { %v594_v2 = vshrl.u32 (!%p3944_p9), %v591_v63, 16  ;;  %v597_v3 = vshll.u32 (!%p3944_p9), %v591_v63, 16  ;;  %v602_v4 = vshrl.u32 (!%p3944_p9), %v592_v0, 16  ;;  %v605_v5 = vshll.u32 (!%p3944_p9), %v592_v0, 16 }
  0x51   : > { %v596_v6 = vrot.slane (!%p3944_p9), %v594_v2, 7  ;;  %v604_v7 = vrot.slane (!%p3944_p9), %v602_v4, 7 }
  0x53   : > { %v599_v10 = vor.u32 %v597_v3, %v596_v6  ;;  %v600_v11 = vrot.slane %v596_v6, 4  ;;  %v607_v12 = vor.u32 %v605_v5, %v604_v7  ;;  %v609_v13 = vrot.slane %v604_v7, 4 }
  0x55   : > { %v614_v14 = vsel %vm4828_vm7, %v599_v10, %v613_v8  ;;  %v608_v15 = vsel %vm4835_vm8, %v600_v11, %v607_v12  ;;  %v618_v16 = vsel %vm4738_vm2, %v609_v13, %v617_v9 }
  0x56   : > { %615 = vst [vmem:[#allocation2] sm:$0xf] %v614_v14  ;;  %616 = vst.msk [vmem:[#allocation2 + $0x4] sm:$0xf] %vm513_vm5, %v608_v15 }
  0x57   : > { %619 = vst [vmem:[#allocation2 + $0x8] sm:$0x1] %v618_v16 }
  0x58 PF: > { %p3948_p10 = scmp.ne.s32.totalorder %s4654_s15, 1 }
  0x59   : > { %v625_v17 = vld [vmem:[#allocation2 + $0x6c] sm:$0xf] (!%p3948_p10)  ;;  %v629_v18 = vld [vmem:[#allocation2 + $0x74] sm:$0x1] (!%p3948_p10)  ;;  %v4673_v20 = vmov (!%p3948_p10), 0  }
  0x5a   : > { %623 = sbr.rel (%p3948_p10) target bundleno = 97 (0x61), region = 44  ;;  %v626_v19 = vsel (!%p3948_p10), %vm4828_vm7, 0, %v625_v17  ;;  %628 = vst.msk [vmem:[#allocation2 + $0x70] sm:$0xf] (!%p3948_p10), %vm513_vm5, %v4673_v20  ;;  %v630_v21 = vsel (!%p3948_p10), %vm4738_vm2, 0, %v629_v18 }
  0x5b   : > { %627 = vst [vmem:[#allocation2 + $0x6c] sm:$0xf] (!%p3948_p10), %v626_v19  ;;  %631 = vst [vmem:[#allocation2 + $0x74] sm:$0x1] (!%p3948_p10), %v630_v21 }
  0x61 PF: > { %p3949_p11 = scmp.ge.s32.totalorder %s4654_s15, 1 }
  0x62   : > { %v3952_v22 = vld [vmem:[%s4813_s11 + $0x40] sm:$0xf] (!%p3949_p11)  ;;  %v3953_v23 = vld [vmem:[%s4813_s11 + $0x44] sm:$0xf] (!%p3949_p11)  ;;  %v663_v30 = vld [vmem:[#allocation2 + $0x6c] sm:$0xf] (!%p3949_p11) }
  0x63   : > { %635 = sbr.rel (%p3949_p11) target bundleno = 108 (0x6c), region = 48  ;;  %v643_v24 = vshrl.u32 (!%p3949_p11), %v3952_v22, 16  ;;  %v646_v25 = vshll.u32 (!%p3949_p11), %v3952_v22, 16  ;;  %v651_v26 = vshrl.u32 (!%p3949_p11), %v3953_v23, 16  ;;  %v654_v27 = vshll.u32 (!%p3949_p11), %v3953_v23, 16 }
  0x64   : > { %v667_v31 = vld [vmem:[#allocation2 + $0x74] sm:$0x1] (!%p3949_p11) }
  0x65   : > { %v645_v28 = vrot.slane (!%p3949_p11), %v643_v24, 7  ;;  %v653_v29 = vrot.slane (!%p3949_p11), %v651_v26, 7 }
  0x67   : > { %v648_v32 = vor.u32 (!%p3949_p11), %v646_v25, %v645_v28  ;;  %v649_v33 = vrot.slane (!%p3949_p11), %v645_v28, 4  ;;  %v656_v34 = vor.u32 (!%p3949_p11), %v654_v27, %v653_v29  ;;  %v658_v35 = vrot.slane (!%p3949_p11), %v653_v29, 4 }
  0x69   : > { %v664_v36 = vsel (!%p3949_p11), %vm4828_vm7, %v648_v32, %v663_v30  ;;  %v657_v37 = vsel (!%p3949_p11), %vm4835_vm8, %v649_v33, %v656_v34  ;;  %v668_v38 = vsel (!%p3949_p11), %vm4738_vm2, %v658_v35, %v667_v31 }
  0x6a   : > { %665 = vst [vmem:[#allocation2 + $0x6c] sm:$0xf] %v664_v36  ;;  %666 = vst.msk [vmem:[#allocation2 + $0x70] sm:$0xf] %vm513_vm5, %v657_v37 }
  0x6b   : > { %669 = vst [vmem:[#allocation2 + $0x74] sm:$0x1] %v668_v38 }
  0x6c PF: > { %s4953_s26 = scalar_lea.vmem %s4803_s29, %s4155_s9  ;;  %s4674_s7 = smov 4   ;;  %vm670_vm9 = vcmask 57376   ;;  %vm959_vm12 = vcmask 60448  }
  0x6d   : > { %v737_v56 = vld [vmem:[%s4953_s26 + $0x8] sm:$0xf]  ;;  %v735_v1 = vld [vmem:[%s4953_s26] sm:$0xf]  ;;  %v4958_v39 = vld [vmem:[%s4953_s26 + $0xc] sm:$0xf] }
  0x6e   : > { %v769_v40 = vshrl.u32 %v737_v56, 16  ;;  %v772_v41 = vshll.u32 %v737_v56, 16  ;;  %v752_v42 = vshrl.u32 %v735_v1, 16  ;;  %v755_v43 = vshll.u32 %v735_v1, 16  ;;  %v4961_v44 = vld [vmem:[%s4953_s26 + $0x4] sm:$0xf]  ;;  %vm5044_vm10 = vmand %vm670_vm9, %vm267_vm1 }
  0x6f   : > { %v777_v45 = vshrl.u32 %v4958_v39, 16  ;;  %v760_v46 = vshrl.u32 %v4961_v44, 16  ;;  %v4966_v47 = vld [vmem:[%s4953_s26 + $0x14] sm:$0xf]  ;;  %v739_v48 = vld [vmem:[%s4953_s26 + $0x10] sm:$0xf]  ;;  %vm5052_vm11 = vmand %vm670_vm9, %vm299_vm3 }
  0x70   : > { %v4969_v49 = vrot.slane %v769_v40, 7  ;;  %v4971_v50 = vrot.slane %v752_v42, 7  ;;  %v794_v51 = vshrl.u32 %v4966_v47, 16  ;;  %v786_v52 = vshrl.u32 %v739_v48, 16  ;;  %v4975_v53 = vld [vmem:[%s4953_s26 + $0x1c] sm:$0xf]  ;;  %vm5169_vm13 = vmand %vm959_vm12, %vm299_vm3 }
  0x71   : > { %v4977_v54 = vrot.slane %v777_v45, 7  ;;  %v4979_v55 = vrot.slane %v760_v46, 7  ;;  %v741_v57 = vld [vmem:[%s4953_s26 + $0x18] sm:$0xf]  ;;  %v4985_v60 = vld [vmem:[%s4953_s26 + $0x24] sm:$0xf] }
  0x72   : > { %v774_v58 = vor.u32 %v772_v41, %v4969_v49  ;;  %v757_v59 = vor.u32 %v755_v43, %v4971_v50  ;;  %v4987_v62 = vrot.slane %v794_v51, 7  ;;  %v789_v63 = vshll.u32 %v739_v48, 16  ;;  %v4991_v2 = vld [vmem:[%s4953_s26 + $0x2c] sm:$0xf]  ;;  %v743_v8 = vld [vmem:[%s4953_s26 + $0x20] sm:$0xf] }
  0x73   : > { %v811_v0 = vshrl.u32 %v4975_v53, 16  ;;  %v784_v3 = vrot.slane %v4977_v54, 4  ;;  %v767_v4 = vrot.slane %v4979_v55, 4  ;;  %v4997_v5 = vrot.slane %v786_v52, 7  ;;  %v5002_v9 = vld [vmem:[%s4953_s26 + $0x34] sm:$0xf] }
  0x74   : > { %893 = vrot.lane.b32.xlu1 %v774_v58, %s4674_s7  ;;  %887 = vrot.lane.b32.xlu0 %v757_v59, %s4674_s7  ;;  %v803_v6 = vshrl.u32 %v741_v57, 16  ;;  %v828_v7 = vshrl.u32 %v4985_v60, 16  ;;  %v845_v10 = vshrl.u32 %v4991_v2, 16  ;;  %v745_v11 = vld [vmem:[%s4953_s26 + $0x28] sm:$0xf]  ;;  %v801_v12 = vrot.slane %v4987_v62, 4 }
  0x75   : > { %v5007_v13 = vrot.slane %v811_v0, 7  ;;  %v862_v14 = vshrl.u32 %v5002_v9, 16  ;;  %v747_v15 = vld [vmem:[%s4953_s26 + $0x30] sm:$0xf]  ;;  %v791_v16 = vor.u32 %v789_v63, %v4997_v5  ;;  %v806_v18 = vshll.u32 %v741_v57, 16 }
  0x76   : > { %v5014_v17 = vrot.slane %v803_v6, 7  ;;  %v820_v19 = vshrl.u32 %v743_v8, 16  ;;  %v5016_v20 = vrot.slane %v828_v7, 7  ;;  %v837_v21 = vshrl.u32 %v745_v11, 16  ;;  %v5023_v25 = vld [vmem:[%s4953_s26 + $0x3c] sm:$0xf] }
  0x77   : > { %v5018_v22 = vrot.slane %v845_v10, 7  ;;  %v854_v23 = vshrl.u32 %v747_v15, 16  ;;  %v5020_v24 = vrot.slane %v862_v14, 7  ;;  %v5026_v26 = vld [vmem:[%s4953_s26 + $0x38] sm:$0xf]  ;;  %v818_v27 = vrot.slane %v5007_v13, 4 }
  0x78   : > { %897 = vrot.lane.b32.xlu1 %v784_v3, %s4674_s7  ;;  %891 = vrot.lane.b32.xlu0 %v767_v4, %s4674_s7  ;;  %v808_v28 = vor.u32 %v806_v18, %v5014_v17  ;;  %v5032_v29 = vrot.slane %v820_v19, 7  ;;  %v823_v30 = vshll.u32 %v743_v8, 16  ;;  %v835_v31 = vrot.slane %v5016_v20, 4  ;;  %v672_v1 = vld [vmem:[#allocation2] sm:$0x1] }
  0x79   : > { %v5035_v32 = vrot.slane %v837_v21, 7  ;;  %v840_v33 = vshll.u32 %v745_v11, 16  ;;  %v857_v34 = vshll.u32 %v747_v15, 16  ;;  %v852_v35 = vrot.slane %v5018_v22, 4  ;;  %v678_v40 = vld [vmem:[#allocation2 + $0x18] sm:$0x1] }
  0x7a   : > { %v5038_v36 = vrot.slane %v854_v23, 7  ;;  %v879_v37 = vshrl.u32 %v5023_v25, 16  ;;  %v871_v38 = vshrl.u32 %v5026_v26, 16  ;;  %v869_v41 = vrot.slane %v5020_v24, 4  ;;  %v699_v43 = vld [vmem:[#allocation2 + $0x6c] sm:$0x1] }
  0x7b   : > { %v874_v42 = vshll.u32 %v5026_v26, 16  ;;  %v675_v45 = vld [vmem:[#allocation2 + $0xc] sm:$0x1]  ;;  %v825_v48 = vor.u32 %v823_v30, %v5032_v29  ;;  %v703_v51 = vld [vmem:[#allocation2 + $0x8] sm:$0x1]  ;;  %v673_v7 = vsel %vm5044_vm10, 0, %v672_v1 }
  0x7c   : > { %903 = vrot.lane.b32.xlu1 %v801_v12, %s4674_s7  ;;  %899 = vrot.lane.b32.xlu0 %v791_v16, %s4674_s7  ;;  %v709_v52 = vld [vmem:[#allocation2 + $0x20] sm:$0x1]  ;;  %v730_v57 = vld [vmem:[#allocation2 + $0x74] sm:$0x1]  ;;  %v712_v59 = vld [vmem:[#allocation2 + $0x2c] sm:$0x1]  ;;  %v842_v12 = vor.u32 %v840_v33, %v5035_v32  ;;  %v859_v14 = vor.u32 %v857_v34, %v5038_v36 }
  0x7d   : > { %v706_v58 = vld [vmem:[#allocation2 + $0x14] sm:$0x1]  ;;  %v681_v63 = vld [vmem:[#allocation2 + $0x24] sm:$0x1]  ;;  %v715_v0 = vld [vmem:[#allocation2 + $0x38] sm:$0x1] }
  0x7e   : > { %v684_v3 = vld [vmem:[#allocation2 + $0x30] sm:$0x1]  ;;  %v718_v4 = vld [vmem:[#allocation2 + $0x44] sm:$0x1]  ;;  %v687_v6 = vld [vmem:[#allocation2 + $0x3c] sm:$0x1] }
  0x7f   : > { %v679_v8 = vsel %vm5044_vm10, 0, %v678_v40  ;;  %v721_v10 = vld [vmem:[#allocation2 + $0x50] sm:$0x1]  ;;  %v690_v11 = vld [vmem:[#allocation2 + $0x48] sm:$0x1]  ;;  %v700_v15 = vsel %vm5044_vm10, 0, %v699_v43 }
  0x80   : > { %909 = vrot.lane.b32.xlu1 %v818_v27, %s4674_s7  ;;  %905 = vrot.lane.b32.xlu0 %v808_v28, %s4674_s7  ;;  %674 = vst [vmem:[#allocation2] sm:$0x1] %v673_v7  ;;  %680 = vst [vmem:[#allocation2 + $0x18] sm:$0x1] %v679_v8  ;;  %v676_v16 = vsel %vm5044_vm10, 0, %v675_v45  ;;  %v5071_v21 = vrot.slane %v879_v37, 7 }
  0x81   : > { %v724_v18 = vld [vmem:[#allocation2 + $0x5c] sm:$0x1]  ;;  %v693_v19 = vld [vmem:[#allocation2 + $0x54] sm:$0x1]  ;;  %701 = vst [vmem:[#allocation2 + $0x6c] sm:$0x1] %v700_v15 }
  0x82   : > { %677 = vst [vmem:[#allocation2 + $0xc] sm:$0x1] %v676_v16  ;;  %v704_v23 = vsel %vm5052_vm11, 0, %v703_v51  ;;  %v710_v27 = vsel %vm5052_vm11, 0, %v709_v52  ;;  %v731_v28 = vsel %vm5052_vm11, 0, %v730_v57  ;;  %v707_v33 = vsel %vm5052_vm11, 0, %v706_v58 }
  0x83   : > { %v727_v30 = vld [vmem:[#allocation2 + $0x68] sm:$0x1]  ;;  %705 = vst [vmem:[#allocation2 + $0x8] sm:$0x1] %v704_v23  ;;  %711 = vst [vmem:[#allocation2 + $0x20] sm:$0x1] %v710_v27 }
  0x84   : > { %915 = vrot.lane.b32.xlu1 %v835_v31, %s4674_s7  ;;  %911 = vrot.lane.b32.xlu0 %v825_v48, %s4674_s7  ;;  %v5079_v31 = vrot.slane %v871_v38, 7  ;;  %732 = vst [vmem:[#allocation2 + $0x74] sm:$0x1] %v731_v28  ;;  %v713_v34 = vsel %vm5052_vm11, 0, %v712_v59  ;;  %v682_v37 = vsel %vm5044_vm10, 0, %v681_v63  ;;  %v716_v38 = vsel %vm5052_vm11, 0, %v715_v0 }
  0x85   : > { %v696_v1 = vld [vmem:[#allocation2 + $0x60] sm:$0x1]  ;;  %708 = vst [vmem:[#allocation2 + $0x14] sm:$0x1] %v707_v33  ;;  %714 = vst [vmem:[#allocation2 + $0x2c] sm:$0x1] %v713_v34 }
  0x86   : > { %683 = vst [vmem:[#allocation2 + $0x24] sm:$0x1] %v682_v37  ;;  %v685_v40 = vsel %vm5044_vm10, 0, %v684_v3  ;;  %v719_v43 = vsel %vm5052_vm11, 0, %v718_v4  ;;  %v688_v45 = vsel %vm5044_vm10, 0, %v687_v6  ;;  %v722_v48 = vsel %vm5052_vm11, 0, %v721_v10 }
  0x87   : > { %717 = vst [vmem:[#allocation2 + $0x38] sm:$0x1] %v716_v38  ;;  %686 = vst [vmem:[#allocation2 + $0x30] sm:$0x1] %v685_v40  ;;  %v691_v51 = vsel %vm5044_vm10, 0, %v690_v11  ;;  %v725_v52 = vsel %vm5052_vm11, 0, %v724_v18 }
  0x88   : > { %921 = vrot.lane.b32.xlu1 %v852_v35, %s4674_s7  ;;  %917 = vrot.lane.b32.xlu0 %v842_v12, %s4674_s7  ;;  %720 = vst [vmem:[#allocation2 + $0x44] sm:$0x1] %v719_v43  ;;  %689 = vst [vmem:[#allocation2 + $0x3c] sm:$0x1] %v688_v45  ;;  %v694_v57 = vsel %vm5044_vm10, 0, %v693_v19  ;;  %v780_v35 = vshll.u32 %v4958_v39, 16 }
  0x89   : > { %v763_v58 = vshll.u32 %v4961_v44, 16  ;;  %723 = vst [vmem:[#allocation2 + $0x50] sm:$0x1] %v722_v48  ;;  %692 = vst [vmem:[#allocation2 + $0x48] sm:$0x1] %v691_v51  ;;  %v728_v59 = vsel %vm5052_vm11, 0, %v727_v30  ;;  %v876_v44 = vor.u32 %v874_v42, %v5079_v31 }
  0x8a   : > { %726 = vst [vmem:[#allocation2 + $0x5c] sm:$0x1] %v725_v52  ;;  %695 = vst [vmem:[#allocation2 + $0x54] sm:$0x1] %v694_v57  ;;  %v697_v63 = vsel %vm5044_vm10, 0, %v696_v1  ;;  %v886_v39 = vrot.slane %v5071_v21, 4  ;;  %v782_v3 = vor.u32 %v780_v35, %v4977_v54 }
  0x8b   : > { %729 = vst [vmem:[#allocation2 + $0x68] sm:$0x1] %v728_v59  ;;  %698 = vst [vmem:[#allocation2 + $0x60] sm:$0x1] %v697_v63  ;;  %v775_v46 = vrot.slane %v4969_v49, 4  ;;  %v814_v0 = vshll.u32 %v4975_v53, 16  ;;  %v765_v6 = vor.u32 %v763_v58, %v4979_v55 }
  0x8c   : > { %927 = vrot.lane.b32.xlu1 %v869_v41, %s4674_s7  ;;  %923 = vrot.lane.b32.xlu0 %v859_v14, %s4674_s7  ;;  %v758_v4 = vrot.slane %v4971_v50, 4  ;;  %v797_v41 = vshll.u32 %v4966_v47, 16  ;;  %v809_v7 = vrot.slane %v5014_v17, 4  ;;  %v792_v49 = vrot.slane %v4997_v5, 4  ;;  %v961_v12 = vld [vmem:[#allocation2 + $0xc] sm:$0xf] }
  0x8d   : > { %v816_v26 = vor.u32 %v814_v0, %v5007_v13  ;;  %v848_v53 = vshll.u32 %v4991_v2, 16  ;;  %v783_v54 = vsel %vm4835_vm8, %v775_v46, %v782_v3  ;;  %v831_v55 = vshll.u32 %v4985_v60, 16  ;;  %v973_v19 = vld [vmem:[#allocation2 + $0x20] sm:$0x1]  ;;  %v976_v33 = vld [vmem:[#allocation2 + $0x24] sm:$0xf] }
  0x8e   : > { %v766_v50 = vsel %vm4835_vm8, %v758_v4, %v765_v6  ;;  %v799_v47 = vor.u32 %v797_v41, %v4987_v62  ;;  %v843_v5 = vrot.slane %v5035_v32, 4  ;;  %v826_v17 = vrot.slane %v5032_v29, 4  ;;  %v987_v40 = vld [vmem:[#allocation2 + $0x38] sm:$0x1]  ;;  %v983_v43 = vld [vmem:[#allocation2 + $0x30] sm:$0xf] }
  0x8f   : > { %v817_v13 = vsel %vm4835_vm8, %v809_v7, %v816_v26  ;;  %v850_v2 = vor.u32 %v848_v53, %v5018_v22  ;;  %v833_v62 = vor.u32 %v831_v55, %v5016_v20  ;;  %v882_v60 = vshll.u32 %v5023_v25, 16  ;;  %v994_v57 = vld [vmem:[#allocation2 + $0x44] sm:$0x1]  ;;  %v990_v35 = vld [vmem:[#allocation2 + $0x3c] sm:$0xf] }
  0x90   : > { %933 = vrot.lane.b32.xlu1 %v886_v39, %s4674_s7  ;;  %929 = vrot.lane.b32.xlu0 %v876_v44, %s4674_s7  ;;  %v800_v42 = vsel %vm4835_vm8, %v792_v49, %v799_v47  ;;  %v865_v8 = vshll.u32 %v5002_v9, 16  ;;  %v877_v10 = vrot.slane %v5079_v31, 4  ;;  %v860_v32 = vrot.slane %v5038_v36, 4  ;;  %v980_v31 = vld [vmem:[#allocation2 + $0x2c] sm:$0x1] }
  0x91   : > { %v851_v22 = vsel %vm4835_vm8, %v843_v5, %v850_v2  ;;  %v834_v29 = vsel %vm4835_vm8, %v826_v17, %v833_v62  ;;  %v884_v20 = vor.u32 %v882_v60, %v5071_v21  ;;  %v966_v21 = vld [vmem:[#allocation2 + $0x14] sm:$0x1]  ;;  %v1001_v44 = vld [vmem:[#allocation2 + $0x50] sm:$0x1]  ;;  %v997_v46 = vld [vmem:[#allocation2 + $0x48] sm:$0xf] }
  0x92   : > { %v867_v25 = vor.u32 %v865_v8, %v5020_v24  ;;  %v969_v24 = vld [vmem:[#allocation2 + $0x18] sm:$0xf]  ;;  %v1008_v41 = vld [vmem:[#allocation2 + $0x5c] sm:$0x1]  ;;  %v1004_v7 = vld [vmem:[#allocation2 + $0x54] sm:$0xf] }
  0x93   : > { %v885_v9 = vsel %vm4835_vm8, %v877_v10, %v884_v20  ;;  %v1011_v47 = vld [vmem:[#allocation2 + $0x60] sm:$0xf]  ;;  %v1025_v20 = vld [vmem:[#allocation2 + $0x8] sm:$0x1] (!%p3943_p8) }
  0x94   : > { %895 = vrot.lane.b32.xlu1 %v783_v54, %s4674_s7  ;;  %889 = vrot.lane.b32.xlu0 %v766_v50, %s4674_s7  ;;  %v868_v36 = vsel %vm4835_vm8, %v860_v32, %v867_v25  ;;  %v1015_v50 = vld [vmem:[#allocation2 + $0x68] sm:$0x1] }
  0x98   : > { %907 = vrot.lane.b32.xlu1 %v817_v13, %s4674_s7  ;;  %901 = vrot.lane.b32.xlu0 %v800_v42, %s4674_s7 }
  0x9c   : > { %919 = vrot.lane.b32.xlu1 %v851_v22, %s4674_s7  ;;  %913 = vrot.lane.b32.xlu0 %v834_v29, %s4674_s7  ;;  %v1021_v29 = vld [vmem:[#allocation2] sm:$0xf] (!%p3943_p8) }
  0x9d   : > { %v1022_v25 = vsel (!%p3943_p8), %vm5169_vm13, 0, %v1021_v29 }
  0x9e   : > { %1023 = vst [vmem:[#allocation2] sm:$0xf] (!%p3943_p8), %v1022_v25 }
  0xa0   : > { %931 = vrot.lane.b32.xlu1 %v885_v9, %s4674_s7  ;;  %925 = vrot.lane.b32.xlu0 %v868_v36, %s4674_s7  ;;  %v4675_v9 = vmov (!%p3943_p8), 0   ;;  %v1026_v36 = vsel (!%p3943_p8), %vm5044_vm10, 0, %v1025_v20 }
  0xa1   : > { %1024 = vst.msk [vmem:[#allocation2 + $0x4] sm:$0xf] (!%p3943_p8), %vm959_vm12, %v4675_v9  ;;  %1027 = vst [vmem:[#allocation2 + $0x8] sm:$0x1] (!%p3943_p8), %v1026_v36 }
  0xe6   : > { %v894_v14 = vpop.permute.xlu1 %893  ;;  %v888_v15 = vpop.permute.xlu0 %887 }
  0xe7   : > { %v970_v16 = vsel %vm5169_vm13, %v894_v14, %v969_v24  ;;  %v962_v18 = vsel %vm5169_vm13, %v888_v15, %v961_v12 }
  0xe8   : > { %971 = vst [vmem:[#allocation2 + $0x18] sm:$0xf] %v970_v16  ;;  %963 = vst [vmem:[#allocation2 + $0xc] sm:$0xf] %v962_v18 }
  0xea   : > { %v898_v23 = vpop.permute.xlu1 %897  ;;  %v892_v27 = vpop.permute.xlu0 %891 }
  0xeb   : > { %v974_v28 = vsel %vm5044_vm10, %v898_v23, %v973_v19  ;;  %v967_v30 = vsel %vm5044_vm10, %v892_v27, %v966_v21 }
  0xec   : > { %975 = vst [vmem:[#allocation2 + $0x20] sm:$0x1] %v974_v28  ;;  %968 = vst [vmem:[#allocation2 + $0x14] sm:$0x1] %v967_v30 }
  0xee   : > { %v904_v34 = vpop.permute.xlu1 %903  ;;  %v900_v37 = vpop.permute.xlu0 %899 }
  0xef   : > { %v981_v1 = vsel %vm5044_vm10, %v904_v34, %v980_v31  ;;  %v977_v38 = vsel %vm5169_vm13, %v900_v37, %v976_v33 }
  0xf0   : > { %982 = vst [vmem:[#allocation2 + $0x2c] sm:$0x1] %v981_v1  ;;  %978 = vst [vmem:[#allocation2 + $0x24] sm:$0xf] %v977_v38 }
  0xf2   : > { %v910_v45 = vpop.permute.xlu1 %909  ;;  %v906_v48 = vpop.permute.xlu0 %905 }
  0xf3   : > { %v988_v51 = vsel %vm5044_vm10, %v910_v45, %v987_v40  ;;  %v984_v52 = vsel %vm5169_vm13, %v906_v48, %v983_v43 }
  0xf4   : > { %989 = vst [vmem:[#allocation2 + $0x38] sm:$0x1] %v988_v51  ;;  %985 = vst [vmem:[#allocation2 + $0x30] sm:$0xf] %v984_v52 }
  0xf6   : > { %v916_v58 = vpop.permute.xlu1 %915  ;;  %v912_v59 = vpop.permute.xlu0 %911 }
  0xf7   : > { %v995_v63 = vsel %vm5044_vm10, %v916_v58, %v994_v57  ;;  %v991_v39 = vsel %vm5169_vm13, %v912_v59, %v990_v35 }
  0xf8   : > { %996 = vst [vmem:[#allocation2 + $0x44] sm:$0x1] %v995_v63  ;;  %992 = vst [vmem:[#allocation2 + $0x3c] sm:$0xf] %v991_v39 }
  0xfa   : > { %v922_v0 = vpop.permute.xlu1 %921  ;;  %v918_v3 = vpop.permute.xlu0 %917 }
  0xfb   : > { %v1002_v4 = vsel %vm5044_vm10, %v922_v0, %v1001_v44  ;;  %v998_v6 = vsel %vm5169_vm13, %v918_v3, %v997_v46 }
  0xfc   : > { %1003 = vst [vmem:[#allocation2 + $0x50] sm:$0x1] %v1002_v4  ;;  %999 = vst [vmem:[#allocation2 + $0x48] sm:$0xf] %v998_v6 }
  0xfe   : > { %v928_v26 = vpop.permute.xlu1 %927  ;;  %v924_v49 = vpop.permute.xlu0 %923 }
  0xff   : > { %v1009_v53 = vsel %vm5044_vm10, %v928_v26, %v1008_v41  ;;  %v1005_v54 = vsel %vm5169_vm13, %v924_v49, %v1004_v7 }
 0x100   : > { %1010 = vst [vmem:[#allocation2 + $0x5c] sm:$0x1] %v1009_v53  ;;  %1006 = vst [vmem:[#allocation2 + $0x54] sm:$0xf] %v1005_v54 }
 0x102   : > { %v934_v55 = vpop.permute.xlu1 %933  ;;  %v930_v13 = vpop.permute.xlu0 %929 }
 0x103   : > { %v1016_v5 = vsel %vm5044_vm10, %v934_v55, %v1015_v50  ;;  %v1012_v2 = vsel %vm5169_vm13, %v930_v13, %v1011_v47 }
 0x104   : > { %1017 = vst [vmem:[#allocation2 + $0x68] sm:$0x1] %v1016_v5  ;;  %1013 = vst [vmem:[#allocation2 + $0x60] sm:$0xf] %v1012_v2 }
 0x106   : > { %v896_v17 = vpop.permute.xlu1 %895  ;;  %v890_v42 = vpop.permute.xlu0 %889 }
 0x107   : > { %972 = vst.msk [vmem:[#allocation2 + $0x1c] sm:$0xf] %vm959_vm12, %v896_v17  ;;  %965 = vst.msk [vmem:[#allocation2 + $0x10] sm:$0xf] %vm959_vm12, %v890_v42 }
 0x10a   : > { %v908_v62 = vpop.permute.xlu1 %907  ;;  %v902_v60 = vpop.permute.xlu0 %901 }
 0x10b   : > { %986 = vst.msk [vmem:[#allocation2 + $0x34] sm:$0xf] %vm959_vm12, %v908_v62  ;;  %979 = vst.msk [vmem:[#allocation2 + $0x28] sm:$0xf] %vm959_vm12, %v902_v60 }
 0x10d   : > { %1020 = sbr.rel (%p3943_p8) target bundleno = 276 (0x114), region = 52 }
 0x10e   : > { %v920_v8 = vpop.permute.xlu1 %919  ;;  %v914_v10 = vpop.permute.xlu0 %913 }
 0x10f   : > { %1000 = vst.msk [vmem:[#allocation2 + $0x4c] sm:$0xf] %vm959_vm12, %v920_v8  ;;  %993 = vst.msk [vmem:[#allocation2 + $0x40] sm:$0xf] %vm959_vm12, %v914_v10 }
 0x112   : > { %v932_v32 = vpop.permute.xlu1 %931  ;;  %v926_v22 = vpop.permute.xlu0 %925 }
 0x113   : > { %1014 = vst.msk [vmem:[#allocation2 + $0x64] sm:$0xf] %vm959_vm12, %v932_v32  ;;  %1007 = vst.msk [vmem:[#allocation2 + $0x58] sm:$0xf] %vm959_vm12, %v926_v22 }
 0x114 PF: > { %1030 = sbr.rel (%p3944_p9) target bundleno = 407 (0x197), region = 56  ;;  %s3957_s8 = sadd.s32 (!%p3944_p9), 4294967295, %s4759_s22  ;;  %v1063_v33 = vld [vmem:[#allocation2] sm:$0xf] (!%p3944_p9)  ;;  %v1067_v38 = vld [vmem:[#allocation2 + $0x8] sm:$0x1] (!%p3944_p9) }
 0x115   : > { %s4159_s9 = sshll.u32 (!%p3944_p9), %s3957_s8, 3  ;;  %s4676_s11 = smov (!%p3944_p9), 4  }
 0x116   : > { %s1034_s10 = scalar_lea.vmem (!%p3944_p9), %s4803_s29, %s4159_s9 }
 0x117   : > { %v1035_v24 = vld [vmem:[%s1034_s10] sm:$0xf] (!%p3944_p9)  ;;  %v1036_v12 = vld [vmem:[%s1034_s10 + $0x4] sm:$0xf] (!%p3944_p9) }
 0x118   : > { %v1038_v14 = vshrl.u32 (!%p3944_p9), %v1035_v24, 16  ;;  %v1041_v15 = vshll.u32 (!%p3944_p9), %v1035_v24, 16  ;;  %v1046_v16 = vshrl.u32 (!%p3944_p9), %v1036_v12, 16  ;;  %v1049_v18 = vshll.u32 (!%p3944_p9), %v1036_v12, 16 }
 0x11a   : > { %v1040_v19 = vrot.slane (!%p3944_p9), %v1038_v14, 7  ;;  %v1048_v21 = vrot.slane (!%p3944_p9), %v1046_v16, 7 }
 0x11c   : > { %v1043_v23 = vor.u32 %v1041_v15, %v1040_v19  ;;  %v1044_v27 = vrot.slane %v1040_v19, 4  ;;  %v1051_v28 = vor.u32 %v1049_v18, %v1048_v21  ;;  %v1053_v30 = vrot.slane %v1048_v21, 4 }
 0x11e   : > { %1054 = vrot.lane.b32.xlu0 %v1043_v23, %s4676_s11  ;;  %v1052_v31 = vsel %vm4835_vm8, %v1044_v27, %v1051_v28 }
 0x11f   : > { %1056 = vrot.lane.b32.xlu1 %v1052_v31, %s4676_s11 }
 0x122   : > { %1058 = vrot.lane.b32.xlu0 %v1053_v30, %s4676_s11 }
 0x190   : > { %v1055_v34 = vpop.permute.xlu0 %1054 }
 0x191   : > { %v1064_v37 = vsel %vm5169_vm13, %v1055_v34, %v1063_v33  ;;  %v1057_v1 = vpop.permute.xlu1 %1056 }
 0x192   : > { %1065 = vst [vmem:[#allocation2] sm:$0xf] %v1064_v37  ;;  %1066 = vst.msk [vmem:[#allocation2 + $0x4] sm:$0xf] %vm959_vm12, %v1057_v1 }
 0x194   : > { %v1059_v40 = vpop.permute.xlu0 %1058 }
 0x195   : > { %v1068_v43 = vsel %vm5044_vm10, %v1059_v40, %v1067_v38 }
 0x196   : > { %1069 = vst [vmem:[#allocation2 + $0x8] sm:$0x1] %v1068_v43 }
 0x197 PF: > { %1072 = sbr.rel (%p3948_p10) target bundleno = 414 (0x19e), region = 60  ;;  %v1074_v45 = vld [vmem:[#allocation2 + $0x6c] sm:$0xf] (!%p3948_p10)  ;;  %v1078_v48 = vld [vmem:[#allocation2 + $0x74] sm:$0x1] (!%p3948_p10)  ;;  %v4677_v52 = vmov (!%p3948_p10), 0  }
 0x198   : > { %v1075_v51 = vsel (!%p3948_p10), %vm5169_vm13, 0, %v1074_v45  ;;  %1077 = vst.msk [vmem:[#allocation2 + $0x70] sm:$0xf] (!%p3948_p10), %vm959_vm12, %v4677_v52  ;;  %v1079_v57 = vsel (!%p3948_p10), %vm5044_vm10, 0, %v1078_v48 }
 0x199   : > { %1076 = vst [vmem:[#allocation2 + $0x6c] sm:$0xf] (!%p3948_p10), %v1075_v51  ;;  %1080 = vst [vmem:[#allocation2 + $0x74] sm:$0x1] (!%p3948_p10), %v1079_v57 }
 0x19e PF: > { %1083 = sbr.rel (%p3949_p11) target bundleno = 542 (0x21e), region = 64  ;;  %v3964_v35 = vld [vmem:[%s4953_s26 + $0x40] sm:$0xf] (!%p3949_p11)  ;;  %v3965_v58 = vld [vmem:[%s4953_s26 + $0x44] sm:$0xf] (!%p3949_p11)  ;;  %s4678_s22 = smov (!%p3949_p11), 4  }
 0x19f   : > { %v1091_v59 = vshrl.u32 (!%p3949_p11), %v3964_v35, 16  ;;  %v1094_v63 = vshll.u32 (!%p3949_p11), %v3964_v35, 16  ;;  %v1099_v39 = vshrl.u32 (!%p3949_p11), %v3965_v58, 16  ;;  %v1102_v44 = vshll.u32 (!%p3949_p11), %v3965_v58, 16 }
 0x1a0   : > { %v1117_v26 = vld [vmem:[#allocation2 + $0x6c] sm:$0xf] (!%p3949_p11)  ;;  %v1121_v50 = vld [vmem:[#allocation2 + $0x74] sm:$0x1] (!%p3949_p11) }
 0x1a1   : > { %v1093_v46 = vrot.slane (!%p3949_p11), %v1091_v59, 7  ;;  %v1101_v0 = vrot.slane (!%p3949_p11), %v1099_v39, 7 }
 0x1a3   : > { %v1096_v3 = vor.u32 (!%p3949_p11), %v1094_v63, %v1093_v46  ;;  %v1097_v4 = vrot.slane (!%p3949_p11), %v1093_v46, 4  ;;  %v1104_v6 = vor.u32 (!%p3949_p11), %v1102_v44, %v1101_v0  ;;  %v1106_v41 = vrot.slane (!%p3949_p11), %v1101_v0, 4 }
 0x1a5   : > { %1107 = vrot.lane.b32.xlu0 %v1096_v3, %s4678_s22  ;;  %v1105_v7 = vsel %vm4835_vm8, %v1097_v4, %v1104_v6 }
 0x1a6   : > { %1109 = vrot.lane.b32.xlu1 %v1105_v7, %s4678_s22 }
 0x1a9   : > { %1111 = vrot.lane.b32.xlu0 %v1106_v41, %s4678_s22 }
 0x217   : > { %v1108_v49 = vpop.permute.xlu0 %1107 }
 0x218   : > { %v1118_v53 = vsel %vm5169_vm13, %v1108_v49, %v1117_v26  ;;  %v1110_v54 = vpop.permute.xlu1 %1109 }
 0x219   : > { %1119 = vst [vmem:[#allocation2 + $0x6c] sm:$0xf] %v1118_v53  ;;  %1120 = vst.msk [vmem:[#allocation2 + $0x70] sm:$0xf] %vm959_vm12, %v1110_v54 }
 0x21b   : > { %v1112_v47 = vpop.permute.xlu0 %1111 }
 0x21c   : > { %v1122_v55 = vsel %vm5044_vm10, %v1112_v47, %v1121_v50 }
 0x21d   : > { %1123 = vst [vmem:[#allocation2 + $0x74] sm:$0x1] %v1122_v55 }
 0x21e PF: > { %v1344_v61 = vld [vmem:[%s6073_s2 + $0x4] sm:$0xf]  ;;  %vm1394_vm14 = vcmask 1043456   ;;  %v2320_v11 = vld [vmem:[%s6073_s2 + $0x10] sm:$0xf]  ;;  %vm1369_vm3 = vcmask 64512  }
 0x21f   : > { %4550 = vmatprep.subr.msk.bf16.mxu1 %vm1394_vm14, %v1344_v61  ;;  %4554 = vmatprep.subr.msk.bf16.mxu0 %vm1394_vm14, %v2320_v11  ;;  %v1396_v13 = vsel %vm1394_vm14, %v1344_v61, 0  ;;  %v5259_v56 = vsel %vm1394_vm14, %v2320_v11, 0  ;;  %v5261_v5 = vld [vmem:[#allocation2] sm:$0xf]  ;;  %v5263_v2 = vld [vmem:[#allocation2 + $0x4] sm:$0xf] }
 0x220   : > { %4259 = vmatpush3.bf16.msra.mxu1 %v1396_v13  ;;  %4331 = vmatpush3.bf16.msra.mxu0 %v5259_v56  ;;  %v5266_v17 = vld [vmem:[#allocation2 + $0x8] sm:$0x1]  ;;  %vm1149_vm15 = vsmask.f32 3328  ;;  %vm1150_vm1 = vsmask.f32 7440 }
 0x221   : > { %v1153_v42 = vshrl.u32 %v5261_v5, 16  ;;  %v1156_v62 = vshll.u32 %v5261_v5, 16  ;;  %v1162_v60 = vshll.u32 %v5263_v2, 16  ;;  %v1166_v8 = vshrl.u32 %v5263_v2, 16  ;;  %v1140_v10 = vld [vmem:[%s6073_s2] sm:$0xf]  ;;  %vm5295_vm2 = vmor %vm1149_vm15, %vm1150_vm1 }
 0x222   : > { %v1172_v32 = vshll.u32 %v5266_v17, 16  ;;  %4551 = vmatprep.subr.msk.bf16.mxu1 %vm1394_vm14, %v1140_v10  ;;  %v2104_v22 = vld [vmem:[#allocation2 + $0xc] sm:$0xf]  ;;  %v5277_v29 = vld [vmem:[#allocation2 + $0x10] sm:$0xf]  ;;  %v1560_v11 = vsel %vm1394_vm14, %v1140_v10, 0 }
 0x223   : > { %v1155_v20 = vrot.slane %v1153_v42, 4  ;;  %v1158_v25 = vrot.slane %v1156_v62, 5  ;;  %v1164_v9 = vrot.slane %v1162_v60, 5  ;;  %v1168_v36 = vrot.slane %v1166_v8, 4  ;;  %v5279_v24 = vld [vmem:[#allocation2 + $0x14] sm:$0x1] }
 0x224   : > { %v1174_v12 = vrot.slane %v1172_v32, 5  ;;  %v2129_v14 = vshrl.u32 %v2104_v22, 16  ;;  %v2132_v15 = vshll.u32 %v2104_v22, 16  ;;  %v2138_v16 = vshll.u32 %v5277_v29, 16  ;;  %v5285_v18 = vld [vmem:[%s6073_s2 + $0x14] sm:$0xf] }
 0x225   : > { %v1159_v19 = vor.u32 %v1158_v25, %v1155_v20  ;;  %v1169_v21 = vor.u32 %v1168_v36, %v1164_v9  ;;  %v2142_v23 = vshrl.u32 %v5277_v29, 16  ;;  %v2148_v27 = vshll.u32 %v5279_v24, 16  ;;  %4556 = vmatprep.subr.msk.bf16.mxu0 %vm1394_vm14, %v5285_v18  ;;  %v5291_v28 = vld [vmem:[#allocation2 + $0xc] sm:$0xf]  ;;  %v5299_v37 = vld [vmem:[#allocation2 + $0x10] sm:$0xf] }
 0x226   : > { %v2131_v31 = vrot.slane %v2129_v14, 4  ;;  %v2134_v33 = vrot.slane %v2132_v15, 5  ;;  %v2140_v34 = vrot.slane %v2138_v16, 5  ;;  %v5301_v48 = vld [vmem:[#allocation2 + $0x14] sm:$0x1]  ;;  %v1177_v51 = vshrl.u32 %v5291_v28, 16 }
 0x227   : > { %v1160_v1 = vrot.slane %v1159_v19, 4  ;;  %v1170_v38 = vrot.slane %v1169_v21, 4  ;;  %v2144_v40 = vrot.slane %v2142_v23, 4  ;;  %v2150_v45 = vrot.slane %v2148_v27, 5  ;;  %v2107_v41 = vld [vmem:[#allocation2 + $0x18] sm:$0xf] }
 0x228   : > { %v2135_v43 = vor.u32 %v2134_v33, %v2131_v31  ;;  %v1180_v52 = vshll.u32 %v5291_v28, 16  ;;  %v1186_v59 = vshll.u32 %v5299_v37, 16  ;;  %v1179_v44 = vrot.slane %v1177_v51, 4  ;;  %v5317_v54 = vld [vmem:[#allocation2 + $0x1c] sm:$0xf] }
 0x229   : > { %v1165_v57 = vsel %vm5295_vm2, %v1160_v1, %v1164_v9  ;;  %v1175_v35 = vsel %vm5295_vm2, %v1170_v38, %v1174_v12  ;;  %v2145_v58 = vor.u32 %v2144_v40, %v2140_v34  ;;  %v1190_v4 = vshrl.u32 %v5299_v37, 16  ;;  %v5319_v50 = vld [vmem:[#allocation2 + $0x20] sm:$0x1]  ;;  %v5331_v12 = vld [vmem:[#allocation2 + $0x18] sm:$0xf] }
 0x22a   : > { %v3966_v63 = vcombine.low %v1165_v57, %v1175_v35  ;;  %v2136_v39 = vrot.slane %v2135_v43, 4  ;;  %v1182_v46 = vrot.slane %v1180_v52, 5  ;;  %v1188_v3 = vrot.slane %v1186_v59, 5  ;;  %v5333_v21 = vld [vmem:[#allocation2 + $0x1c] sm:$0xf] }
 0x22b   : > { %v2146_v0 = vrot.slane %v2145_v58, 4  ;;  %v1196_v6 = vshll.u32 %v5301_v48, 16  ;;  %v2519_v26 = vrot.slane %v5277_v29, 5  ;;  %v2522_v49 = vrot.slane %v5279_v24, 5 }
 0x22c   : > { %4260 = vmatprep.mubr.msk.bf16.mxu1 %vm1369_vm3, %v3966_v63  ;;  %v2141_v7 = vsel %vm5295_vm2, %v2136_v39, %v2140_v34  ;;  %v1183_v53 = vor.u32 %v1182_v46, %v1179_v44  ;;  %v1192_v55 = vrot.slane %v1190_v4, 4  ;;  %v2153_v62 = vshrl.u32 %v2107_v41, 16  ;;  %v5342_v34 = vld [vmem:[#allocation2 + $0x20] sm:$0x1]  ;;  %v5351_v39 = vld [vmem:[#allocation2 + $0x28] sm:$0xf] }
 0x22d   : > { %v2151_v47 = vsel %vm5295_vm2, %v2146_v0, %v2150_v45  ;;  %v1198_v61 = vrot.slane %v1196_v6, 5  ;;  %v2156_v60 = vshll.u32 %v2107_v41, 16  ;;  %v2162_v32 = vshll.u32 %v5317_v54, 16  ;;  %v2110_v45 = vld [vmem:[#allocation2 + $0x24] sm:$0xf] }
 0x22e   : > { %v4038_v13 = vcombine.low %v2141_v7, %v2151_v47  ;;  %v1184_v42 = vrot.slane %v1183_v53, 4  ;;  %v1193_v8 = vor.u32 %v1192_v55, %v1188_v3  ;;  %v2166_v22 = vshrl.u32 %v5317_v54, 16  ;;  %v5360_v47 = vld [vmem:[#allocation2 + $0x24] sm:$0xf] }
 0x22f   : > { %v2172_v20 = vshll.u32 %v5319_v50, 16  ;;  %v2155_v9 = vrot.slane %v2153_v62, 4  ;;  %v2158_v36 = vrot.slane %v2156_v60, 5  ;;  %v2526_v10 = vrot.slane %v5317_v54, 5  ;;  %v5363_v62 = vld [vmem:[#allocation2 + $0x28] sm:$0xf] }
 0x230   : > { %4332 = vmatprep.mubr.msk.bf16.mxu0 %vm1369_vm3, %v4038_v13  ;;  %v1189_v25 = vsel %vm5295_vm2, %v1184_v42, %v1188_v3  ;;  %v1194_v14 = vrot.slane %v1193_v8, 4  ;;  %v2164_v15 = vrot.slane %v2162_v32, 5  ;;  %v2168_v16 = vrot.slane %v2166_v22, 4  ;;  %v5356_v3 = vld [vmem:[#allocation2 + $0x2c] sm:$0x1] }
 0x231   : > { %v2174_v19 = vrot.slane %v2172_v20, 5  ;;  %v2159_v23 = vor.u32 %v2158_v36, %v2155_v9  ;;  %v5337_v27 = vrot.slane %v2526_v10, 4  ;;  %v2529_v31 = vrot.slane %v5319_v50, 5  ;;  %v5370_v22 = vld [vmem:[%s6073_s2 + $0x18] sm:$0xf] }
 0x232   : > { %v2623_v33 = vsel %vm1394_vm14, %v5285_v18, 0  ;;  %v1199_v1 = vsel %vm5295_vm2, %v1194_v14, %v1198_v61  ;;  %v2169_v38 = vor.u32 %v2168_v16, %v2164_v15  ;;  %v1201_v40 = vshrl.u32 %v5331_v12, 16 }
 0x233   : > { %v1204_v43 = vshll.u32 %v5331_v12, 16  ;;  %v3967_v51 = vcombine.low %v1189_v25, %v1199_v1  ;;  %v2160_v52 = vrot.slane %v2159_v23, 4  ;;  %v1210_v57 = vshll.u32 %v5333_v21, 16  ;;  %v5377_v23 = vld [vmem:[#allocation2 + $0x2c] sm:$0x1] }
 0x234   : > { %v1214_v35 = vshrl.u32 %v5333_v21, 16  ;;  %v2170_v58 = vrot.slane %v2169_v38, 4  ;;  %v1203_v59 = vrot.slane %v1201_v40, 4  ;;  %v1220_v63 = vshll.u32 %v5342_v34, 16  ;;  %v2113_v1 = vld [vmem:[#allocation2 + $0x30] sm:$0xf] }
 0x235   : > { %v1206_v18 = vrot.slane %v1204_v43, 5  ;;  %4261 = vmatmul.mubr.msk.bf16.vlgmr.msra.gmra.mrb[0].mxu1 %vm1369_vm3, %v3967_v51  ;;  %v2165_v44 = vsel %vm5295_vm2, %v2160_v52, %v2164_v15  ;;  %v1212_v46 = vrot.slane %v1210_v57, 5  ;;  %v2177_v4 = vshrl.u32 %v2110_v45, 16 }
 0x236   : > { %v1216_v0 = vrot.slane %v1214_v35, 4  ;;  %4277 = vmatpush3.bf16.msra.mxu1 %v1560_v11  ;;  %v2175_v6 = vsel %vm5295_vm2, %v2170_v58, %v2174_v19  ;;  %v1222_v7 = vrot.slane %v1220_v63, 5  ;;  %v2180_v53 = vshll.u32 %v2110_v45, 16  ;;  %v5385_v35 = vld [vmem:[#allocation2 + $0x34] sm:$0xf] }
 0x237   : > { %v1207_v41 = vor.u32 %v1206_v18, %v1203_v59  ;;  %v4039_v55 = vcombine.low %v2165_v44, %v2175_v6  ;;  %v2179_v13 = vrot.slane %v2177_v4, 4  ;;  %v2186_v42 = vshll.u32 %v5351_v39, 16  ;;  %v5388_v63 = vld [vmem:[#allocation2 + $0x38] sm:$0x1] }
 0x238   : > { %v1217_v61 = vor.u32 %v1216_v0, %v1212_v46  ;;  %v2182_v8 = vrot.slane %v2180_v53, 5  ;;  %v2190_v32 = vshrl.u32 %v5351_v39, 16  ;;  %v2196_v11 = vshll.u32 %v5356_v3, 16 }
 0x239   : > { %v1208_v60 = vrot.slane %v1207_v41, 4  ;;  %4333 = vmatmul.mubr.msk.bf16.vlgmr.msra.gmra.mrb[0].mxu0 %vm1369_vm3, %v4039_v55  ;;  %v2188_v25 = vrot.slane %v2186_v42, 5  ;;  %v1225_v9 = vshrl.u32 %v5360_v47, 16  ;;  %v1228_v36 = vshll.u32 %v5360_v47, 16  ;;  %v5393_v41 = vld [vmem:[#allocation2 + $0x30] sm:$0xf] }
 0x23a   : > { %v1218_v20 = vrot.slane %v1217_v61, 4  ;;  %4349 = vmatpush3.bf16.msra.mxu0 %v2623_v33  ;;  %v2183_v15 = vor.u32 %v2182_v8, %v2179_v13  ;;  %v2192_v16 = vrot.slane %v2190_v32, 4  ;;  %v2198_v19 = vrot.slane %v2196_v11, 5  ;;  %v5399_v13 = vld [vmem:[%s6073_s2 + $0x8] sm:$0xf] }
 0x23b   : > { %v1213_v14 = vsel %vm5295_vm2, %v1208_v60, %v1212_v46  ;;  %v1227_v40 = vrot.slane %v1225_v9, 4  ;;  %v1230_v43 = vrot.slane %v1228_v36, 5  ;;  %v1234_v45 = vshll.u32 %v5363_v62, 16  ;;  %4557 = vmatprep.subr.msk.bf16.mxu0 %vm1394_vm14, %v5370_v22  ;;  %v5404_v11 = vld [vmem:[#allocation2 + $0x34] sm:$0xf]  ;;  %4552 = vmatprep.subr.msk.bf16.mxu1 %vm1394_vm14, %v5399_v13 }
 0x23c   : > { %v1223_v38 = vsel %vm5295_vm2, %v1218_v20, %v1222_v7  ;;  %v2184_v51 = vrot.slane %v2183_v15, 4  ;;  %v2193_v52 = vor.u32 %v2192_v16, %v2188_v25  ;;  %v1238_v57 = vshrl.u32 %v5363_v62, 16 }
 0x23d   : > { %v3968_v33 = vcombine.low %v1213_v14, %v1223_v38  ;;  %v1231_v58 = vor.u32 %v1230_v43, %v1227_v40  ;;  %v1236_v59 = vrot.slane %v1234_v45, 5  ;;  %v1244_v18 = vshll.u32 %v5377_v23, 16  ;;  %v5413_v38 = vld [vmem:[#allocation2 + $0x38] sm:$0x1] }
 0x23e   : > { %v2201_v44 = vshrl.u32 %v2113_v1, 16  ;;  %v2189_v46 = vsel %vm5295_vm2, %v2184_v51, %v2188_v25  ;;  %v2194_v0 = vrot.slane %v2193_v52, 4  ;;  %v1240_v4 = vrot.slane %v1238_v57, 4 }
 0x23f   : > { %4264 = vmatprep.mubr.msk.bf16.mxu1 %vm1369_vm3, %v3968_v33  ;;  %v2204_v6 = vshll.u32 %v2113_v1, 16  ;;  %v1232_v7 = vrot.slane %v1231_v58, 4  ;;  %v1246_v53 = vrot.slane %v1244_v18, 5  ;;  %v2210_v61 = vshll.u32 %v5385_v35, 16  ;;  %v2485_v58 = vld [vmem:[#allocation2 + $0xc] sm:$0xe] }
 0x240   : > { %v2203_v55 = vrot.slane %v2201_v44, 4  ;;  %v2199_v42 = vsel %vm5295_vm2, %v2194_v0, %v2198_v19  ;;  %v1241_v60 = vor.u32 %v1240_v4, %v1236_v59  ;;  %v2214_v32 = vshrl.u32 %v5385_v35, 16  ;;  %v5420_v0 = vld [vmem:[#allocation2 + $0x3c] sm:$0xf] }
 0x241   : > { %v2206_v8 = vrot.slane %v2204_v6, 5  ;;  %v4040_v20 = vcombine.low %v2189_v46, %v2199_v42  ;;  %v1237_v25 = vsel %vm5295_vm2, %v1232_v7, %v1236_v59  ;;  %v2212_v9 = vrot.slane %v2210_v61, 5  ;;  %v5426_v42 = vld [vmem:[#allocation2 + $0x40] sm:$0xf] }
 0x242   : > { %v2220_v36 = vshll.u32 %v5388_v63, 16  ;;  %v1242_v14 = vrot.slane %v1241_v60, 4  ;;  %v2216_v16 = vrot.slane %v2214_v32, 4  ;;  %v1249_v19 = vshrl.u32 %v5393_v41, 16  ;;  %v5428_v60 = vld [vmem:[#allocation2 + $0x44] sm:$0x1] }
 0x243   : > { %v2207_v15 = vor.u32 %v2206_v8, %v2203_v55  ;;  %4336 = vmatprep.mubr.msk.bf16.mxu0 %vm1369_vm3, %v4040_v20  ;;  %v1252_v40 = vshll.u32 %v5393_v41, 16  ;;  %v1258_v43 = vshll.u32 %v5404_v11, 16  ;;  %v1262_v45 = vshrl.u32 %v5404_v11, 16 }
 0x244   : > { %v2222_v1 = vrot.slane %v2220_v36, 5  ;;  %v1247_v33 = vsel %vm5295_vm2, %v1242_v14, %v1246_v53  ;;  %v2217_v52 = vor.u32 %v2216_v16, %v2212_v9  ;;  %v1251_v57 = vrot.slane %v1249_v19, 4  ;;  %v2486_v36 = vld [vmem:[#allocation2 + $0x18] sm:$0xe] }
 0x245   : > { %v2208_v51 = vrot.slane %v2207_v15, 4  ;;  %v3969_v59 = vcombine.low %v1237_v25, %v1247_v33  ;;  %v1254_v18 = vrot.slane %v1252_v40, 5  ;;  %v1260_v44 = vrot.slane %v1258_v43, 5 }
 0x246   : > { %v1264_v46 = vrot.slane %v1262_v45, 4  ;;  %v2218_v6 = vrot.slane %v2217_v52, 4  ;;  %v1268_v7 = vshll.u32 %v5413_v38, 16  ;;  %vm1683_vm4 = vcmask 1042432  }
 0x247   : > { %v2213_v4 = vsel %vm5295_vm2, %v2208_v51, %v2212_v9  ;;  %4265 = vmatmul.mubr.msk.bf16.gmra.mrb[4].mxu1 %vm1369_vm3, %v3969_v59  ;;  %v1255_v53 = vor.u32 %v1254_v18, %v1251_v57  ;;  %vm1684_vm6 = vcmask 1046532   ;;  %v4054_v61 = vrot.slane %v2485_v58, 9  ;;  %v5451_v51 = vld [vmem:[#allocation2 + $0x4c] sm:$0xf]  ;;  %v5460_v18 = vld [vmem:[#allocation2 + $0x50] sm:$0x1] }
 0x248   : > { %v1265_v55 = vor.u32 %v1264_v46, %v1260_v44  ;;  %v2223_v8 = vsel %vm5295_vm2, %v2218_v6, %v2222_v1  ;;  %v1270_v32 = vrot.slane %v1268_v7, 5  ;;  %vm5432_vm7 = vmor %vm1683_vm4, %vm1684_vm6  ;;  %v2521_v25 = vrot.slane %v2519_v26, 4  ;;  %v5443_v1 = vld [vmem:[#allocation2 + $0x48] sm:$0xf] }
 0x249   : > { %v1273_v9 = vshrl.u32 %v5420_v0, 16  ;;  %v4041_v14 = vcombine.low %v2213_v4, %v2223_v8  ;;  %v1256_v15 = vrot.slane %v1255_v53, 4  ;;  %v2520_v19 = vsel %vm5432_vm7, %v4054_v61, %v2519_v26 }
 0x24a   : > { %v1266_v16 = vrot.slane %v1265_v55, 4  ;;  %v2523_v40 = vsel %vm5432_vm7, %v2521_v25, %v2522_v49  ;;  %v1276_v45 = vshll.u32 %v5420_v0, 16  ;;  %v1282_v33 = vshll.u32 %v5426_v42, 16 }
 0x24b   : > { %v1275_v43 = vrot.slane %v1273_v9, 4  ;;  %4337 = vmatmul.mubr.msk.bf16.gmra.mrb[4].mxu0 %vm1369_vm3, %v4041_v14  ;;  %v1261_v29 = vsel %vm5295_vm2, %v1256_v15, %v1260_v44  ;;  %v4062_v52 = vcombine.low %v2520_v19, %v2523_v40  ;;  %v1286_v24 = vshrl.u32 %v5426_v42, 16  ;;  %v5479_v14 = vld [vmem:[#allocation2 + $0x54] sm:$0xf]  ;;  %v5481_v15 = vld [vmem:[#allocation2 + $0x58] sm:$0xf] }
 0x24c   : > { %v1271_v26 = vsel %vm5295_vm2, %v1266_v16, %v1270_v32  ;;  %v1278_v49 = vrot.slane %v1276_v45, 5  ;;  %v1284_v58 = vrot.slane %v1282_v33, 5  ;;  %v1292_v59 = vshll.u32 %v5428_v60, 16 }
 0x24d   : > { %v3970_v57 = vcombine.low %v1261_v29, %v1271_v26  ;;  %4350 = vmatprep.mubr.msk.bf16.mxu0 %vm1369_vm3, %v4062_v52  ;;  %v1288_v46 = vrot.slane %v1286_v24, 4  ;;  %v4055_v4 = vrot.slane %v2486_v36, 9  ;;  %v2530_v44 = vsel %vm5432_vm7, %v5337_v27, %v2529_v31  ;;  %v2487_v31 = vld [vmem:[#allocation2 + $0x24] sm:$0xe]  ;;  %v5490_v29 = vld [vmem:[%s6073_s2 + $0x1c] sm:$0xf] }
 0x24e   : > { %v2821_v6 = vsel %vm1394_vm14, %v5370_v22, 0  ;;  %v1279_v7 = vor.u32 %v1278_v49, %v1275_v43  ;;  %v1294_v53 = vrot.slane %v1292_v59, 5  ;;  %v1297_v55 = vshrl.u32 %v5443_v1, 16  ;;  %v5496_v49 = vld [vmem:[#allocation2 + $0x5c] sm:$0x1] }
 0x24f   : > { %4268 = vmatprep.mubr.msk.bf16.mxu1 %vm1369_vm3, %v3970_v57  ;;  %v1300_v61 = vshll.u32 %v5443_v1, 16  ;;  %v1289_v8 = vor.u32 %v1288_v46, %v1284_v58  ;;  %v2527_v50 = vsel %vm5432_vm7, %v4055_v4, %v2526_v10  ;;  %v1306_v32 = vshll.u32 %v5451_v51, 16  ;;  %v2488_v4 = vld [vmem:[#allocation2 + $0x30] sm:$0xe] }
 0x250   : > { %v1310_v27 = vshrl.u32 %v5451_v51, 16  ;;  %v1280_v22 = vrot.slane %v1279_v7, 4  ;;  %v4063_v25 = vcombine.low %v2527_v50, %v2530_v44  ;;  %v1299_v9 = vrot.slane %v1297_v55, 4 }
 0x251   : > { %v1302_v36 = vrot.slane %v1300_v61, 5  ;;  %v1290_v16 = vrot.slane %v1289_v8, 4  ;;  %v1308_v19 = vrot.slane %v1306_v32, 5  ;;  %v1316_v54 = vshll.u32 %v5460_v18, 16  ;;  %v5503_v61 = vld [vmem:[#allocation2 + $0x40] sm:$0xf] }
 0x252   : > { %v1312_v40 = vrot.slane %v1310_v27, 4  ;;  %v1285_v10 = vsel %vm5295_vm2, %v1280_v22, %v1284_v58  ;;  %v4056_v45 = vrot.slane %v2487_v31, 9  ;;  %v2533_v33 = vrot.slane %v5351_v39, 5 }
 0x253   : > { %v1303_v43 = vor.u32 %v1302_v36, %v1299_v9  ;;  %v1295_v26 = vsel %vm5295_vm2, %v1290_v16, %v1294_v53  ;;  %4351 = vmatmul.mubr.msk.bf16.vlgmr.msra.gmra.mrb[0].mxu0 %vm1369_vm3, %v4063_v25  ;;  %v1318_v24 = vrot.slane %v1316_v54, 5  ;;  %v2536_v57 = vrot.slane %v5356_v3, 5  ;;  %v5516_v25 = vld [vmem:[#allocation2 + $0x44] sm:$0x1]  ;;  %v2489_v9 = vld [vmem:[#allocation2 + $0x3c] sm:$0xe] }
 0x254   : > { %v1313_v52 = vor.u32 %v1312_v40, %v1308_v19  ;;  %v3971_v58 = vcombine.low %v1285_v10, %v1295_v26  ;;  %4367 = vmatpush3.bf16.msra.mxu0 %v2821_v6  ;;  %v2534_v39 = vsel %vm5432_vm7, %v4056_v45, %v2533_v33  ;;  %v2535_v46 = vrot.slane %v2533_v33, 4 }
 0x255   : > { %v1304_v59 = vrot.slane %v1303_v43, 4  ;;  %v1321_v7 = vshrl.u32 %v5479_v14, 16  ;;  %v1324_v53 = vshll.u32 %v5479_v14, 16  ;;  %v1330_v55 = vshll.u32 %v5481_v15, 16  ;;  %4558 = vmatprep.subr.msk.bf16.mxu0 %vm1394_vm14, %v5490_v29 }
 0x256   : > { %v1314_v44 = vrot.slane %v1313_v52, 4  ;;  %4269 = vmatmul.mubr.msk.bf16.gmra.mrb[8].mxu1 %vm1369_vm3, %v3971_v58  ;;  %v2537_v6 = vsel %vm5432_vm7, %v2535_v46, %v2536_v57  ;;  %v1334_v8 = vshrl.u32 %v5481_v15, 16  ;;  %v1340_v50 = vshll.u32 %v5496_v49, 16 }
 0x257   : > { %v1309_v3 = vsel %vm5295_vm2, %v1304_v59, %v1308_v19  ;;  %v4064_v27 = vcombine.low %v2534_v39, %v2537_v6  ;;  %v1323_v31 = vrot.slane %v1321_v7, 4  ;;  %v1326_v22 = vrot.slane %v1324_v53, 5  ;;  %v5534_v7 = vld [vmem:[#allocation2 + $0x50] sm:$0x1]  ;;  %v2490_v53 = vld [vmem:[#allocation2 + $0x48] sm:$0xe] }
 0x258   : > { %v1319_v32 = vsel %vm5295_vm2, %v1314_v44, %v1318_v24  ;;  %v1332_v16 = vrot.slane %v1330_v55, 5  ;;  %v1336_v40 = vrot.slane %v1334_v8, 4  ;;  %v1342_v19 = vrot.slane %v1340_v50, 5  ;;  %v5532_v44 = vld [vmem:[#allocation2 + $0x4c] sm:$0xf] }
 0x259   : > { %v3972_v36 = vcombine.low %v1309_v3, %v1319_v32  ;;  %4354 = vmatprep.mubr.msk.bf16.mxu0 %vm1369_vm3, %v4064_v27  ;;  %v1327_v54 = vor.u32 %v1326_v22, %v1323_v31  ;;  %v4057_v10 = vrot.slane %v2488_v4, 9  ;;  %v2540_v43 = vrot.slane %v5385_v35, 5  ;;  %v5542_v50 = vld [vmem:[#allocation2 + $0x58] sm:$0xf]  ;;  %v2491_v32 = vld [vmem:[#allocation2 + $0x54] sm:$0xe] }
 0x25a   : > { %v2543_v45 = vrot.slane %v5388_v63, 5  ;;  %v1337_v33 = vor.u32 %v1336_v40, %v1332_v16  ;;  %v4058_v26 = vrot.slane %v2489_v9, 9  ;;  %v2547_v52 = vrot.slane %v5503_v61, 5  ;;  %v5544_v22 = vld [vmem:[#allocation2 + $0x5c] sm:$0x1] }
 0x25b   : > { %4272 = vmatprep.mubr.msk.bf16.mxu1 %vm1369_vm3, %v3972_v36  ;;  %v2550_v24 = vrot.slane %v5516_v25, 5  ;;  %v1328_v57 = vrot.slane %v1327_v54, 4  ;;  %v2541_v58 = vsel %vm5432_vm7, %v4057_v10, %v2540_v43  ;;  %v2542_v59 = vrot.slane %v2540_v43, 4  ;;  %6098 = vst [vmem:[#allocation3_spill] sm:$0xff] %v5544_v22  ;;  %v5549_v40 = vld [vmem:[#allocation2 + $0x64] sm:$0xf] }
 0x25c   : > { %v1338_v39 = vrot.slane %v1337_v33, 4  ;;  %v2548_v46 = vsel %vm5432_vm7, %v4058_v26, %v2547_v52  ;;  %v2549_v35 = vrot.slane %v2547_v52, 4  ;;  %v3982_v6 = vcombine.low %v5261_v5, %v5263_v2  ;;  %6099 = vst [vmem:[#allocation4_spill] sm:$0xff] %v5549_v40  ;;  %v5554_v54 = vld [vmem:[#allocation2 + $0x68] sm:$0x1] }
 0x25d   : > { %v1333_v63 = vsel %vm5295_vm2, %v1328_v57, %v1332_v16  ;;  %v2544_v4 = vsel %vm5432_vm7, %v2542_v59, %v2543_v45  ;;  %v4059_v9 = vrot.slane %v2490_v53, 9  ;;  %v2554_v36 = vrot.slane %v5532_v44, 5  ;;  %6100 = vst [vmem:[#allocation5_spill] sm:$0xff] %v5554_v54  ;;  %v2492_v10 = vld [vmem:[#allocation2 + $0x60] sm:$0xe] }
 0x25e   : > { %v1343_v55 = vsel %vm5295_vm2, %v1338_v39, %v1342_v19  ;;  %v4065_v3 = vcombine.low %v2541_v58, %v2544_v4  ;;  %v2551_v8 = vsel %vm5432_vm7, %v2549_v35, %v2550_v24  ;;  %v2557_v16 = vrot.slane %v5534_v7, 5  ;;  %v1660_v39 = vld [vmem:[#allocation2 + $0xc] sm:$0xe] }
 0x25f   : > { %v3973_v27 = vcombine.low %v1333_v63, %v1343_v55  ;;  %v4066_v31 = vcombine.low %v2548_v46, %v2551_v8  ;;  %v4060_v5 = vrot.slane %v2491_v32, 9  ;;  %v2561_v19 = vrot.slane %v5542_v50, 5  ;;  %v1661_v46 = vld [vmem:[#allocation2 + $0x18] sm:$0xe]  ;;  %v1662_v32 = vld [vmem:[#allocation2 + $0x24] sm:$0xe] }
 0x260   : > { %4355 = vmatmul.mubr.msk.bf16.gmra.mrb[4].mxu0 %vm1369_vm3, %v4065_v3  ;;  %v2555_v43 = vsel %vm5432_vm7, %v4059_v9, %v2554_v36  ;;  %v2556_v45 = vrot.slane %v2554_v36, 4  ;;  %v2564_v33 = vrot.slane %v5544_v22, 5  ;;  %v1695_v24 = vrot.slane %v5299_v37, 5  ;;  %v1663_v36 = vld [vmem:[#allocation2 + $0x30] sm:$0xe] }
 0x261   : > { %4273 = vmatmul.mubr.msk.bf16.gmra.mrb[12].mxu1 %vm1369_vm3, %v3973_v27  ;;  %4358 = vmatprep.mubr.msk.bf16.mxu0 %vm1369_vm3, %v4066_v31  ;;  %v2562_v26 = vsel %vm5432_vm7, %v4060_v5, %v2561_v19  ;;  %v2563_v52 = vrot.slane %v2561_v19, 4  ;;  %v3983_v57 = vcombine.low %v5291_v28, %v5299_v37  ;;  %v2568_v59 = vrot.slane %v5549_v40, 5  ;;  %v5580_v27 = vld [vmem:[%s6073_s2 + $0xc] sm:$0xf]  ;;  %v5822_v22 = vld [vmem:[#allocation2 + $0x70] sm:$0xf] }
 0x262   : > { %4278 = vmatprep.mubr.msk.bf16.mxu1 %vm1369_vm3, %v3982_v6  ;;  %v2558_v58 = vsel %vm5432_vm7, %v2556_v45, %v2557_v16  ;;  %v4061_v4 = vrot.slane %v2492_v10, 9  ;;  %v2571_v53 = vrot.slane %v5554_v54, 5  ;;  %v1698_v55 = vrot.slane %v5301_v48, 5 }
 0x263   : > { %v4067_v35 = vcombine.low %v2555_v43, %v2558_v58  ;;  %v2565_v63 = vsel %vm5432_vm7, %v2563_v52, %v2564_v33  ;;  %v3984_v3 = vcombine.low %v5331_v12, %v5333_v21  ;;  %v2570_v37 = vrot.slane %v2568_v59, 4 }
 0x264   : > { %v4068_v28 = vcombine.low %v2562_v26, %v2565_v63  ;;  %v1792_v6 = vsel %vm1394_vm14, %v5399_v13, 0  ;;  %v3999_v8 = vrot.slane %v1660_v39, 9  ;;  %v1697_v31 = vrot.slane %v1695_v24, 4  ;;  %v1664_v63 = vld [vmem:[#allocation2 + $0x3c] sm:$0xe] }
 0x265   : > { %v4000_v9 = vrot.slane %v1661_v46, 9  ;;  %v2569_v48 = vsel %vm5432_vm7, %v4061_v4, %v2568_v59  ;;  %v2572_v12 = vsel %vm5432_vm7, %v2570_v37, %v2571_v53  ;;  %v1702_v5 = vrot.slane %v5333_v21, 5 }
 0x266   : > { %v5590_v13 = vsel %vm5432_vm7, %v3999_v8, %v1695_v24  ;;  %v5595_v16 = vsel %vm5432_vm7, %v1697_v31, %v1698_v55  ;;  %v1705_v19 = vrot.slane %v5342_v34, 5  ;;  %v4001_v10 = vrot.slane %v1662_v32, 9  ;;  %v4614_v31 = vld [vmem:[#allocation2 + $0x24] sm:$0xff]  }
 0x267   : > { %v3985_v43 = vcombine.low %v5360_v47, %v5363_v62  ;;  %v1709_v33 = vrot.slane %v5363_v62, 5  ;;  %v1712_v26 = vrot.slane %v5377_v23, 5  ;;  %v4069_v52 = vcombine.low %v2569_v48, %v2572_v12  ;;  %v1659_v23 = vld [vmem:[#allocation2] sm:$0xe] }
 0x268   : > { %4359 = vmatmul.mubr.msk.bf16.gmra.mrb[8].mxu0 %vm1369_vm3, %v4067_v35  ;;  %v5609_v21 = vsel %vm5432_vm7, %v4000_v9, %v1702_v5  ;;  %v1704_v34 = vrot.slane %v1702_v5, 4  ;;  %v4002_v24 = vrot.slane %v1663_v36, 9  ;;  %v1716_v59 = vrot.slane %v5404_v11, 5  ;;  %v2936_v9 = vld [vmem:[#allocation2 + $0x18] sm:$0xf] }
 0x269   : > { %4279 = vmatmul.mubr.msk.bf16.vlgmr.msra.gmra.mrb[0].mxu1 %vm1369_vm3, %v3983_v57  ;;  %4362 = vmatprep.mubr.msk.bf16.mxu0 %vm1369_vm3, %v4068_v28  ;;  %v4612_v57 = vld [vmem:[#allocation2 + $0x18] sm:$0xff]   ;;  %v5613_v47 = vsel %vm5432_vm7, %v4001_v10, %v1709_v33  ;;  %v1711_v58 = vrot.slane %v1709_v33, 4  ;;  %v1719_v39 = vrot.slane %v5413_v38, 5  ;;  %v3986_v62 = vcombine.low %v5393_v41, %v5404_v11 }
 0x26a   : > { %4295 = vmatpush3.bf16.msra.mxu1 %v1792_v6  ;;  %4282 = vmatprep.mubr.msk.bf16.mxu1 %vm1369_vm3, %v3984_v3  ;;  %v1688_v46 = vrot.slane %v5263_v2, 5  ;;  %v5622_v35 = vsel %vm5432_vm7, %v1704_v34, %v1705_v19  ;;  %v5632_v38 = vsel %vm5432_vm7, %v4002_v24, %v1716_v59  ;;  %v1718_v41 = vrot.slane %v1716_v59, 4  ;;  %v5655_v5 = vld [vmem:[#allocation2 + $0x1c] sm:$0xf]  ;;  %v1665_v19 = vld [vmem:[#allocation2 + $0x48] sm:$0xe] }
 0x26b   : > { %4553 = vmatprep.subr.msk.bf16.mxu1 %vm1394_vm14, %v5580_v27  ;;  %v5628_v53 = vsel %vm5432_vm7, %v1711_v58, %v1712_v26  ;;  %v4003_v55 = vrot.slane %v1664_v63, 9  ;;  %v3998_v3 = vrot.slane %v1659_v23, 9  ;;  %v1723_v37 = vrot.slane %v5426_v42, 5  ;;  %v5677_v34 = vld [vmem:[%s6073_s2 + $0x20] sm:$0xf] }
 0x26c   : > { %v5641_v11 = vsel %vm5432_vm7, %v1718_v41, %v1719_v39  ;;  %v1726_v6 = vrot.slane %v5428_v60, 5  ;;  %v1691_v8 = vrot.slane %v5266_v17, 5  ;;  %v1690_v32 = vrot.slane %v1688_v46, 4  ;;  %v4616_v60 = vld [vmem:[#allocation2 + $0x30] sm:$0xff]   ;;  %v2939_v59 = vld [vmem:[#allocation2 + $0x24] sm:$0xf] }
 0x26d   : > { %v5651_v48 = vsel %vm5432_vm7, %v4003_v55, %v1723_v37  ;;  %v1725_v12 = vrot.slane %v1723_v37, 4  ;;  %v3987_v36 = vcombine.low %v5420_v0, %v5426_v42  ;;  %v3202_v10 = vsel %vm1394_vm14, %v5490_v29, 0  ;;  %v5684_v39 = vld [vmem:[#allocation2 + $0x28] sm:$0xf]  ;;  %v1666_v55 = vld [vmem:[#allocation2 + $0x54] sm:$0xe] }
 0x26e   : > { %v3988_v17 = vcombine.low %v5443_v1, %v5451_v51  ;;  %v1692_v0 = vsel %vm5432_vm7, %v1690_v32, %v1691_v8  ;;  %v2961_v42 = vshrl.u32 %v2936_v9, 16  ;;  %v2964_v26 = vshll.u32 %v2936_v9, 16  ;;  %v4619_v9 = vld [vmem:[#allocation2 + $0x48] sm:$0xff]  }
 0x26f   : > { %v5665_v33 = vsel %vm5432_vm7, %v1725_v12, %v1726_v6  ;;  %v2970_v1 = vshll.u32 %v5655_v5, 16  ;;  %v2974_v29 = vshrl.u32 %v5655_v5, 16  ;;  %v4004_v24 = vrot.slane %v1665_v19, 9 }
 0x270   : > { %4363 = vmatmul.mubr.msk.bf16.gmra.mrb[12].mxu0 %vm1369_vm3, %v4069_v52  ;;  %v1733_v58 = vrot.slane %v5460_v18, 5  ;;  %v2963_v41 = vrot.slane %v2961_v42, 4  ;;  %v2942_v18 = vld [vmem:[#allocation2 + $0x30] sm:$0xf]  ;;  %v2966_v37 = vrot.slane %v2964_v26, 5  ;;  %v2985_v12 = vshrl.u32 %v2939_v59, 16 }
 0x271   : > { %4283 = vmatmul.mubr.msk.bf16.gmra.mrb[4].mxu1 %vm1369_vm3, %v3985_v43  ;;  %4368 = vmatprep.mubr.msk.bf16.mxu0 %vm1369_vm3, %v4612_v57  ;;  %v1689_v43 = vsel %vm5432_vm7, %v3998_v3, %v1688_v46  ;;  %v1730_v57 = vrot.slane %v5451_v51, 5  ;;  %v2258_v46 = vshll.u32 %v5532_v44, 16  ;;  %v3989_v51 = vcombine.low %v5479_v14, %v5481_v15  ;;  %v4618_v3 = vld [vmem:[#allocation2 + $0x3c] sm:$0xff]   ;;  %v2948_v52 = vld [vmem:[#allocation2 + $0x48] sm:$0xf] }
 0x272   : > { %4286 = vmatprep.mubr.msk.bf16.mxu1 %vm1369_vm3, %v3986_v62  ;;  %v4006_v63 = vcombine.low %v1689_v43, %v1692_v0  ;;  %v5695_v6 = vrot.slane %v2970_v1, 5  ;;  %v2976_v8 = vrot.slane %v2974_v29, 4  ;;  %v5703_v14 = vld [vmem:[#allocation2 + $0x20] sm:$0x1]  ;;  %v2994_v19 = vshll.u32 %v5684_v39, 16 }
 0x273   : > { %v5688_v62 = vsel %vm5432_vm7, %v4004_v24, %v1730_v57  ;;  %v1732_v23 = vrot.slane %v1730_v57, 4  ;;  %v3012_v43 = vshll.u32 %v2942_v18, 16  ;;  %v4005_v0 = vrot.slane %v1666_v55, 9  ;;  %v5724_v55 = vld [vmem:[#allocation2 + $0x2c] sm:$0x1] }
 0x274   : > { %v1737_v1 = vrot.slane %v5481_v15, 5  ;;  %v1740_v29 = vrot.slane %v5496_v49, 5  ;;  %v2262_v24 = vshrl.u32 %v5532_v44, 16  ;;  %v2967_v57 = vor.u32 %v2966_v37, %v2963_v41  ;;  %v4620_v44 = vld [vmem:[#allocation2 + $0x54] sm:$0xff]  }
 0x275   : > { %v5699_v32 = vsel %vm5432_vm7, %v1732_v23, %v1733_v58  ;;  %v2977_v58 = vor.u32 %v2976_v8, %v5695_v6  ;;  %v2987_v23 = vrot.slane %v2985_v12, 4  ;;  %v5726_v41 = vrot.slane %v2994_v19, 5  ;;  %v5730_v12 = vld [vmem:[#allocation2 + $0x38] sm:$0x1] }
 0x276   : > { %v5721_v15 = vsel %vm5432_vm7, %v4005_v0, %v1737_v1  ;;  %v1739_v49 = vrot.slane %v1737_v1, 4  ;;  %v3014_v8 = vrot.slane %v3012_v43, 5  ;;  %vm3666_vm8 = vcmask 31744  }
 0x277   : > { %v2978_v43 = vrot.slane %v2977_v58, 4 }
 0x278   : > { %4369 = vmatmul.mubr.msk.bf16.vlgmr.msra.gmra.mrb[0].mxu0 %vm1369_vm3, %v4614_v31  ;;  %v5701_v31 = vld [vmem:[#allocation2 + $0x34] sm:$0xf]  ;;  %v5736_v1 = vsel %vm5432_vm7, %v1739_v49, %v1740_v29  ;;  %v5749_v49 = vld [vmem:[#allocation2 + $0x4c] sm:$0xf] }
 0x279   : > { %4287 = vmatmul.mubr.msk.bf16.gmra.mrb[8].mxu1 %vm1369_vm3, %v3987_v36  ;;  %4385 = vmatpush3.bf16.msra.mxu0 %v3202_v10  ;;  %v2988_v36 = vshll.u32 %v2939_v59, 16  ;;  %v3018_v42 = vshll.u32 %v5701_v31, 16  ;;  %v3022_v26 = vshrl.u32 %v5701_v31, 16  ;;  %v2980_v59 = vshll.u32 %v5703_v14, 16 }
 0x27a   : > { %4290 = vmatprep.mubr.msk.bf16.mxu1 %vm1369_vm3, %v3988_v17  ;;  %4372 = vmatprep.mubr.msk.bf16.mxu0 %vm1369_vm3, %v4616_v60  ;;  %v2998_v17 = vshrl.u32 %v5684_v39, 16  ;;  %v3009_v60 = vshrl.u32 %v2942_v18, 16  ;;  %v2968_v10 = vrot.slane %v2967_v57, 4  ;;  %v3028_v57 = vshll.u32 %v5730_v12, 16 }
 0x27b   : > { %4559 = vmatprep.subr.msk.bf16.mxu0 %vm1394_vm14, %v5677_v34  ;;  %v2990_v18 = vrot.slane %v2988_v36, 5  ;;  %v5732_v36 = vrot.slane %v3018_v42, 5  ;;  %v3024_v0 = vrot.slane %v3022_v26, 4  ;;  %v2982_v42 = vrot.slane %v2980_v59, 5 }
 0x27c   : > { %v3011_v37 = vrot.slane %v3009_v60, 4  ;;  %v5742_v60 = vld [vmem:[#allocation2 + $0x40] sm:$0xf]  ;;  %v3004_v26 = vshll.u32 %v5724_v55, 16  ;;  %v3057_v59 = vshrl.u32 %v2948_v52, 16 }
 0x27d   : > { %v2991_v28 = vor.u32 %v2990_v18, %v2987_v23  ;;  %v3025_v19 = vor.u32 %v3024_v0, %v5732_v36  ;;  %v3042_v45 = vshll.u32 %v5742_v60, 16  ;;  %v3046_v58 = vshrl.u32 %v5742_v60, 16 }
 0x27e   : > { %v3060_v23 = vshll.u32 %v2948_v52, 16  ;;  %v6101_v18 = vcombine.low %v5590_v13, %v5595_v16  ;;  %v6102_v52 = vcombine.low %v5609_v21, %v5622_v35  ;;  %v4622_v13 = vld [vmem:[#allocation2 + $0x6c] sm:$0xff]   ;;  %v5779_v21 = vld [vmem:[#allocation2 + $0x44] sm:$0x1] }
 0x27f   : > { %v2992_v16 = vrot.slane %v2991_v28, 4  ;;  %v3048_v35 = vrot.slane %v3046_v58, 4  ;;  %v3059_v28 = vrot.slane %v3057_v59, 4  ;;  %v2954_v59 = vld [vmem:[#allocation2 + $0x60] sm:$0xf] }
 0x280   : > { %4373 = vmatmul.mubr.msk.bf16.gmra.mrb[4].mxu0 %vm1369_vm3, %v4618_v3  ;;  %v3000_v3 = vrot.slane %v2998_v17, 4  ;;  %v2945_v17 = vld [vmem:[#allocation2 + $0x3c] sm:$0xf] }
 0x281   : > { %4291 = vmatmul.mubr.msk.bf16.gmra.mrb[12].mxu1 %vm1369_vm3, %v3989_v51  ;;  %4376 = vmatprep.mubr.msk.bf16.mxu0 %vm1369_vm3, %v4619_v9  ;;  %v5728_v51 = vrot.slane %v2258_v46, 5  ;;  %v4621_v9 = vld [vmem:[#allocation2 + $0x60] sm:$0xff]   ;;  %v1989_v46 = vsel %vm1394_vm14, %v5580_v27, 0  ;;  %v3033_v2 = vshrl.u32 %v2945_v17, 16  ;;  %v3036_v4 = vshll.u32 %v2945_v17, 16 }
 0x282   : > { %4296 = vmatprep.mubr.msk.bf16.mxu1 %vm1369_vm3, %v4006_v63  ;;  %v5738_v63 = vrot.slane %v2262_v24, 4  ;;  %v3001_v29 = vor.u32 %v3000_v3, %v5726_v41  ;;  %v3015_v24 = vor.u32 %v3014_v8, %v3011_v37  ;;  %v2973_v27 = vsel %vm5295_vm2, %v2968_v10, %v5695_v6  ;;  %v2951_v6 = vld [vmem:[#allocation2 + $0x54] sm:$0xf] }
 0x283   : > { %v2983_v3 = vsel %vm5295_vm2, %v2978_v43, %v2982_v42  ;;  %v3006_v37 = vrot.slane %v3004_v26, 5  ;;  %v3070_v8 = vshrl.u32 %v5749_v49, 16  ;;  %v3026_v17 = vrot.slane %v3025_v19, 4  ;;  %v4631_v26 = vld [vmem:[%s6073_s2 + $0x10] sm:$0xf] }
 0x284   : > { %v3002_v10 = vrot.slane %v3001_v29, 4  ;;  %v3016_v0 = vrot.slane %v3015_v24, 4  ;;  %v3038_v43 = vrot.slane %v3036_v4, 5  ;;  %v5771_v42 = vrot.slane %v3042_v45, 5  ;;  %v5781_v19 = vld [vmem:[#allocation2 + $0x50] sm:$0x1] }
 0x285   : > { %v3062_v29 = vrot.slane %v3060_v23, 5  ;;  %v3081_v24 = vshrl.u32 %v2951_v6, 16  ;;  %v3072_v45 = vrot.slane %v3070_v8, 4  ;;  %v5798_v8 = vld [vmem:[#allocation2 + $0x64] sm:$0xf] }
 0x288   : > { %4377 = vmatmul.mubr.msk.bf16.gmra.mrb[8].mxu0 %vm1369_vm3, %v4620_v44  ;;  %v3066_v44 = vshll.u32 %v5749_v49, 16 }
 0x289   : > { %4297 = vmatmul.mubr.msk.bf16.vlgmr.msra.gmra.mrb[0].mxu1 %vm1369_vm3, %v6101_v18  ;;  %4380 = vmatprep.mubr.msk.bf16.mxu0 %vm1369_vm3, %v4621_v9  ;;  %v3030_v9 = vrot.slane %v3028_v57, 5  ;;  %v3035_v18 = vrot.slane %v3033_v2, 4  ;;  %v4094_v57 = vcombine.low %v2973_v27, %v2983_v3  ;;  %v3084_v2 = vshll.u32 %v2951_v6, 16 }
 0x28a   : > { %4313 = vmatpush3.bf16.msra.mxu1 %v1989_v46  ;;  %4300 = vmatprep.mubr.msk.bf16.mxu1 %vm1369_vm3, %v6102_v52  ;;  %v5777_v46 = vld [vmem:[#allocation2 + $0x58] sm:$0xf]  ;;  %v5783_v4 = vrot.slane %v3066_v44, 5  ;;  %v2997_v52 = vsel %vm5295_vm2, %v2992_v16, %v5726_v41  ;;  %v3021_v27 = vsel %vm5295_vm2, %v3016_v0, %v5732_v36  ;;  %v3052_v44 = vshll.u32 %v5779_v21, 16 }
 0x28b   : > { %4555 = vmatprep.subr.msk.bf16.mxu1 %vm1394_vm14, %v4631_v26  ;;  %v3007_v26 = vsel %vm5295_vm2, %v3002_v10, %v3006_v37  ;;  %v3090_v54 = vshll.u32 %v5777_v46, 16  ;;  %v3094_v58 = vshrl.u32 %v5777_v46, 16  ;;  %v3031_v23 = vsel %vm5295_vm2, %v3026_v17, %v3030_v9 }
 0x28c   : > { %v3039_v3 = vor.u32 %v3038_v43, %v3035_v18  ;;  %v3049_v41 = vor.u32 %v3048_v35, %v5771_v42  ;;  %v3063_v37 = vor.u32 %v3062_v29, %v3059_v28  ;;  %v3076_v6 = vshll.u32 %v5781_v19, 16  ;;  %v5813_v18 = vld [vmem:[#allocation2 + $0x5c] sm:$0x1] }
 0x28d   : > { %v3083_v16 = vrot.slane %v3081_v24, 4  ;;  %v6103_v10 = vcombine.low %v5613_v47, %v5628_v53  ;;  %v3073_v36 = vor.u32 %v3072_v45, %v5783_v4  ;;  %v3086_v0 = vrot.slane %v3084_v2, 5 }
 0x28e   : > { %v3105_v9 = vshrl.u32 %v2954_v59, 16  ;;  %v3108_v17 = vshll.u32 %v2954_v59, 16  ;;  %v5815_v43 = vrot.slane %v3090_v54, 5  ;;  %v3096_v35 = vrot.slane %v3094_v58, 4  ;;  %v2957_v59 = vld [vmem:[#allocation2 + $0x6c] sm:$0xf] }
 0x28f   : > { %v3114_v47 = vshll.u32 %v5798_v8, 16  ;;  %v3118_v53 = vshrl.u32 %v5798_v8, 16  ;;  %v4095_v28 = vcombine.low %v2997_v52, %v3007_v26  ;;  %v3455_v29 = vsel %vm1394_vm14, %v5677_v34, 0 }
 0x290   : > { %4381 = vmatmul.mubr.msk.bf16.gmra.mrb[12].mxu0 %vm1369_vm3, %v4622_v13  ;;  %v6104_v13 = vcombine.low %v5632_v38, %v5641_v11  ;;  %v4096_v24 = vcombine.low %v3021_v27, %v3031_v23  ;;  %v3040_v45 = vrot.slane %v3039_v3, 4  ;;  %v3050_v2 = vrot.slane %v3049_v41, 4  ;;  %v5830_v3 = vld [vmem:[#allocation2 + $0x68] sm:$0x1] }
 0x291   : > { %4301 = vmatmul.mubr.msk.bf16.gmra.mrb[4].mxu1 %vm1369_vm3, %v6103_v10  ;;  %4386 = vmatprep.mubr.msk.bf16.mxu0 %vm1369_vm3, %v4094_v57  ;;  %v3054_v57 = vrot.slane %v3052_v44, 5  ;;  %v3064_v38 = vrot.slane %v3063_v37, 4  ;;  %v3078_v11 = vrot.slane %v3076_v6, 5  ;;  %v3074_v10 = vrot.slane %v3073_v36, 4 }
 0x292   : > { %4304 = vmatprep.mubr.msk.bf16.mxu1 %vm1369_vm3, %v6104_v13  ;;  %v3100_v54 = vshll.u32 %v5813_v18, 16  ;;  %v3107_v13 = vrot.slane %v3105_v9, 4  ;;  %v3110_v58 = vrot.slane %v3108_v17, 5  ;;  %v3087_v40 = vor.u32 %v3086_v0, %v3083_v16 }
 0x293   : > { %v3097_v52 = vor.u32 %v3096_v35, %v5815_v43  ;;  %v5825_v26 = vrot.slane %v3114_v47, 5  ;;  %v3120_v34 = vrot.slane %v3118_v53, 4  ;;  %v2265_v27 = vor.u32 %v5738_v63, %v5728_v51 }
 0x294   : > { %v2268_v23 = vshll.u32 %v5534_v7, 16  ;;  %v3129_v44 = vshrl.u32 %v2957_v59, 16  ;;  %v3132_v41 = vshll.u32 %v2957_v59, 16  ;;  %v3045_v37 = vsel %vm5295_vm2, %v3040_v45, %v5771_v42 }
 0x295   : > { %v3055_v6 = vsel %vm5295_vm2, %v3050_v2, %v3054_v57  ;;  %v3138_v16 = vshll.u32 %v5822_v22, 16  ;;  %v3142_v36 = vshrl.u32 %v5822_v22, 16  ;;  %v6105_v7 = vcombine.low %v5651_v48, %v5665_v33 }
 0x296   : > { %v3069_v63 = vsel %vm5295_vm2, %v3064_v38, %v5783_v4  ;;  %v3079_v42 = vsel %vm5295_vm2, %v3074_v10, %v3078_v11  ;;  %v3102_v0 = vrot.slane %v3100_v54, 5  ;;  %v3111_v9 = vor.u32 %v3110_v58, %v3107_v13  ;;  %v4623_v11 = vld [vmem:[#allocation2 + $0xc] sm:$0xff]   ;;  %v2119_v58 = vld [vmem:[#allocation2 + $0x48] sm:$0xf] }
 0x297   : > { %v6106_v17 = vcombine.low %v5688_v62, %v5699_v32  ;;  %v3088_v48 = vrot.slane %v3087_v40, 4  ;;  %v3098_v33 = vrot.slane %v3097_v52, 4  ;;  %v3121_v35 = vor.u32 %v3120_v34, %v5825_v26  ;;  %v3317_v34 = vld [vmem:[#allocation2 + $0x18] sm:$0xe] }
 0x298   : > { %4387 = vmatmul.mubr.msk.bf16.vlgmr.msra.gmra.mrb[0].mxu0 %vm1369_vm3, %v4095_v28  ;;  %v3124_v47 = vshll.u32 %v5830_v3, 16  ;;  %v3131_v53 = vrot.slane %v3129_v44, 4  ;;  %v3134_v4 = vrot.slane %v3132_v41, 5  ;;  %v4097_v28 = vcombine.low %v3045_v37, %v3055_v6 }
 0x299   : > { %4305 = vmatmul.mubr.msk.bf16.gmra.mrb[8].mxu1 %vm1369_vm3, %v6105_v7  ;;  %4403 = vmatpush3.bf16.msra.mxu0 %v3455_v29  ;;  %v5856_v29 = vld [vmem:[#allocation2 + $0x74] sm:$0x1]  ;;  %v5858_v57 = vrot.slane %v3138_v16, 5  ;;  %v3144_v45 = vrot.slane %v3142_v36, 4  ;;  %v2266_v2 = vrot.slane %v2265_v27, 4  ;;  %v2270_v62 = vrot.slane %v2268_v23, 5 }
 0x29a   : > { %4308 = vmatprep.mubr.msk.bf16.mxu1 %vm1369_vm3, %v6106_v17  ;;  %4390 = vmatprep.mubr.msk.bf16.mxu0 %vm1369_vm3, %v4096_v24  ;;  %v4098_v32 = vcombine.low %v3069_v63, %v3079_v42  ;;  %v3112_v38 = vrot.slane %v3111_v9, 4  ;;  %v3093_v40 = vsel %vm5295_vm2, %v3088_v48, %v5815_v43  ;;  %v3103_v24 = vsel %vm5295_vm2, %v3098_v33, %v3102_v0  ;;  %v4625_v17 = vld [vmem:[#allocation2 + $0x24] sm:$0xff]   ;;  %v2116_v48 = vld [vmem:[#allocation2 + $0x3c] sm:$0xf] }
 0x29b   : > { %v3122_v59 = vrot.slane %v3121_v35, 4  ;;  %v3126_v10 = vrot.slane %v3124_v47, 5  ;;  %v3135_v54 = vor.u32 %v3134_v4, %v3131_v53  ;;  %v3148_v13 = vshll.u32 %v5856_v29, 16  ;;  %v3318_v53 = vld [vmem:[#allocation2 + $0x24] sm:$0xe] }
 0x29c   : > { %v3145_v52 = vor.u32 %v3144_v45, %v5858_v57  ;;  %v3351_v27 = vrot.slane %v5655_v5, 5  ;;  %v6107_v23 = vcombine.low %v5721_v15, %v5736_v1  ;;  %v4099_v43 = vcombine.low %v3093_v40, %v3103_v24  ;;  %v3319_v45 = vld [vmem:[#allocation2 + $0x30] sm:$0xe] }
 0x29d   : > { %v3117_v44 = vsel %vm5295_vm2, %v3112_v38, %v5825_v26  ;;  %v3127_v41 = vsel %vm5295_vm2, %v3122_v59, %v3126_v10  ;;  %v2249_v37 = vshrl.u32 %v2119_v58, 16  ;;  %v2252_v6 = vshll.u32 %v2119_v58, 16  ;;  %v4624_v26 = vld [vmem:[#allocation2 + $0x18] sm:$0xff]  }
 0x29e   : > { %v2271_v5 = vsel %vm5295_vm2, %v2266_v2, %v2270_v62  ;;  %v3136_v15 = vrot.slane %v3135_v54, 4  ;;  %v3150_v1 = vrot.slane %v3148_v13, 5  ;;  %v4110_v16 = vrot.slane %v3317_v34, 9 }
 0x29f   : > { %v3354_v36 = vrot.slane %v5703_v14, 5  ;;  %v3146_v7 = vrot.slane %v3145_v52, 4  ;;  %v3353_v63 = vrot.slane %v3351_v27, 4  ;;  %v2251_v42 = vrot.slane %v2249_v37, 4  ;;  %v4626_v52 = vld [vmem:[#allocation2 + $0x30] sm:$0xff]  }
 0x2a0   : > { %4391 = vmatmul.mubr.msk.bf16.gmra.mrb[4].mxu0 %vm1369_vm3, %v4097_v28  ;;  %v2254_v0 = vrot.slane %v2252_v6, 5  ;;  %v4100_v9 = vcombine.low %v3117_v44, %v3127_v41  ;;  %v3141_v35 = vsel %vm5295_vm2, %v3136_v15, %v5858_v57  ;;  %v3352_v47 = vsel %vm5432_vm7, %v4110_v16, %v3351_v27  ;;  %v3320_v44 = vld [vmem:[#allocation2 + $0x3c] sm:$0xe]  ;;  %v2122_v6 = vld [vmem:[#allocation2 + $0x54] sm:$0xf] }
 0x2a1   : > { %4309 = vmatmul.mubr.msk.bf16.gmra.mrb[12].mxu1 %vm1369_vm3, %v6107_v23  ;;  %4394 = vmatprep.mubr.msk.bf16.mxu0 %vm1369_vm3, %v4098_v32  ;;  %v3358_v4 = vrot.slane %v5684_v39, 5  ;;  %v3151_v14 = vsel %vm5295_vm2, %v3146_v7, %v3150_v1  ;;  %v3355_v28 = vsel %vm5432_vm7, %v3353_v63, %v3354_v36  ;;  %v3365_v2 = vrot.slane %v5701_v31, 5  ;;  %v3321_v16 = vld [vmem:[#allocation2 + $0x48] sm:$0xe] }
 0x2a2   : > { %4314 = vmatprep.mubr.msk.bf16.mxu1 %vm1369_vm3, %v4623_v11  ;;  %v2255_v33 = vor.u32 %v2254_v0, %v2251_v42  ;;  %v2225_v57 = vshrl.u32 %v2116_v48, 16  ;;  %v2228_v32 = vshll.u32 %v2116_v48, 16  ;;  %v2234_v39 = vshll.u32 %v5503_v61, 16 }
 0x2a3   : > { %v2238_v38 = vshrl.u32 %v5503_v61, 16  ;;  %v4111_v11 = vrot.slane %v3318_v53, 9  ;;  %v3360_v40 = vrot.slane %v3358_v4, 4  ;;  %v3361_v24 = vrot.slane %v5724_v55, 5 }
 0x2a4   : > { %v2256_v62 = vrot.slane %v2255_v33, 4  ;;  %v4112_v59 = vrot.slane %v3319_v45, 9  ;;  %v4101_v54 = vcombine.low %v3141_v35, %v3151_v14  ;;  %v4118_v13 = vcombine.low %v3352_v47, %v3355_v28  ;;  %v4628_v35 = vld [vmem:[#allocation2 + $0x48] sm:$0xff]   ;;  %v4629_v14 = vld [vmem:[#allocation2 + $0x54] sm:$0xff]  }
 0x2a5   : > { %v3367_v58 = vrot.slane %v3365_v2, 4  ;;  %v3368_v61 = vrot.slane %v5730_v12, 5  ;;  %v2230_v34 = vrot.slane %v2228_v32, 5  ;;  %v5908_v27 = vrot.slane %v2234_v39, 5 }
 0x2a6   : > { %v2261_v31 = vsel %vm5295_vm2, %v2256_v62, %v5728_v51  ;;  %v2240_v23 = vrot.slane %v2238_v38, 4  ;;  %v3359_v51 = vsel %vm5432_vm7, %v4111_v11, %v3358_v4  ;;  %v3362_v55 = vsel %vm5432_vm7, %v3360_v40, %v3361_v24  ;;  %v2125_v62 = vld [vmem:[#allocation2 + $0x60] sm:$0xf] }
 0x2a7   : > { %v5905_v10 = vcombine.low %v2261_v31, %v2271_v5  ;;  %v3366_v41 = vsel %vm5432_vm7, %v4112_v59, %v3365_v2  ;;  %v3372_v12 = vrot.slane %v5742_v60, 5  ;;  %v2244_v37 = vshll.u32 %v5516_v25, 16  ;;  %v3322_v31 = vld [vmem:[#allocation2 + $0x54] sm:$0xe] }
 0x2a8   : > { %4395 = vmatmul.mubr.msk.bf16.gmra.mrb[8].mxu0 %vm1369_vm3, %v4099_v43  ;;  %v4627_v43 = vld [vmem:[#allocation2 + $0x3c] sm:$0xff]   ;;  %v3369_v5 = vsel %vm5432_vm7, %v3367_v58, %v3368_v61  ;;  %v2241_v1 = vor.u32 %v2240_v23, %v5908_v27  ;;  %v3379_v36 = vrot.slane %v5749_v49, 5  ;;  %v4119_v7 = vcombine.low %v3359_v51, %v3362_v55 }
 0x2a9   : > { %4315 = vmatmul.mubr.msk.bf16.vlgmr.msra.gmra.mrb[0].mxu1 %vm1369_vm3, %v4624_v26  ;;  %4398 = vmatprep.mubr.msk.bf16.mxu0 %vm1369_vm3, %v4100_v9  ;;  %v4113_v60 = vrot.slane %v3320_v44, 9  ;;  %v3375_v25 = vrot.slane %v5779_v21, 5  ;;  %v2273_v63 = vshrl.u32 %v2122_v6, 16  ;;  %v2276_v42 = vshll.u32 %v2122_v6, 16 }
 0x2aa   : > { %4421 = vmatpush3.bf16.msra.mxu1 %v5259_v56  ;;  %4318 = vmatprep.mubr.msk.bf16.mxu1 %vm1369_vm3, %v4625_v17  ;;  %v2227_v56 = vrot.slane %v2225_v57, 4  ;;  %v2282_v0 = vshll.u32 %v5542_v50, 16  ;;  %v2286_v26 = vshrl.u32 %v5542_v50, 16  ;;  %v4120_v9 = vcombine.low %v3366_v41, %v3369_v5 }
 0x2ab   : > { %v3374_v17 = vrot.slane %v3372_v12, 4  ;;  %v2246_v48 = vrot.slane %v2244_v37, 5  ;;  %v4114_v33 = vrot.slane %v3321_v16, 9  ;;  %v2242_v53 = vrot.slane %v2241_v1, 4 }
 0x2ac   : > { %v2231_v15 = vor.u32 %v2230_v34, %v2227_v56  ;;  %v3381_v49 = vrot.slane %v3379_v36, 4  ;;  %v3382_v4 = vrot.slane %v5781_v19, 5  ;;  %v2275_v28 = vrot.slane %v2273_v63, 4  ;;  %v6109_v34 = vld [vmem:[#allocation3_spill] sm:$0xff] }
 0x2ad   : > { %v2278_v45 = vrot.slane %v2276_v42, 5  ;;  %v2284_v21 = vrot.slane %v2282_v0, 5  ;;  %v2288_v2 = vrot.slane %v2286_v26, 4  ;;  %v3373_v50 = vsel %vm5432_vm7, %v4113_v60, %v3372_v12  ;;  %v6110_v26 = vld [vmem:[#allocation5_spill] sm:$0xff] }
 0x2ae   : > { %v2232_v47 = vrot.slane %v2231_v15, 4  ;;  %v3376_v57 = vsel %vm5432_vm7, %v3374_v17, %v3375_v25  ;;  %v3380_v32 = vsel %vm5432_vm7, %v4114_v33, %v3379_v36  ;;  %v3386_v39 = vrot.slane %v5777_v46, 5  ;;  %v3323_v46 = vld [vmem:[#allocation2 + $0x60] sm:$0xe]  ;;  %v3324_v17 = vld [vmem:[#allocation2 + $0x6c] sm:$0xe] }
 0x2af   : > { %v2247_v38 = vsel %vm5295_vm2, %v2242_v53, %v2246_v48  ;;  %v3383_v11 = vsel %vm5432_vm7, %v3381_v49, %v3382_v4  ;;  %v3393_v40 = vrot.slane %v5798_v8, 5  ;;  %v2297_v24 = vshrl.u32 %v2125_v62, 16  ;;  %v4630_v8 = vld [vmem:[#allocation2 + $0x60] sm:$0xff]  }
 0x2b0   : > { %4399 = vmatmul.mubr.msk.bf16.gmra.mrb[12].mxu0 %vm1369_vm3, %v4101_v54  ;;  %v2237_v19 = vsel %vm5295_vm2, %v2232_v47, %v5908_v27  ;;  %v2300_v59 = vshll.u32 %v2125_v62, 16  ;;  %v6108_v54 = vld [vmem:[#allocation4_spill] sm:$0xff]  ;;  %v4121_v61 = vcombine.low %v3373_v50, %v3376_v57  ;;  %v2289_v56 = vor.u32 %v2288_v2, %v2284_v21 }
 0x2b1   : > { %4319 = vmatmul.mubr.msk.bf16.gmra.mrb[4].mxu1 %vm1369_vm3, %v4626_v52  ;;  %4404 = vmatprep.mubr.msk.bf16.mxu0 %vm1369_vm3, %v4118_v13  ;;  %v2306_v13 = vshll.u32 %v6108_v54, 16  ;;  %v2310_v58 = vshrl.u32 %v6108_v54, 16  ;;  %v2279_v52 = vor.u32 %v2278_v45, %v2275_v28  ;;  %v2292_v27 = vshll.u32 %v6109_v34, 16 }
 0x2b2   : > { %4322 = vmatprep.mubr.msk.bf16.mxu1 %vm1369_vm3, %v4627_v43  ;;  %v4042_v23 = vcombine.low %v2237_v19, %v2247_v38  ;;  %v4122_v43 = vcombine.low %v3380_v32, %v3383_v11  ;;  %v4115_v51 = vrot.slane %v3322_v31, 9  ;;  %v3389_v55 = vrot.slane %v5813_v18, 5 }
 0x2b3   : > { %v3388_v44 = vrot.slane %v3386_v39, 4  ;;  %v4116_v41 = vrot.slane %v3323_v46, 9  ;;  %v3395_v12 = vrot.slane %v3393_v40, 4  ;;  %v3396_v37 = vrot.slane %v5830_v3, 5 }
 0x2b4   : > { %v2299_v6 = vrot.slane %v2297_v24, 4  ;;  %v2302_v5 = vrot.slane %v2300_v59, 5  ;;  %v2308_v15 = vrot.slane %v2306_v13, 5  ;;  %v2312_v1 = vrot.slane %v2310_v58, 4 }
 0x2b5   : > { %v2280_v16 = vrot.slane %v2279_v52, 4  ;;  %v2290_v36 = vrot.slane %v2289_v56, 4  ;;  %v3387_v18 = vsel %vm5432_vm7, %v4115_v51, %v3386_v39  ;;  %v3390_v60 = vsel %vm5432_vm7, %v3388_v44, %v3389_v55 }
 0x2b6   : > { %v3394_v3 = vsel %vm5432_vm7, %v4116_v41, %v3393_v40  ;;  %v3400_v25 = vrot.slane %v5822_v22, 5  ;;  %v3397_v63 = vsel %vm5432_vm7, %v3395_v12, %v3396_v37  ;;  %v2303_v42 = vor.u32 %v2302_v5, %v2299_v6 }
 0x2b7   : > { %v2313_v0 = vor.u32 %v2312_v1, %v2308_v15  ;;  %v2285_v48 = vsel %vm5295_vm2, %v2280_v16, %v2284_v21  ;;  %v4124_v47 = vcombine.low %v3394_v3, %v3397_v63  ;;  %v4117_v53 = vrot.slane %v3324_v17, 9 }
 0x2b8   : > { %4405 = vmatmul.mubr.msk.bf16.vlgmr.msra.gmra.mrb[0].mxu0 %vm1369_vm3, %v4119_v7  ;;  %v2294_v7 = vrot.slane %v2292_v27, 5  ;;  %v3402_v22 = vrot.slane %v3400_v25, 4  ;;  %v3403_v49 = vrot.slane %v5856_v29, 5 }
 0x2b9   : > { %4323 = vmatmul.mubr.msk.bf16.gmra.mrb[8].mxu1 %vm1369_vm3, %v4628_v35  ;;  %4408 = vmatprep.mubr.msk.bf16.mxu0 %vm1369_vm3, %v4120_v9  ;;  %v2316_v9 = vshll.u32 %v6110_v26, 16  ;;  %v4123_v35 = vcombine.low %v3387_v18, %v3390_v60  ;;  %v2314_v28 = vrot.slane %v2313_v0, 4  ;;  %v3401_v21 = vsel %vm5432_vm7, %v4117_v53, %v3400_v25 }
 0x2ba   : > { %4326 = vmatprep.mubr.msk.bf16.mxu1 %vm1369_vm3, %v4629_v14  ;;  %v2295_v33 = vsel %vm5295_vm2, %v2290_v36, %v2294_v7  ;;  %v2304_v14 = vrot.slane %v2303_v42, 4  ;;  %v3404_v2 = vsel %vm5432_vm7, %v3402_v22, %v3403_v49 }
 0x2bb   : > { %v4044_v4 = vcombine.low %v2285_v48, %v2295_v33  ;;  %v2318_v45 = vrot.slane %v2316_v9, 5  ;;  %v4125_v50 = vcombine.low %v3401_v21, %v3404_v2 }
 0x2bc   : > { %v2309_v29 = vsel %vm5295_vm2, %v2304_v14, %v2308_v15 }
 0x2bd   : > { %v2319_v62 = vsel %vm5295_vm2, %v2314_v28, %v2318_v45 }
 0x2be   : > { %v4045_v57 = vcombine.low %v2309_v29, %v2319_v62 }
 0x2c0   : > { %4409 = vmatmul.mubr.msk.bf16.gmra.mrb[4].mxu0 %vm1369_vm3, %v4121_v61 }
 0x2c1   : > { %4327 = vmatmul.mubr.msk.bf16.gmra.mrb[12].mxu1 %vm1369_vm3, %v4630_v8  ;;  %4412 = vmatprep.mubr.msk.bf16.mxu0 %vm1369_vm3, %v4122_v43 }
 0x2c2   : > { %4340 = vmatprep.mubr.msk.bf16.mxu1 %vm1369_vm3, %v4042_v23 }
 0x2c8   : > { %4413 = vmatmul.mubr.msk.bf16.gmra.mrb[8].mxu0 %vm1369_vm3, %v4123_v35 }
 0x2c9   : > { %4341 = vmatmul.mubr.msk.bf16.vlgmr.msra.gmra.mrb[8].mxu1 %vm1369_vm3, %v5905_v10  ;;  %4416 = vmatprep.mubr.msk.bf16.mxu0 %vm1369_vm3, %v4124_v47 }
 0x2ca   : > { %4344 = vmatprep.mubr.msk.bf16.mxu1 %vm1369_vm3, %v4044_v4 }
 0x2d0   : > { %4417 = vmatmul.mubr.msk.bf16.gmra.mrb[12].mxu0 %vm1369_vm3, %v4125_v50 }
 0x2d1   : > { %4345 = vmatmul.mubr.msk.bf16.gmra.mrb[12].mxu1 %vm1369_vm3, %v4045_v57 }
 0x37c   : > { %v4316_v10 = vpop.f32.mrb[0].mxu1 }
 0x37d   : > { %v2025_v32 = vpop.f32.mrb[1].mxu1 }
 0x37e   : > { %v4317_v39 = vpop.f32.mrb[2].mxu1 }
 0x37f   : > { %v2028_v20 = vpop.f32.mrb[3].mxu1 }
 0x384   : > { %v4320_v19 = vpop.f32.mrb[4].mxu1 }
 0x385   : > { %v2041_v38 = vpop.f32.mrb[5].mxu1 }
 0x386   : > { %v4321_v11 = vpop.f32.mrb[6].mxu1 }
 0x387   : > { %v2044_v31 = vpop.f32.mrb[7].mxu1 }
 0x38b   : > { %v4406_v40 = vpop.f32.mrb[0].mxu0 }
 0x38c   : > { %v4422_v46 = vadd.f32 %v4406_v40, %v4316_v10  ;;  %v3491_v30 = vpop.f32.mrb[1].mxu0 }
 0x38d   : > { %v4423_v24 = vadd.f32 %v3491_v30, %v2025_v32  ;;  %v4407_v59 = vpop.f32.mrb[2].mxu0 }
 0x38e   : > { %v4163_v54 = vpack.c.bf16 %v4422_v46, %v4422_v46  ;;  %v4424_v13 = vadd.f32 %v4407_v59, %v4317_v39  ;;  %v3494_v58 = vpop.f32.mrb[3].mxu0 }
 0x38f   : > { %v4161_v61 = vpack.c.bf16 %v4423_v24, %v4423_v24  ;;  %v4425_v52 = vadd.f32 %v3494_v58, %v2028_v20 }
 0x390   : > { %3636 = vst.msk [vmem:[%s4818_s14 + $0x8] sm:$0xf] %vm513_vm5, %v4163_v54  ;;  %v3571_v56 = vpack.c.bf16 %v4424_v13, %v4422_v46  ;;  %v4164_v34 = vpack.c.bf16 %v4424_v13, %v4424_v13 }
 0x391   : > { %3634 = vst.msk [vmem:[%s4818_s14] sm:$0xf] %vm513_vm5, %v4161_v61  ;;  %v3570_v27 = vpack.c.bf16 %v4425_v52, %v4423_v24  ;;  %v4162_v23 = vpack.c.bf16 %v4425_v52, %v4425_v52 }
 0x392   : > { %3637 = vst.msk [vmem:[%s4818_s14 + $0xc] sm:$0xf] %vm513_vm5, %v4164_v34  ;;  %v3652_v43 = vunpack.c.l.bf16 %v3571_v56  ;;  %v3653_v51 = vunpack.c.h.bf16 %v3571_v56 }
 0x393   : > { %3635 = vst.msk [vmem:[%s4818_s14 + $0x4] sm:$0xf] %vm513_vm5, %v4162_v23  ;;  %v3650_v55 = vunpack.c.l.bf16 %v3570_v27  ;;  %v3651_v8 = vunpack.c.h.bf16 %v3570_v27  ;;  %v4410_v44 = vpop.f32.mrb[4].mxu0 }
 0x394   : > { %v3670_v41 = vsel %vm3666_vm8, %v3652_v43, 0.0  ;;  %v3708_v12 = vmul.f32 %v3652_v43, %v3652_v43  ;;  %v3507_v37 = vpop.f32.mrb[5].mxu0  ;;  %v3672_v36 = vsel %vm3666_vm8, %v3653_v51, 0.0  ;;  %v3709_v7 = vmul.f32 %v3653_v51, %v3653_v51 }
 0x395   : > { %v3667_v6 = vsel %vm3666_vm8, %v3650_v55, 0.0  ;;  %v3668_v5 = vsel %vm3666_vm8, %v3651_v8, 0.0  ;;  %v3706_v15 = vmul.f32 %v3650_v55, %v3650_v55  ;;  %v3707_v1 = vmul.f32 %v3651_v8, %v3651_v8  ;;  %v4411_v16 = vpop.f32.mrb[6].mxu0 }
 0x396   : > { %v3669_v18 = vadd.f32 %v3668_v5, %v3667_v6  ;;  %v4426_v60 = vadd.f32 %v4410_v44, %v4320_v19  ;;  %v3510_v3 = vpop.f32.mrb[7].mxu0  ;;  %v4427_v42 = vadd.f32 %v3507_v37, %v2041_v38  ;;  %v4428_v0 = vadd.f32 %v4411_v16, %v4321_v11 }
 0x397   : > { %v3722_v25 = vsel %vm3666_vm8, %v3706_v15, 0.0  ;;  %v3723_v63 = vsel %vm3666_vm8, %v3707_v1, 0.0  ;;  %v4429_v48 = vadd.f32 %v3510_v3, %v2044_v31  ;;  %v3725_v33 = vsel %vm3666_vm8, %v3708_v12, 0.0 }
 0x398   : > { %v3671_v26 = vadd.f32 %v3670_v41, %v3669_v18  ;;  %v3724_v9 = vadd.f32 %v3723_v63, %v3722_v25  ;;  %v4167_v17 = vpack.c.bf16 %v4426_v60, %v4426_v60  ;;  %v4165_v35 = vpack.c.bf16 %v4427_v42, %v4427_v42 }
 0x399   : > { %v3573_v47 = vpack.c.bf16 %v4428_v0, %v4426_v60  ;;  %v4168_v53 = vpack.c.bf16 %v4428_v0, %v4428_v0  ;;  %v3572_v49 = vpack.c.bf16 %v4429_v48, %v4427_v42  ;;  %v4166_v4 = vpack.c.bf16 %v4429_v48, %v4429_v48 }
 0x39a   : > { %v3726_v22 = vadd.f32 %v3725_v33, %v3724_v9  ;;  %3640 = vst.msk [vmem:[%s4818_s14 + $0x18] sm:$0xf] %vm513_vm5, %v4167_v17  ;;  %v3673_v14 = vadd.f32 %v3672_v36, %v3671_v26  ;;  %v3727_v28 = vsel %vm3666_vm8, %v3709_v7, 0.0  ;;  %3638 = vst.msk [vmem:[%s4818_s14 + $0x10] sm:$0xf] %vm513_vm5, %v4165_v35 }
 0x39b   : > { %3641 = vst.msk [vmem:[%s4818_s14 + $0x1c] sm:$0xf] %vm513_vm5, %v4168_v53  ;;  %v3656_v45 = vunpack.c.l.bf16 %v3573_v47  ;;  %v3657_v21 = vunpack.c.h.bf16 %v3573_v47  ;;  %v4414_v2 = vpop.f32.mrb[8].mxu0  ;;  %3639 = vst.msk [vmem:[%s4818_s14 + $0x14] sm:$0xf] %vm513_vm5, %v4166_v4  ;;  %v3654_v29 = vunpack.c.l.bf16 %v3572_v49  ;;  %v3655_v62 = vunpack.c.h.bf16 %v3572_v49 }
 0x39c   : > { %v3728_v50 = vadd.f32 %v3727_v28, %v3726_v22  ;;  %v4342_v57 = vpop.f32.mrb[8].mxu1  ;;  %v3523_v10 = vpop.f32.mrb[9].mxu0 }
 0x39d   : > { %v2438_v32 = vpop.f32.mrb[9].mxu1  ;;  %v4415_v39 = vpop.f32.mrb[10].mxu0  ;;  %v3678_v20 = vsel %vm3666_vm8, %v3656_v45, 0.0  ;;  %v3674_v19 = vsel %vm3666_vm8, %v3654_v29, 0.0  ;;  %v3710_v38 = vmul.f32 %v3654_v29, %v3654_v29  ;;  %v3711_v11 = vmul.f32 %v3655_v62, %v3655_v62 }
 0x39e   : > { %v4343_v31 = vpop.f32.mrb[10].mxu1  ;;  %v3526_v40 = vpop.f32.mrb[11].mxu0  ;;  %v3712_v46 = vmul.f32 %v3656_v45, %v3656_v45  ;;  %v3713_v30 = vmul.f32 %v3657_v21, %v3657_v21  ;;  %v3675_v24 = vadd.f32 %v3674_v19, %v3673_v14  ;;  %v4430_v59 = vadd.f32 %v4414_v2, %v4342_v57 }
 0x39f   : > { %v2441_v54 = vpop.f32.mrb[11].mxu1  ;;  %v3676_v13 = vsel %vm3666_vm8, %v3655_v62, 0.0  ;;  %v3729_v58 = vsel %vm3666_vm8, %v3710_v38, 0.0  ;;  %v4431_v61 = vadd.f32 %v3523_v10, %v2438_v32  ;;  %v4432_v52 = vadd.f32 %v4415_v39, %v4343_v31 }
 0x3a0   : > { %v3677_v56 = vadd.f32 %v3676_v13, %v3675_v24  ;;  %v3730_v34 = vadd.f32 %v3729_v58, %v3728_v50  ;;  %v4171_v27 = vpack.c.bf16 %v4430_v59, %v4430_v59  ;;  %v4433_v23 = vadd.f32 %v3526_v40, %v2441_v54 }
 0x3a1   : > { %v3731_v43 = vsel %vm3666_vm8, %v3711_v11, 0.0  ;;  %v4169_v51 = vpack.c.bf16 %v4431_v61, %v4431_v61  ;;  %v3575_v55 = vpack.c.bf16 %v4432_v52, %v4430_v59  ;;  %v4172_v8 = vpack.c.bf16 %v4432_v52, %v4432_v52 }
 0x3a2   : > { %v3679_v44 = vadd.f32 %v3678_v20, %v3677_v56  ;;  %v3732_v41 = vadd.f32 %v3731_v43, %v3730_v34  ;;  %3644 = vst.msk [vmem:[%s4818_s14 + $0x28] sm:$0xf] %vm513_vm5, %v4171_v27  ;;  %v3574_v12 = vpack.c.bf16 %v4433_v23, %v4431_v61  ;;  %v4170_v37 = vpack.c.bf16 %v4433_v23, %v4433_v23 }
 0x3a3   : > { %v4418_v6 = vpop.f32.mrb[12].mxu0  ;;  %v3680_v5 = vsel %vm3666_vm8, %v3657_v21, 0.0  ;;  %v3733_v15 = vsel %vm3666_vm8, %v3712_v46, 0.0  ;;  %3642 = vst.msk [vmem:[%s4818_s14 + $0x20] sm:$0xf] %vm513_vm5, %v4169_v51  ;;  %v3660_v1 = vunpack.c.l.bf16 %v3575_v55  ;;  %v3735_v42 = vsel %vm3666_vm8, %v3713_v30, 0.0 }
 0x3a4   : > { %3645 = vst.msk [vmem:[%s4818_s14 + $0x2c] sm:$0xf] %vm513_vm5, %v4172_v8  ;;  %v4346_v16 = vpop.f32.mrb[12].mxu1  ;;  %v3539_v36 = vpop.f32.mrb[13].mxu0  ;;  %v3734_v7 = vadd.f32 %v3733_v15, %v3732_v41  ;;  %3643 = vst.msk [vmem:[%s4818_s14 + $0x24] sm:$0xf] %vm513_vm5, %v4170_v37  ;;  %v3658_v18 = vunpack.c.l.bf16 %v3574_v12  ;;  %v3659_v60 = vunpack.c.h.bf16 %v3574_v12  ;;  %v3681_v3 = vadd.f32 %v3680_v5, %v3679_v44 }
 0x3a5   : > { %v2454_v25 = vpop.f32.mrb[13].mxu1  ;;  %v4419_v63 = vpop.f32.mrb[14].mxu0  ;;  %v3661_v9 = vunpack.c.h.bf16 %v3575_v55  ;;  %v3686_v47 = vsel %vm3666_vm8, %v3660_v1, 0.0  ;;  %v3716_v53 = vmul.f32 %v3660_v1, %v3660_v1  ;;  %v4434_v28 = vadd.f32 %v4418_v6, %v4346_v16 }
 0x3a6   : > { %v4347_v0 = vpop.f32.mrb[14].mxu1  ;;  %v3542_v26 = vpop.f32.mrb[15].mxu0  ;;  %v3682_v17 = vsel %vm3666_vm8, %v3658_v18, 0.0  ;;  %v3714_v48 = vmul.f32 %v3658_v18, %v3658_v18  ;;  %v3715_v33 = vmul.f32 %v3659_v60, %v3659_v60  ;;  %v3736_v49 = vadd.f32 %v3735_v42, %v3734_v7 }
 0x3a7   : > { %v2457_v35 = vpop.f32.mrb[15].mxu1  ;;  %v3683_v22 = vadd.f32 %v3682_v17, %v3681_v3  ;;  %v3684_v4 = vsel %vm3666_vm8, %v3659_v60, 0.0  ;;  %v4435_v45 = vadd.f32 %v3539_v36, %v2454_v25  ;;  %v4436_v29 = vadd.f32 %v4419_v63, %v4347_v0 }
 0x3a8   : > { %v3737_v14 = vsel %vm3666_vm8, %v3714_v48, 0.0  ;;  %v4437_v62 = vadd.f32 %v3542_v26, %v2457_v35  ;;  %v3717_v50 = vmul.f32 %v3661_v9, %v3661_v9  ;;  %v3739_v57 = vsel %vm3666_vm8, %v3715_v33, 0.0 }
 0x3a9   : > { %v3685_v21 = vadd.f32 %v3684_v4, %v3683_v22  ;;  %v3738_v2 = vadd.f32 %v3737_v14, %v3736_v49  ;;  %v4175_v10 = vpack.c.bf16 %v4434_v28, %v4434_v28  ;;  %v4173_v32 = vpack.c.bf16 %v4435_v45, %v4435_v45 }
 0x3aa   : > { %v3577_v19 = vpack.c.bf16 %v4436_v29, %v4434_v28  ;;  %v4176_v38 = vpack.c.bf16 %v4436_v29, %v4436_v29  ;;  %v3688_v11 = vsel %vm3666_vm8, %v3661_v9, 0.0  ;;  %v3741_v31 = vsel %vm3666_vm8, %v3716_v53, 0.0 }
 0x3ab   : > { %v3687_v39 = vadd.f32 %v3686_v47, %v3685_v21  ;;  %v3740_v20 = vadd.f32 %v3739_v57, %v3738_v2  ;;  %3648 = vst.msk [vmem:[%s4818_s14 + $0x38] sm:$0xf] %vm513_vm5, %v4175_v10  ;;  %3646 = vst.msk [vmem:[%s4818_s14 + $0x30] sm:$0xf] %vm513_vm5, %v4173_v32  ;;  %v3576_v40 = vpack.c.bf16 %v4437_v62, %v4435_v45  ;;  %v3743_v58 = vsel %vm3666_vm8, %v3717_v50, 0.0 }
 0x3ac   : > { %v4174_v46 = vpack.c.bf16 %v4437_v62, %v4437_v62  ;;  %3649 = vst.msk [vmem:[%s4818_s14 + $0x3c] sm:$0xf] %vm513_vm5, %v4176_v38  ;;  %v3664_v59 = vunpack.c.l.bf16 %v3577_v19  ;;  %v3665_v61 = vunpack.c.h.bf16 %v3577_v19 }
 0x3ad   : > { %v3742_v30 = vadd.f32 %v3741_v31, %v3740_v20  ;;  %v3689_v24 = vadd.f32 %v3688_v11, %v3687_v39  ;;  %v3662_v54 = vunpack.c.l.bf16 %v3576_v40  ;;  %v3663_v13 = vunpack.c.h.bf16 %v3576_v40 }
 0x3ae   : > { %3647 = vst.msk [vmem:[%s4818_s14 + $0x34] sm:$0xf] %vm513_vm5, %v4174_v46  ;;  %v3720_v43 = vmul.f32 %v3664_v59, %v3664_v59  ;;  %v3694_v41 = vsel %vm3666_vm8, %v3664_v59, 0.0  ;;  %v3721_v12 = vmul.f32 %v3665_v61, %v3665_v61  ;;  %v3696_v15 = vsel %vm3666_vm8, %v3665_v61, 0.0 }
 0x3af   : > { %v3690_v52 = vsel %vm3666_vm8, %v3662_v54, 0.0  ;;  %v3718_v56 = vmul.f32 %v3662_v54, %v3662_v54  ;;  %v3719_v34 = vmul.f32 %v3663_v13, %v3663_v13  ;;  %v3744_v23 = vadd.f32 %v3743_v58, %v3742_v30 }
 0x3b0   : > { %v3691_v27 = vadd.f32 %v3690_v52, %v3689_v24  ;;  %v3692_v51 = vsel %vm3666_vm8, %v3663_v13, 0.0  ;;  %v3749_v1 = vsel %vm3666_vm8, %v3720_v43, 0.0  ;;  %v3751_v7 = vsel %vm3666_vm8, %v3721_v12, 0.0 }
 0x3b1   : > { %v3745_v55 = vsel %vm3666_vm8, %v3718_v56, 0.0  ;;  %v3747_v37 = vsel %vm3666_vm8, %v3719_v34, 0.0 }
 0x3b2   : > { %v3693_v8 = vadd.f32 %v3692_v51, %v3691_v27  ;;  %v3746_v44 = vadd.f32 %v3745_v55, %v3744_v23 }
 0x3b4   : > { %v3695_v6 = vadd.f32 %v3694_v41, %v3693_v8  ;;  %v3748_v5 = vadd.f32 %v3747_v37, %v3746_v44 }
 0x3b6   : > { %v3697_v16 = vadd.f32 %v3696_v15, %v3695_v6  ;;  %v3750_v36 = vadd.f32 %v3749_v1, %v3748_v5 }
 0x3b8   : > { %v3698_v18 = vrot.slane %v3697_v16, 4  ;;  %v3752_v60 = vadd.f32 %v3751_v7, %v3750_v36 }
 0x3ba   : > { %v3699_v3 = vadd.f32 %v3698_v18, %v3697_v16  ;;  %v3753_v25 = vrot.slane %v3752_v60, 4 }
 0x3bc   : > { %v3700_v63 = vrot.slane %v3699_v3, 2  ;;  %v3754_v42 = vadd.f32 %v3753_v25, %v3752_v60 }
 0x3be   : > { %v3701_v0 = vadd.f32 %v3700_v63, %v3699_v3  ;;  %v3755_v26 = vrot.slane %v3754_v42, 2 }
 0x3c0   : > { %v3702_v9 = vrot.slane %v3701_v0, 1  ;;  %v3756_v17 = vadd.f32 %v3755_v26, %v3754_v42 }
 0x3c2   : > { %v3703_v48 = vadd.f32 %v3702_v9, %v3701_v0  ;;  %v3757_v33 = vrot.slane %v3756_v17, 1 }
 0x3c4   : > { %3705 = vst.msk [vmem:[%s4842_s28] sm:$0x1] %vm266_vm0, %v3703_v48  ;;  %v3758_v35 = vadd.f32 %v3757_v33, %v3756_v17 }
 0x3c6   : > { %3759 = vst.msk [vmem:[%s4842_s28 + $0x1] sm:$0x1] %vm266_vm0, %v3758_v35 }
 0x3c7 PF: > { %s15_s19 = sadd.s32 1, %s4670_s19   ;;  %s6111_s15 = smov %s4662_s17 }
 0x3c8   : > { %p12_p12 = scmp.ge.s32.totalorder %s15_s19, 6   ;;  %s6112_s16 = smov %s4666_s18 }
 0x3c9   : > { %s6113_s17 = smov %s6116_s20  ;;  %s6114_s18 = smov %s6120_s21 }
 0x3ca   :  { %14 = sbr.rel (!%p12_p12) target bundleno = 3 (0x3), region = 121 }

</bundles_post_ra>
